<compile_context>
chip_gen: v7x
topology: tpu7x:2x2x1
jax: 0.10.0
libtpu: 0.0.40
codegen_flags: <defaults>
</compile_context>

<pallas_src>
import functools

import jax
import jax.numpy as jnp
from jax import lax
from jax.experimental import pallas as pl
from jax.experimental.pallas import tpu as pltpu


# -----------------------------------------------------------------------------
# Pallas kernel: implicit conv (fused im2col) + InstanceNorm + LeakyReLU for a
# block of samples per grid step.
# -----------------------------------------------------------------------------
def convdown_kernel(w_sref, x_ref, o_ref, *, k, stride, eps, neg_slope):
    # w_sref: SMEM f32[C_out*C_in*k*k]   flattened OIHW conv weight
    # x_ref : VMEM [B, s*s*C_in, Hpp, Wpp]  stride-phase-decomposed padded input
    # o_ref : VMEM [B, C_out, Ho, Wo]       NCHW output block
    s = stride
    b, c_out, ho, wo = o_ref.shape
    c_in = x_ref.shape[1] // (s * s)

    # ---- convolution: unrolled taps, one f32 accumulator per output channel.
    per_o = [jnp.zeros((b, ho, wo), jnp.float32) for _ in range(c_out)]
    for ki in range(k):
        for kj in range(k):
            di, dj = ki // s, kj // s
            pbase = ((ki % s) * s + (kj % s)) * c_in
            for c in range(c_in):
                # unit-stride static slice of the phase plane == conv tap
                tap = x_ref[:, pbase + c, di:di + ho, dj:dj + wo].astype(
                    jnp.float32)                              # [B, Ho, Wo]
                for o in range(c_out):
                    w = w_sref[((o * c_in + c) * k + ki) * k + kj]
                    per_o[o] = per_o[o] + w * tap
    y = jnp.stack(per_o, axis=1)                              # [B, C_out, Ho, Wo]

    # ---- InstanceNorm2d (affine=False): per-sample / per-channel stats over
    # the spatial dims, biased variance, eps inside the sqrt, all f32.  The
    # result y is resident, so this is a single sweep over the data.
    inv_p = jnp.float32(1.0 / (ho * wo))
    ssum = jnp.sum(jnp.sum(y, axis=3, keepdims=True), axis=2, keepdims=True)
    mean = ssum * inv_p
    d = y - mean
    vsum = jnp.sum(jnp.sum(d * d, axis=3, keepdims=True), axis=2, keepdims=True)
    y_n = d * lax.rsqrt(vsum * inv_p + eps)

    # ---- LeakyReLU(0.2) and a single full-block store (output already NCHW).
    out = jnp.where(y_n >= 0, y_n, neg_slope * y_n)
    o_ref[...] = out.astype(o_ref.dtype)


# -----------------------------------------------------------------------------
# Wrapper: pad + stride-phase decomposition (input-sized), batching, pallas_call.
# -----------------------------------------------------------------------------
def conv_down_forward(x, weight, *, stride=2, padding=1, eps=1e-5,
                      neg_slope=0.2, block_n=None):
    """ConvDown forward.  x: [N, C_in, H, W] NCHW.  weight: [C_out, C_in, k, k]."""
    n, c_in, h, w = x.shape
    c_out, c_in_w, k, _ = weight.shape
    assert c_in_w == c_in
    s = stride
    ho = (h + 2 * padding - k) // s + 1
    wo = (w + 2 * padding - k) // s + 1

    # Pad + space-to-depth so every conv tap becomes a unit-stride slice:
    #   x_ph[n, (pi*s+pj)*C + c, i, j] = x_pad[n, c, s*i + pi, s*j + pj]
    hpp = (k - 1) // s + ho
    wpp = (k - 1) // s + wo
    hp2, wp2 = s * hpp, s * wpp
    canvas = jnp.zeros((n, c_in, hp2, wp2), dtype=x.dtype)
    h_hi = min(padding + h, hp2)
    w_hi = min(padding + w, wp2)
    canvas = canvas.at[:, :, padding:h_hi, padding:w_hi].set(
        x[:, :, :h_hi - padding, :w_hi - padding])
    x_ph = canvas.reshape(n, c_in, hpp, s, wpp, s)
    x_ph = x_ph.transpose(0, 3, 5, 1, 2, 4).reshape(n, s * s * c_in, hpp, wpp)

    # Samples per grid step: amortize per-step overhead, cap VMEM block bytes,
    # and keep >= 2 grid steps (when possible) so the "parallel" batch axis can
    # shard across TensorCores.
    per_sample_bytes = 4 * (s * s * c_in * hpp * wpp + c_out * ho * wo)
    if block_n is None:
        budget = 2 * 1024 * 1024
        block_n = max(1, min(n, budget // max(per_sample_bytes, 1)))
        if n >= 2:
            block_n = min(block_n, max(1, n // 2))
    n_pad = pl.cdiv(n, block_n) * block_n
    if n_pad != n:
        x_ph = jnp.pad(x_ph, ((0, n_pad - n), (0, 0), (0, 0), (0, 0)))

    w_flat = weight.astype(jnp.float32).reshape(-1)           # -> SMEM scalars

    vmem_limit = int(min(48 * 1024 * 1024,
                         max(8 * 1024 * 1024, 8 * block_n * per_sample_bytes)))

    kern = functools.partial(convdown_kernel, k=k, stride=s, eps=eps,
                             neg_slope=neg_slope)

    out = pl.pallas_call(
        kern,
        out_shape=jax.ShapeDtypeStruct((n_pad, c_out, ho, wo), x.dtype),
        grid=(n_pad // block_n,),
        in_specs=[
            pl.BlockSpec(memory_space=pltpu.MemorySpace.SMEM),  # conv weights
            pl.BlockSpec((block_n, s * s * c_in, hpp, wpp),
                         lambda b: (b, 0, 0, 0)),
        ],
        out_specs=pl.BlockSpec((block_n, c_out, ho, wo),
                               lambda b: (b, 0, 0, 0)),
        compiler_params=pltpu.CompilerParams(
            dimension_semantics=("parallel",),
            vmem_limit_bytes=vmem_limit),
    )(w_flat, x_ph)

    return out[:n]                       # already NCHW: [N, C_out, Ho, Wo]


# -----------------------------------------------------------------------------
# Pure-JAX reference for a sanity check.
# -----------------------------------------------------------------------------
def conv_down_ref(x, weight, *, stride=2, padding=1, eps=1e-5, neg_slope=0.2):
    y = lax.conv_general_dilated(
        x.astype(jnp.float32), weight.astype(jnp.float32),
        window_strides=(stride, stride),
        padding=((padding, padding), (padding, padding)),
        dimension_numbers=("NCHW", "OIHW", "NCHW"))
    mean = jnp.mean(y, axis=(2, 3), keepdims=True)
    var = jnp.mean((y - mean) ** 2, axis=(2, 3), keepdims=True)
    y_n = (y - mean) * lax.rsqrt(var + eps)
    return jnp.where(y_n >= 0, y_n, neg_slope * y_n).astype(x.dtype)


if __name__ == "__main__":
    # Shapes consistent with the module: in_c=4, out_c=8 (nf_mult=2),
    # kernel=3, stride=2, padding=1, layers=1, activ=True, bias=False.
    N, C_IN, H, W = 2, 4, 16, 16
    C_OUT, K = 8, 3

    key = jax.random.PRNGKey(0)
    kx, kw = jax.random.split(key)
    x = jax.random.normal(kx, (N, C_IN, H, W), dtype=jnp.float32)
    weight = 0.1 * jax.random.normal(kw, (C_OUT, C_IN, K, K), dtype=jnp.float32)

    out = jax.block_until_ready(conv_down_forward(x, weight, stride=2, padding=1))
    ref = jax.block_until_ready(conv_down_ref(x, weight, stride=2, padding=1))

    assert out.shape == (N, C_OUT, H // 2, W // 2), out.shape
    err = float(jnp.max(jnp.abs(out - ref)))
    assert err < 1e-3, err

    print("KERNEL_OK")
</pallas_src>

<mosaic_0001>
module attributes {stable_mosaic.version = 11 : i64} {
  func.func @convdown_kernel(%arg0: i32, %arg1: memref<288xf32, #tpu.memory_space<smem>>, %arg2: memref<1x16x9x9xf32, #tpu.memory_space<vmem>>, %arg3: memref<1x8x8x8xf32, #tpu.memory_space<vmem>>) attributes {dimension_semantics = [#tpu.dimension_semantics<parallel>], iteration_bounds = array<i64: 2>, scalar_prefetch = 0 : i64, scratch_operands = 0 : i64, tpu.core_type = #tpu.core_type<tc>, window_params = [{transform_indices = @transform_0, window_bounds = array<i64: 288>}, {transform_indices = @transform_1, window_bounds = array<i64: 1, 16, 9, 9>}, {transform_indices = @transform_2, window_bounds = array<i64: 1, 8, 8, 8>}]} {
    %cst = arith.constant 0.000000e+00 : f32
    %0 = vector.broadcast %cst : f32 to vector<1x8x8xf32>
    %cst_0 = arith.constant 0.000000e+00 : f32
    %1 = vector.broadcast %cst_0 : f32 to vector<1x8x8xf32>
    %cst_1 = arith.constant 0.000000e+00 : f32
    %2 = vector.broadcast %cst_1 : f32 to vector<1x8x8xf32>
    %cst_2 = arith.constant 0.000000e+00 : f32
    %3 = vector.broadcast %cst_2 : f32 to vector<1x8x8xf32>
    %cst_3 = arith.constant 0.000000e+00 : f32
    %4 = vector.broadcast %cst_3 : f32 to vector<1x8x8xf32>
    %cst_4 = arith.constant 0.000000e+00 : f32
    %5 = vector.broadcast %cst_4 : f32 to vector<1x8x8xf32>
    %cst_5 = arith.constant 0.000000e+00 : f32
    %6 = vector.broadcast %cst_5 : f32 to vector<1x8x8xf32>
    %cst_6 = arith.constant 0.000000e+00 : f32
    %7 = vector.broadcast %cst_6 : f32 to vector<1x8x8xf32>
    %c0 = arith.constant 0 : index
    %c0_7 = arith.constant 0 : index
    %c0_8 = arith.constant 0 : index
    %c0_9 = arith.constant 0 : index
    %8 = vector.load %arg2[%c0, %c0_7, %c0_8, %c0_9] : memref<1x16x9x9xf32, #tpu.memory_space<vmem>>, vector<1x1x8x8xf32>
    %9 = vector.shape_cast %8 : vector<1x1x8x8xf32> to vector<1x8x8xf32>
    %c0_10 = arith.constant 0 : index
    %10 = memref.load %arg1[%c0_10] : memref<288xf32, #tpu.memory_space<smem>>
    %11 = vector.broadcast %10 : f32 to vector<1x8x8xf32>
    %12 = arith.mulf %11, %9 : vector<1x8x8xf32>
    %13 = arith.addf %0, %12 : vector<1x8x8xf32>
    %c36 = arith.constant 36 : index
    %14 = memref.load %arg1[%c36] : memref<288xf32, #tpu.memory_space<smem>>
    %15 = vector.broadcast %14 : f32 to vector<1x8x8xf32>
    %16 = arith.mulf %15, %9 : vector<1x8x8xf32>
    %17 = arith.addf %1, %16 : vector<1x8x8xf32>
    %c72 = arith.constant 72 : index
    %18 = memref.load %arg1[%c72] : memref<288xf32, #tpu.memory_space<smem>>
    %19 = vector.broadcast %18 : f32 to vector<1x8x8xf32>
    %20 = arith.mulf %19, %9 : vector<1x8x8xf32>
    %21 = arith.addf %2, %20 : vector<1x8x8xf32>
    %c108 = arith.constant 108 : index
    %22 = memref.load %arg1[%c108] : memref<288xf32, #tpu.memory_space<smem>>
    %23 = vector.broadcast %22 : f32 to vector<1x8x8xf32>
    %24 = arith.mulf %23, %9 : vector<1x8x8xf32>
    %25 = arith.addf %3, %24 : vector<1x8x8xf32>
    %c144 = arith.constant 144 : index
    %26 = memref.load %arg1[%c144] : memref<288xf32, #tpu.memory_space<smem>>
    %27 = vector.broadcast %26 : f32 to vector<1x8x8xf32>
    %28 = arith.mulf %27, %9 : vector<1x8x8xf32>
    %29 = arith.addf %4, %28 : vector<1x8x8xf32>
    %c180 = arith.constant 180 : index
    %30 = memref.load %arg1[%c180] : memref<288xf32, #tpu.memory_space<smem>>
    %31 = vector.broadcast %30 : f32 to vector<1x8x8xf32>
    %32 = arith.mulf %31, %9 : vector<1x8x8xf32>
    %33 = arith.addf %5, %32 : vector<1x8x8xf32>
    %c216 = arith.constant 216 : index
    %34 = memref.load %arg1[%c216] : memref<288xf32, #tpu.memory_space<smem>>
    %35 = vector.broadcast %34 : f32 to vector<1x8x8xf32>
    %36 = arith.mulf %35, %9 : vector<1x8x8xf32>
    %37 = arith.addf %6, %36 : vector<1x8x8xf32>
    %c252 = arith.constant 252 : index
    %38 = memref.load %arg1[%c252] : memref<288xf32, #tpu.memory_space<smem>>
    %39 = vector.broadcast %38 : f32 to vector<1x8x8xf32>
    %40 = arith.mulf %39, %9 : vector<1x8x8xf32>
    %41 = arith.addf %7, %40 : vector<1x8x8xf32>
    %c0_11 = arith.constant 0 : index
    %c1 = arith.constant 1 : index
    %c0_12 = arith.constant 0 : index
    %c0_13 = arith.constant 0 : index
    %42 = vector.load %arg2[%c0_11, %c1, %c0_12, %c0_13] : memref<1x16x9x9xf32, #tpu.memory_space<vmem>>, vector<1x1x8x8xf32>
    %43 = vector.shape_cast %42 : vector<1x1x8x8xf32> to vector<1x8x8xf32>
    %c9 = arith.constant 9 : index
    %44 = memref.load %arg1[%c9] : memref<288xf32, #tpu.memory_space<smem>>
    %45 = vector.broadcast %44 : f32 to vector<1x8x8xf32>
    %46 = arith.mulf %45, %43 : vector<1x8x8xf32>
    %47 = arith.addf %13, %46 : vector<1x8x8xf32>
    %c45 = arith.constant 45 : index
    %48 = memref.load %arg1[%c45] : memref<288xf32, #tpu.memory_space<smem>>
    %49 = vector.broadcast %48 : f32 to vector<1x8x8xf32>
    %50 = arith.mulf %49, %43 : vector<1x8x8xf32>
    %51 = arith.addf %17, %50 : vector<1x8x8xf32>
    %c81 = arith.constant 81 : index
    %52 = memref.load %arg1[%c81] : memref<288xf32, #tpu.memory_space<smem>>
    %53 = vector.broadcast %52 : f32 to vector<1x8x8xf32>
    %54 = arith.mulf %53, %43 : vector<1x8x8xf32>
    %55 = arith.addf %21, %54 : vector<1x8x8xf32>
    %c117 = arith.constant 117 : index
    %56 = memref.load %arg1[%c117] : memref<288xf32, #tpu.memory_space<smem>>
    %57 = vector.broadcast %56 : f32 to vector<1x8x8xf32>
    %58 = arith.mulf %57, %43 : vector<1x8x8xf32>
    %59 = arith.addf %25, %58 : vector<1x8x8xf32>
    %c153 = arith.constant 153 : index
    %60 = memref.load %arg1[%c153] : memref<288xf32, #tpu.memory_space<smem>>
    %61 = vector.broadcast %60 : f32 to vector<1x8x8xf32>
    %62 = arith.mulf %61, %43 : vector<1x8x8xf32>
    %63 = arith.addf %29, %62 : vector<1x8x8xf32>
    %c189 = arith.constant 189 : index
    %64 = memref.load %arg1[%c189] : memref<288xf32, #tpu.memory_space<smem>>
    %65 = vector.broadcast %64 : f32 to vector<1x8x8xf32>
    %66 = arith.mulf %65, %43 : vector<1x8x8xf32>
    %67 = arith.addf %33, %66 : vector<1x8x8xf32>
    %c225 = arith.constant 225 : index
    %68 = memref.load %arg1[%c225] : memref<288xf32, #tpu.memory_space<smem>>
    %69 = vector.broadcast %68 : f32 to vector<1x8x8xf32>
    %70 = arith.mulf %69, %43 : vector<1x8x8xf32>
    %71 = arith.addf %37, %70 : vector<1x8x8xf32>
    %c261 = arith.constant 261 : index
    %72 = memref.load %arg1[%c261] : memref<288xf32, #tpu.memory_space<smem>>
    %73 = vector.broadcast %72 : f32 to vector<1x8x8xf32>
    %74 = arith.mulf %73, %43 : vector<1x8x8xf32>
    %75 = arith.addf %41, %74 : vector<1x8x8xf32>
    %c0_14 = arith.constant 0 : index
    %c2 = arith.constant 2 : index
    %c0_15 = arith.constant 0 : index
    %c0_16 = arith.constant 0 : index
    %76 = vector.load %arg2[%c0_14, %c2, %c0_15, %c0_16] : memref<1x16x9x9xf32, #tpu.memory_space<vmem>>, vector<1x1x8x8xf32>
    %77 = vector.shape_cast %76 : vector<1x1x8x8xf32> to vector<1x8x8xf32>
    %c18 = arith.constant 18 : index
    %78 = memref.load %arg1[%c18] : memref<288xf32, #tpu.memory_space<smem>>
    %79 = vector.broadcast %78 : f32 to vector<1x8x8xf32>
    %80 = arith.mulf %79, %77 : vector<1x8x8xf32>
    %81 = arith.addf %47, %80 : vector<1x8x8xf32>
    %c54 = arith.constant 54 : index
    %82 = memref.load %arg1[%c54] : memref<288xf32, #tpu.memory_space<smem>>
    %83 = vector.broadcast %82 : f32 to vector<1x8x8xf32>
    %84 = arith.mulf %83, %77 : vector<1x8x8xf32>
    %85 = arith.addf %51, %84 : vector<1x8x8xf32>
    %c90 = arith.constant 90 : index
    %86 = memref.load %arg1[%c90] : memref<288xf32, #tpu.memory_space<smem>>
    %87 = vector.broadcast %86 : f32 to vector<1x8x8xf32>
    %88 = arith.mulf %87, %77 : vector<1x8x8xf32>
    %89 = arith.addf %55, %88 : vector<1x8x8xf32>
    %c126 = arith.constant 126 : index
    %90 = memref.load %arg1[%c126] : memref<288xf32, #tpu.memory_space<smem>>
    %91 = vector.broadcast %90 : f32 to vector<1x8x8xf32>
    %92 = arith.mulf %91, %77 : vector<1x8x8xf32>
    %93 = arith.addf %59, %92 : vector<1x8x8xf32>
    %c162 = arith.constant 162 : index
    %94 = memref.load %arg1[%c162] : memref<288xf32, #tpu.memory_space<smem>>
    %95 = vector.broadcast %94 : f32 to vector<1x8x8xf32>
    %96 = arith.mulf %95, %77 : vector<1x8x8xf32>
    %97 = arith.addf %63, %96 : vector<1x8x8xf32>
    %c198 = arith.constant 198 : index
    %98 = memref.load %arg1[%c198] : memref<288xf32, #tpu.memory_space<smem>>
    %99 = vector.broadcast %98 : f32 to vector<1x8x8xf32>
    %100 = arith.mulf %99, %77 : vector<1x8x8xf32>
    %101 = arith.addf %67, %100 : vector<1x8x8xf32>
    %c234 = arith.constant 234 : index
    %102 = memref.load %arg1[%c234] : memref<288xf32, #tpu.memory_space<smem>>
    %103 = vector.broadcast %102 : f32 to vector<1x8x8xf32>
    %104 = arith.mulf %103, %77 : vector<1x8x8xf32>
    %105 = arith.addf %71, %104 : vector<1x8x8xf32>
    %c270 = arith.constant 270 : index
    %106 = memref.load %arg1[%c270] : memref<288xf32, #tpu.memory_space<smem>>
    %107 = vector.broadcast %106 : f32 to vector<1x8x8xf32>
    %108 = arith.mulf %107, %77 : vector<1x8x8xf32>
    %109 = arith.addf %75, %108 : vector<1x8x8xf32>
    %c0_17 = arith.constant 0 : index
    %c3 = arith.constant 3 : index
    %c0_18 = arith.constant 0 : index
    %c0_19 = arith.constant 0 : index
    %110 = vector.load %arg2[%c0_17, %c3, %c0_18, %c0_19] : memref<1x16x9x9xf32, #tpu.memory_space<vmem>>, vector<1x1x8x8xf32>
    %111 = vector.shape_cast %110 : vector<1x1x8x8xf32> to vector<1x8x8xf32>
    %c27 = arith.constant 27 : index
    %112 = memref.load %arg1[%c27] : memref<288xf32, #tpu.memory_space<smem>>
    %113 = vector.broadcast %112 : f32 to vector<1x8x8xf32>
    %114 = arith.mulf %113, %111 : vector<1x8x8xf32>
    %115 = arith.addf %81, %114 : vector<1x8x8xf32>
    %c63 = arith.constant 63 : index
    %116 = memref.load %arg1[%c63] : memref<288xf32, #tpu.memory_space<smem>>
    %117 = vector.broadcast %116 : f32 to vector<1x8x8xf32>
    %118 = arith.mulf %117, %111 : vector<1x8x8xf32>
    %119 = arith.addf %85, %118 : vector<1x8x8xf32>
    %c99 = arith.constant 99 : index
    %120 = memref.load %arg1[%c99] : memref<288xf32, #tpu.memory_space<smem>>
    %121 = vector.broadcast %120 : f32 to vector<1x8x8xf32>
    %122 = arith.mulf %121, %111 : vector<1x8x8xf32>
    %123 = arith.addf %89, %122 : vector<1x8x8xf32>
    %c135 = arith.constant 135 : index
    %124 = memref.load %arg1[%c135] : memref<288xf32, #tpu.memory_space<smem>>
    %125 = vector.broadcast %124 : f32 to vector<1x8x8xf32>
    %126 = arith.mulf %125, %111 : vector<1x8x8xf32>
    %127 = arith.addf %93, %126 : vector<1x8x8xf32>
    %c171 = arith.constant 171 : index
    %128 = memref.load %arg1[%c171] : memref<288xf32, #tpu.memory_space<smem>>
    %129 = vector.broadcast %128 : f32 to vector<1x8x8xf32>
    %130 = arith.mulf %129, %111 : vector<1x8x8xf32>
    %131 = arith.addf %97, %130 : vector<1x8x8xf32>
    %c207 = arith.constant 207 : index
    %132 = memref.load %arg1[%c207] : memref<288xf32, #tpu.memory_space<smem>>
    %133 = vector.broadcast %132 : f32 to vector<1x8x8xf32>
    %134 = arith.mulf %133, %111 : vector<1x8x8xf32>
    %135 = arith.addf %101, %134 : vector<1x8x8xf32>
    %c243 = arith.constant 243 : index
    %136 = memref.load %arg1[%c243] : memref<288xf32, #tpu.memory_space<smem>>
    %137 = vector.broadcast %136 : f32 to vector<1x8x8xf32>
    %138 = arith.mulf %137, %111 : vector<1x8x8xf32>
    %139 = arith.addf %105, %138 : vector<1x8x8xf32>
    %c279 = arith.constant 279 : index
    %140 = memref.load %arg1[%c279] : memref<288xf32, #tpu.memory_space<smem>>
    %141 = vector.broadcast %140 : f32 to vector<1x8x8xf32>
    %142 = arith.mulf %141, %111 : vector<1x8x8xf32>
    %143 = arith.addf %109, %142 : vector<1x8x8xf32>
    %c0_20 = arith.constant 0 : index
    %c4 = arith.constant 4 : index
    %c0_21 = arith.constant 0 : index
    %c0_22 = arith.constant 0 : index
    %144 = vector.load %arg2[%c0_20, %c4, %c0_21, %c0_22] : memref<1x16x9x9xf32, #tpu.memory_space<vmem>>, vector<1x1x8x8xf32>
    %145 = vector.shape_cast %144 : vector<1x1x8x8xf32> to vector<1x8x8xf32>
    %c1_23 = arith.constant 1 : index
    %146 = memref.load %arg1[%c1_23] : memref<288xf32, #tpu.memory_space<smem>>
    %147 = vector.broadcast %146 : f32 to vector<1x8x8xf32>
    %148 = arith.mulf %147, %145 : vector<1x8x8xf32>
    %149 = arith.addf %115, %148 : vector<1x8x8xf32>
    %c37 = arith.constant 37 : index
    %150 = memref.load %arg1[%c37] : memref<288xf32, #tpu.memory_space<smem>>
    %151 = vector.broadcast %150 : f32 to vector<1x8x8xf32>
    %152 = arith.mulf %151, %145 : vector<1x8x8xf32>
    %153 = arith.addf %119, %152 : vector<1x8x8xf32>
    %c73 = arith.constant 73 : index
    %154 = memref.load %arg1[%c73] : memref<288xf32, #tpu.memory_space<smem>>
    %155 = vector.broadcast %154 : f32 to vector<1x8x8xf32>
    %156 = arith.mulf %155, %145 : vector<1x8x8xf32>
    %157 = arith.addf %123, %156 : vector<1x8x8xf32>
    %c109 = arith.constant 109 : index
    %158 = memref.load %arg1[%c109] : memref<288xf32, #tpu.memory_space<smem>>
    %159 = vector.broadcast %158 : f32 to vector<1x8x8xf32>
    %160 = arith.mulf %159, %145 : vector<1x8x8xf32>
    %161 = arith.addf %127, %160 : vector<1x8x8xf32>
    %c145 = arith.constant 145 : index
    %162 = memref.load %arg1[%c145] : memref<288xf32, #tpu.memory_space<smem>>
    %163 = vector.broadcast %162 : f32 to vector<1x8x8xf32>
    %164 = arith.mulf %163, %145 : vector<1x8x8xf32>
    %165 = arith.addf %131, %164 : vector<1x8x8xf32>
    %c181 = arith.constant 181 : index
    %166 = memref.load %arg1[%c181] : memref<288xf32, #tpu.memory_space<smem>>
    %167 = vector.broadcast %166 : f32 to vector<1x8x8xf32>
    %168 = arith.mulf %167, %145 : vector<1x8x8xf32>
    %169 = arith.addf %135, %168 : vector<1x8x8xf32>
    %c217 = arith.constant 217 : index
    %170 = memref.load %arg1[%c217] : memref<288xf32, #tpu.memory_space<smem>>
    %171 = vector.broadcast %170 : f32 to vector<1x8x8xf32>
    %172 = arith.mulf %171, %145 : vector<1x8x8xf32>
    %173 = arith.addf %139, %172 : vector<1x8x8xf32>
    %c253 = arith.constant 253 : index
    %174 = memref.load %arg1[%c253] : memref<288xf32, #tpu.memory_space<smem>>
    %175 = vector.broadcast %174 : f32 to vector<1x8x8xf32>
    %176 = arith.mulf %175, %145 : vector<1x8x8xf32>
    %177 = arith.addf %143, %176 : vector<1x8x8xf32>
    %c0_24 = arith.constant 0 : index
    %c5 = arith.constant 5 : index
    %c0_25 = arith.constant 0 : index
    %c0_26 = arith.constant 0 : index
    %178 = vector.load %arg2[%c0_24, %c5, %c0_25, %c0_26] : memref<1x16x9x9xf32, #tpu.memory_space<vmem>>, vector<1x1x8x8xf32>
    %179 = vector.shape_cast %178 : vector<1x1x8x8xf32> to vector<1x8x8xf32>
    %c10 = arith.constant 10 : index
    %180 = memref.load %arg1[%c10] : memref<288xf32, #tpu.memory_space<smem>>
    %181 = vector.broadcast %180 : f32 to vector<1x8x8xf32>
    %182 = arith.mulf %181, %179 : vector<1x8x8xf32>
    %183 = arith.addf %149, %182 : vector<1x8x8xf32>
    %c46 = arith.constant 46 : index
    %184 = memref.load %arg1[%c46] : memref<288xf32, #tpu.memory_space<smem>>
    %185 = vector.broadcast %184 : f32 to vector<1x8x8xf32>
    %186 = arith.mulf %185, %179 : vector<1x8x8xf32>
    %187 = arith.addf %153, %186 : vector<1x8x8xf32>
    %c82 = arith.constant 82 : index
    %188 = memref.load %arg1[%c82] : memref<288xf32, #tpu.memory_space<smem>>
    %189 = vector.broadcast %188 : f32 to vector<1x8x8xf32>
    %190 = arith.mulf %189, %179 : vector<1x8x8xf32>
    %191 = arith.addf %157, %190 : vector<1x8x8xf32>
    %c118 = arith.constant 118 : index
    %192 = memref.load %arg1[%c118] : memref<288xf32, #tpu.memory_space<smem>>
    %193 = vector.broadcast %192 : f32 to vector<1x8x8xf32>
    %194 = arith.mulf %193, %179 : vector<1x8x8xf32>
    %195 = arith.addf %161, %194 : vector<1x8x8xf32>
    %c154 = arith.constant 154 : index
    %196 = memref.load %arg1[%c154] : memref<288xf32, #tpu.memory_space<smem>>
    %197 = vector.broadcast %196 : f32 to vector<1x8x8xf32>
    %198 = arith.mulf %197, %179 : vector<1x8x8xf32>
    %199 = arith.addf %165, %198 : vector<1x8x8xf32>
    %c190 = arith.constant 190 : index
    %200 = memref.load %arg1[%c190] : memref<288xf32, #tpu.memory_space<smem>>
    %201 = vector.broadcast %200 : f32 to vector<1x8x8xf32>
    %202 = arith.mulf %201, %179 : vector<1x8x8xf32>
    %203 = arith.addf %169, %202 : vector<1x8x8xf32>
    %c226 = arith.constant 226 : index
    %204 = memref.load %arg1[%c226] : memref<288xf32, #tpu.memory_space<smem>>
    %205 = vector.broadcast %204 : f32 to vector<1x8x8xf32>
    %206 = arith.mulf %205, %179 : vector<1x8x8xf32>
    %207 = arith.addf %173, %206 : vector<1x8x8xf32>
    %c262 = arith.constant 262 : index
    %208 = memref.load %arg1[%c262] : memref<288xf32, #tpu.memory_space<smem>>
    %209 = vector.broadcast %208 : f32 to vector<1x8x8xf32>
    %210 = arith.mulf %209, %179 : vector<1x8x8xf32>
    %211 = arith.addf %177, %210 : vector<1x8x8xf32>
    %c0_27 = arith.constant 0 : index
    %c6 = arith.constant 6 : index
    %c0_28 = arith.constant 0 : index
    %c0_29 = arith.constant 0 : index
    %212 = vector.load %arg2[%c0_27, %c6, %c0_28, %c0_29] : memref<1x16x9x9xf32, #tpu.memory_space<vmem>>, vector<1x1x8x8xf32>
    %213 = vector.shape_cast %212 : vector<1x1x8x8xf32> to vector<1x8x8xf32>
    %c19 = arith.constant 19 : index
    %214 = memref.load %arg1[%c19] : memref<288xf32, #tpu.memory_space<smem>>
    %215 = vector.broadcast %214 : f32 to vector<1x8x8xf32>
    %216 = arith.mulf %215, %213 : vector<1x8x8xf32>
    %217 = arith.addf %183, %216 : vector<1x8x8xf32>
    %c55 = arith.constant 55 : index
    %218 = memref.load %arg1[%c55] : memref<288xf32, #tpu.memory_space<smem>>
    %219 = vector.broadcast %218 : f32 to vector<1x8x8xf32>
    %220 = arith.mulf %219, %213 : vector<1x8x8xf32>
    %221 = arith.addf %187, %220 : vector<1x8x8xf32>
    %c91 = arith.constant 91 : index
    %222 = memref.load %arg1[%c91] : memref<288xf32, #tpu.memory_space<smem>>
    %223 = vector.broadcast %222 : f32 to vector<1x8x8xf32>
    %224 = arith.mulf %223, %213 : vector<1x8x8xf32>
    %225 = arith.addf %191, %224 : vector<1x8x8xf32>
    %c127 = arith.constant 127 : index
    %226 = memref.load %arg1[%c127] : memref<288xf32, #tpu.memory_space<smem>>
    %227 = vector.broadcast %226 : f32 to vector<1x8x8xf32>
    %228 = arith.mulf %227, %213 : vector<1x8x8xf32>
    %229 = arith.addf %195, %228 : vector<1x8x8xf32>
    %c163 = arith.constant 163 : index
    %230 = memref.load %arg1[%c163] : memref<288xf32, #tpu.memory_space<smem>>
    %231 = vector.broadcast %230 : f32 to vector<1x8x8xf32>
    %232 = arith.mulf %231, %213 : vector<1x8x8xf32>
    %233 = arith.addf %199, %232 : vector<1x8x8xf32>
    %c199 = arith.constant 199 : index
    %234 = memref.load %arg1[%c199] : memref<288xf32, #tpu.memory_space<smem>>
    %235 = vector.broadcast %234 : f32 to vector<1x8x8xf32>
    %236 = arith.mulf %235, %213 : vector<1x8x8xf32>
    %237 = arith.addf %203, %236 : vector<1x8x8xf32>
    %c235 = arith.constant 235 : index
    %238 = memref.load %arg1[%c235] : memref<288xf32, #tpu.memory_space<smem>>
    %239 = vector.broadcast %238 : f32 to vector<1x8x8xf32>
    %240 = arith.mulf %239, %213 : vector<1x8x8xf32>
    %241 = arith.addf %207, %240 : vector<1x8x8xf32>
    %c271 = arith.constant 271 : index
    %242 = memref.load %arg1[%c271] : memref<288xf32, #tpu.memory_space<smem>>
    %243 = vector.broadcast %242 : f32 to vector<1x8x8xf32>
    %244 = arith.mulf %243, %213 : vector<1x8x8xf32>
    %245 = arith.addf %211, %244 : vector<1x8x8xf32>
    %c0_30 = arith.constant 0 : index
    %c7 = arith.constant 7 : index
    %c0_31 = arith.constant 0 : index
    %c0_32 = arith.constant 0 : index
    %246 = vector.load %arg2[%c0_30, %c7, %c0_31, %c0_32] : memref<1x16x9x9xf32, #tpu.memory_space<vmem>>, vector<1x1x8x8xf32>
    %247 = vector.shape_cast %246 : vector<1x1x8x8xf32> to vector<1x8x8xf32>
    %c28 = arith.constant 28 : index
    %248 = memref.load %arg1[%c28] : memref<288xf32, #tpu.memory_space<smem>>
    %249 = vector.broadcast %248 : f32 to vector<1x8x8xf32>
    %250 = arith.mulf %249, %247 : vector<1x8x8xf32>
    %251 = arith.addf %217, %250 : vector<1x8x8xf32>
    %c64 = arith.constant 64 : index
    %252 = memref.load %arg1[%c64] : memref<288xf32, #tpu.memory_space<smem>>
    %253 = vector.broadcast %252 : f32 to vector<1x8x8xf32>
    %254 = arith.mulf %253, %247 : vector<1x8x8xf32>
    %255 = arith.addf %221, %254 : vector<1x8x8xf32>
    %c100 = arith.constant 100 : index
    %256 = memref.load %arg1[%c100] : memref<288xf32, #tpu.memory_space<smem>>
    %257 = vector.broadcast %256 : f32 to vector<1x8x8xf32>
    %258 = arith.mulf %257, %247 : vector<1x8x8xf32>
    %259 = arith.addf %225, %258 : vector<1x8x8xf32>
    %c136 = arith.constant 136 : index
    %260 = memref.load %arg1[%c136] : memref<288xf32, #tpu.memory_space<smem>>
    %261 = vector.broadcast %260 : f32 to vector<1x8x8xf32>
    %262 = arith.mulf %261, %247 : vector<1x8x8xf32>
    %263 = arith.addf %229, %262 : vector<1x8x8xf32>
    %c172 = arith.constant 172 : index
    %264 = memref.load %arg1[%c172] : memref<288xf32, #tpu.memory_space<smem>>
    %265 = vector.broadcast %264 : f32 to vector<1x8x8xf32>
    %266 = arith.mulf %265, %247 : vector<1x8x8xf32>
    %267 = arith.addf %233, %266 : vector<1x8x8xf32>
    %c208 = arith.constant 208 : index
    %268 = memref.load %arg1[%c208] : memref<288xf32, #tpu.memory_space<smem>>
    %269 = vector.broadcast %268 : f32 to vector<1x8x8xf32>
    %270 = arith.mulf %269, %247 : vector<1x8x8xf32>
    %271 = arith.addf %237, %270 : vector<1x8x8xf32>
    %c244 = arith.constant 244 : index
    %272 = memref.load %arg1[%c244] : memref<288xf32, #tpu.memory_space<smem>>
    %273 = vector.broadcast %272 : f32 to vector<1x8x8xf32>
    %274 = arith.mulf %273, %247 : vector<1x8x8xf32>
    %275 = arith.addf %241, %274 : vector<1x8x8xf32>
    %c280 = arith.constant 280 : index
    %276 = memref.load %arg1[%c280] : memref<288xf32, #tpu.memory_space<smem>>
    %277 = vector.broadcast %276 : f32 to vector<1x8x8xf32>
    %278 = arith.mulf %277, %247 : vector<1x8x8xf32>
    %279 = arith.addf %245, %278 : vector<1x8x8xf32>
    %c0_33 = arith.constant 0 : index
    %c0_34 = arith.constant 0 : index
    %c0_35 = arith.constant 0 : index
    %c1_36 = arith.constant 1 : index
    %280 = vector.load %arg2[%c0_33, %c0_34, %c0_35, %c1_36] : memref<1x16x9x9xf32, #tpu.memory_space<vmem>>, vector<1x1x8x8xf32>
    %281 = vector.shape_cast %280 : vector<1x1x8x8xf32> to vector<1x8x8xf32>
    %c2_37 = arith.constant 2 : index
    %282 = memref.load %arg1[%c2_37] : memref<288xf32, #tpu.memory_space<smem>>
    %283 = vector.broadcast %282 : f32 to vector<1x8x8xf32>
    %284 = arith.mulf %283, %281 : vector<1x8x8xf32>
    %285 = arith.addf %251, %284 : vector<1x8x8xf32>
    %c38 = arith.constant 38 : index
    %286 = memref.load %arg1[%c38] : memref<288xf32, #tpu.memory_space<smem>>
    %287 = vector.broadcast %286 : f32 to vector<1x8x8xf32>
    %288 = arith.mulf %287, %281 : vector<1x8x8xf32>
    %289 = arith.addf %255, %288 : vector<1x8x8xf32>
    %c74 = arith.constant 74 : index
    %290 = memref.load %arg1[%c74] : memref<288xf32, #tpu.memory_space<smem>>
    %291 = vector.broadcast %290 : f32 to vector<1x8x8xf32>
    %292 = arith.mulf %291, %281 : vector<1x8x8xf32>
    %293 = arith.addf %259, %292 : vector<1x8x8xf32>
    %c110 = arith.constant 110 : index
    %294 = memref.load %arg1[%c110] : memref<288xf32, #tpu.memory_space<smem>>
    %295 = vector.broadcast %294 : f32 to vector<1x8x8xf32>
    %296 = arith.mulf %295, %281 : vector<1x8x8xf32>
    %297 = arith.addf %263, %296 : vector<1x8x8xf32>
    %c146 = arith.constant 146 : index
    %298 = memref.load %arg1[%c146] : memref<288xf32, #tpu.memory_space<smem>>
    %299 = vector.broadcast %298 : f32 to vector<1x8x8xf32>
    %300 = arith.mulf %299, %281 : vector<1x8x8xf32>
    %301 = arith.addf %267, %300 : vector<1x8x8xf32>
    %c182 = arith.constant 182 : index
    %302 = memref.load %arg1[%c182] : memref<288xf32, #tpu.memory_space<smem>>
    %303 = vector.broadcast %302 : f32 to vector<1x8x8xf32>
    %304 = arith.mulf %303, %281 : vector<1x8x8xf32>
    %305 = arith.addf %271, %304 : vector<1x8x8xf32>
    %c218 = arith.constant 218 : index
    %306 = memref.load %arg1[%c218] : memref<288xf32, #tpu.memory_space<smem>>
    %307 = vector.broadcast %306 : f32 to vector<1x8x8xf32>
    %308 = arith.mulf %307, %281 : vector<1x8x8xf32>
    %309 = arith.addf %275, %308 : vector<1x8x8xf32>
    %c254 = arith.constant 254 : index
    %310 = memref.load %arg1[%c254] : memref<288xf32, #tpu.memory_space<smem>>
    %311 = vector.broadcast %310 : f32 to vector<1x8x8xf32>
    %312 = arith.mulf %311, %281 : vector<1x8x8xf32>
    %313 = arith.addf %279, %312 : vector<1x8x8xf32>
    %c0_38 = arith.constant 0 : index
    %c1_39 = arith.constant 1 : index
    %c0_40 = arith.constant 0 : index
    %c1_41 = arith.constant 1 : index
    %314 = vector.load %arg2[%c0_38, %c1_39, %c0_40, %c1_41] : memref<1x16x9x9xf32, #tpu.memory_space<vmem>>, vector<1x1x8x8xf32>
    %315 = vector.shape_cast %314 : vector<1x1x8x8xf32> to vector<1x8x8xf32>
    %c11 = arith.constant 11 : index
    %316 = memref.load %arg1[%c11] : memref<288xf32, #tpu.memory_space<smem>>
    %317 = vector.broadcast %316 : f32 to vector<1x8x8xf32>
    %318 = arith.mulf %317, %315 : vector<1x8x8xf32>
    %319 = arith.addf %285, %318 : vector<1x8x8xf32>
    %c47 = arith.constant 47 : index
    %320 = memref.load %arg1[%c47] : memref<288xf32, #tpu.memory_space<smem>>
    %321 = vector.broadcast %320 : f32 to vector<1x8x8xf32>
    %322 = arith.mulf %321, %315 : vector<1x8x8xf32>
    %323 = arith.addf %289, %322 : vector<1x8x8xf32>
    %c83 = arith.constant 83 : index
    %324 = memref.load %arg1[%c83] : memref<288xf32, #tpu.memory_space<smem>>
    %325 = vector.broadcast %324 : f32 to vector<1x8x8xf32>
    %326 = arith.mulf %325, %315 : vector<1x8x8xf32>
    %327 = arith.addf %293, %326 : vector<1x8x8xf32>
    %c119 = arith.constant 119 : index
    %328 = memref.load %arg1[%c119] : memref<288xf32, #tpu.memory_space<smem>>
    %329 = vector.broadcast %328 : f32 to vector<1x8x8xf32>
    %330 = arith.mulf %329, %315 : vector<1x8x8xf32>
    %331 = arith.addf %297, %330 : vector<1x8x8xf32>
    %c155 = arith.constant 155 : index
    %332 = memref.load %arg1[%c155] : memref<288xf32, #tpu.memory_space<smem>>
    %333 = vector.broadcast %332 : f32 to vector<1x8x8xf32>
    %334 = arith.mulf %333, %315 : vector<1x8x8xf32>
    %335 = arith.addf %301, %334 : vector<1x8x8xf32>
    %c191 = arith.constant 191 : index
    %336 = memref.load %arg1[%c191] : memref<288xf32, #tpu.memory_space<smem>>
    %337 = vector.broadcast %336 : f32 to vector<1x8x8xf32>
    %338 = arith.mulf %337, %315 : vector<1x8x8xf32>
    %339 = arith.addf %305, %338 : vector<1x8x8xf32>
    %c227 = arith.constant 227 : index
    %340 = memref.load %arg1[%c227] : memref<288xf32, #tpu.memory_space<smem>>
    %341 = vector.broadcast %340 : f32 to vector<1x8x8xf32>
    %342 = arith.mulf %341, %315 : vector<1x8x8xf32>
    %343 = arith.addf %309, %342 : vector<1x8x8xf32>
    %c263 = arith.constant 263 : index
    %344 = memref.load %arg1[%c263] : memref<288xf32, #tpu.memory_space<smem>>
    %345 = vector.broadcast %344 : f32 to vector<1x8x8xf32>
    %346 = arith.mulf %345, %315 : vector<1x8x8xf32>
    %347 = arith.addf %313, %346 : vector<1x8x8xf32>
    %c0_42 = arith.constant 0 : index
    %c2_43 = arith.constant 2 : index
    %c0_44 = arith.constant 0 : index
    %c1_45 = arith.constant 1 : index
    %348 = vector.load %arg2[%c0_42, %c2_43, %c0_44, %c1_45] : memref<1x16x9x9xf32, #tpu.memory_space<vmem>>, vector<1x1x8x8xf32>
    %349 = vector.shape_cast %348 : vector<1x1x8x8xf32> to vector<1x8x8xf32>
    %c20 = arith.constant 20 : index
    %350 = memref.load %arg1[%c20] : memref<288xf32, #tpu.memory_space<smem>>
    %351 = vector.broadcast %350 : f32 to vector<1x8x8xf32>
    %352 = arith.mulf %351, %349 : vector<1x8x8xf32>
    %353 = arith.addf %319, %352 : vector<1x8x8xf32>
    %c56 = arith.constant 56 : index
    %354 = memref.load %arg1[%c56] : memref<288xf32, #tpu.memory_space<smem>>
    %355 = vector.broadcast %354 : f32 to vector<1x8x8xf32>
    %356 = arith.mulf %355, %349 : vector<1x8x8xf32>
    %357 = arith.addf %323, %356 : vector<1x8x8xf32>
    %c92 = arith.constant 92 : index
    %358 = memref.load %arg1[%c92] : memref<288xf32, #tpu.memory_space<smem>>
    %359 = vector.broadcast %358 : f32 to vector<1x8x8xf32>
    %360 = arith.mulf %359, %349 : vector<1x8x8xf32>
    %361 = arith.addf %327, %360 : vector<1x8x8xf32>
    %c128 = arith.constant 128 : index
    %362 = memref.load %arg1[%c128] : memref<288xf32, #tpu.memory_space<smem>>
    %363 = vector.broadcast %362 : f32 to vector<1x8x8xf32>
    %364 = arith.mulf %363, %349 : vector<1x8x8xf32>
    %365 = arith.addf %331, %364 : vector<1x8x8xf32>
    %c164 = arith.constant 164 : index
    %366 = memref.load %arg1[%c164] : memref<288xf32, #tpu.memory_space<smem>>
    %367 = vector.broadcast %366 : f32 to vector<1x8x8xf32>
    %368 = arith.mulf %367, %349 : vector<1x8x8xf32>
    %369 = arith.addf %335, %368 : vector<1x8x8xf32>
    %c200 = arith.constant 200 : index
    %370 = memref.load %arg1[%c200] : memref<288xf32, #tpu.memory_space<smem>>
    %371 = vector.broadcast %370 : f32 to vector<1x8x8xf32>
    %372 = arith.mulf %371, %349 : vector<1x8x8xf32>
    %373 = arith.addf %339, %372 : vector<1x8x8xf32>
    %c236 = arith.constant 236 : index
    %374 = memref.load %arg1[%c236] : memref<288xf32, #tpu.memory_space<smem>>
    %375 = vector.broadcast %374 : f32 to vector<1x8x8xf32>
    %376 = arith.mulf %375, %349 : vector<1x8x8xf32>
    %377 = arith.addf %343, %376 : vector<1x8x8xf32>
    %c272 = arith.constant 272 : index
    %378 = memref.load %arg1[%c272] : memref<288xf32, #tpu.memory_space<smem>>
    %379 = vector.broadcast %378 : f32 to vector<1x8x8xf32>
    %380 = arith.mulf %379, %349 : vector<1x8x8xf32>
    %381 = arith.addf %347, %380 : vector<1x8x8xf32>
    %c0_46 = arith.constant 0 : index
    %c3_47 = arith.constant 3 : index
    %c0_48 = arith.constant 0 : index
    %c1_49 = arith.constant 1 : index
    %382 = vector.load %arg2[%c0_46, %c3_47, %c0_48, %c1_49] : memref<1x16x9x9xf32, #tpu.memory_space<vmem>>, vector<1x1x8x8xf32>
    %383 = vector.shape_cast %382 : vector<1x1x8x8xf32> to vector<1x8x8xf32>
    %c29 = arith.constant 29 : index
    %384 = memref.load %arg1[%c29] : memref<288xf32, #tpu.memory_space<smem>>
    %385 = vector.broadcast %384 : f32 to vector<1x8x8xf32>
    %386 = arith.mulf %385, %383 : vector<1x8x8xf32>
    %387 = arith.addf %353, %386 : vector<1x8x8xf32>
    %c65 = arith.constant 65 : index
    %388 = memref.load %arg1[%c65] : memref<288xf32, #tpu.memory_space<smem>>
    %389 = vector.broadcast %388 : f32 to vector<1x8x8xf32>
    %390 = arith.mulf %389, %383 : vector<1x8x8xf32>
    %391 = arith.addf %357, %390 : vector<1x8x8xf32>
    %c101 = arith.constant 101 : index
    %392 = memref.load %arg1[%c101] : memref<288xf32, #tpu.memory_space<smem>>
    %393 = vector.broadcast %392 : f32 to vector<1x8x8xf32>
    %394 = arith.mulf %393, %383 : vector<1x8x8xf32>
    %395 = arith.addf %361, %394 : vector<1x8x8xf32>
    %c137 = arith.constant 137 : index
    %396 = memref.load %arg1[%c137] : memref<288xf32, #tpu.memory_space<smem>>
    %397 = vector.broadcast %396 : f32 to vector<1x8x8xf32>
    %398 = arith.mulf %397, %383 : vector<1x8x8xf32>
    %399 = arith.addf %365, %398 : vector<1x8x8xf32>
    %c173 = arith.constant 173 : index
    %400 = memref.load %arg1[%c173] : memref<288xf32, #tpu.memory_space<smem>>
    %401 = vector.broadcast %400 : f32 to vector<1x8x8xf32>
    %402 = arith.mulf %401, %383 : vector<1x8x8xf32>
    %403 = arith.addf %369, %402 : vector<1x8x8xf32>
    %c209 = arith.constant 209 : index
    %404 = memref.load %arg1[%c209] : memref<288xf32, #tpu.memory_space<smem>>
    %405 = vector.broadcast %404 : f32 to vector<1x8x8xf32>
    %406 = arith.mulf %405, %383 : vector<1x8x8xf32>
    %407 = arith.addf %373, %406 : vector<1x8x8xf32>
    %c245 = arith.constant 245 : index
    %408 = memref.load %arg1[%c245] : memref<288xf32, #tpu.memory_space<smem>>
    %409 = vector.broadcast %408 : f32 to vector<1x8x8xf32>
    %410 = arith.mulf %409, %383 : vector<1x8x8xf32>
    %411 = arith.addf %377, %410 : vector<1x8x8xf32>
    %c281 = arith.constant 281 : index
    %412 = memref.load %arg1[%c281] : memref<288xf32, #tpu.memory_space<smem>>
    %413 = vector.broadcast %412 : f32 to vector<1x8x8xf32>
    %414 = arith.mulf %413, %383 : vector<1x8x8xf32>
    %415 = arith.addf %381, %414 : vector<1x8x8xf32>
    %c0_50 = arith.constant 0 : index
    %c8 = arith.constant 8 : index
    %c0_51 = arith.constant 0 : index
    %c0_52 = arith.constant 0 : index
    %416 = vector.load %arg2[%c0_50, %c8, %c0_51, %c0_52] : memref<1x16x9x9xf32, #tpu.memory_space<vmem>>, vector<1x1x8x8xf32>
    %417 = vector.shape_cast %416 : vector<1x1x8x8xf32> to vector<1x8x8xf32>
    %c3_53 = arith.constant 3 : index
    %418 = memref.load %arg1[%c3_53] : memref<288xf32, #tpu.memory_space<smem>>
    %419 = vector.broadcast %418 : f32 to vector<1x8x8xf32>
    %420 = arith.mulf %419, %417 : vector<1x8x8xf32>
    %421 = arith.addf %387, %420 : vector<1x8x8xf32>
    %c39 = arith.constant 39 : index
    %422 = memref.load %arg1[%c39] : memref<288xf32, #tpu.memory_space<smem>>
    %423 = vector.broadcast %422 : f32 to vector<1x8x8xf32>
    %424 = arith.mulf %423, %417 : vector<1x8x8xf32>
    %425 = arith.addf %391, %424 : vector<1x8x8xf32>
    %c75 = arith.constant 75 : index
    %426 = memref.load %arg1[%c75] : memref<288xf32, #tpu.memory_space<smem>>
    %427 = vector.broadcast %426 : f32 to vector<1x8x8xf32>
    %428 = arith.mulf %427, %417 : vector<1x8x8xf32>
    %429 = arith.addf %395, %428 : vector<1x8x8xf32>
    %c111 = arith.constant 111 : index
    %430 = memref.load %arg1[%c111] : memref<288xf32, #tpu.memory_space<smem>>
    %431 = vector.broadcast %430 : f32 to vector<1x8x8xf32>
    %432 = arith.mulf %431, %417 : vector<1x8x8xf32>
    %433 = arith.addf %399, %432 : vector<1x8x8xf32>
    %c147 = arith.constant 147 : index
    %434 = memref.load %arg1[%c147] : memref<288xf32, #tpu.memory_space<smem>>
    %435 = vector.broadcast %434 : f32 to vector<1x8x8xf32>
    %436 = arith.mulf %435, %417 : vector<1x8x8xf32>
    %437 = arith.addf %403, %436 : vector<1x8x8xf32>
    %c183 = arith.constant 183 : index
    %438 = memref.load %arg1[%c183] : memref<288xf32, #tpu.memory_space<smem>>
    %439 = vector.broadcast %438 : f32 to vector<1x8x8xf32>
    %440 = arith.mulf %439, %417 : vector<1x8x8xf32>
    %441 = arith.addf %407, %440 : vector<1x8x8xf32>
    %c219 = arith.constant 219 : index
    %442 = memref.load %arg1[%c219] : memref<288xf32, #tpu.memory_space<smem>>
    %443 = vector.broadcast %442 : f32 to vector<1x8x8xf32>
    %444 = arith.mulf %443, %417 : vector<1x8x8xf32>
    %445 = arith.addf %411, %444 : vector<1x8x8xf32>
    %c255 = arith.constant 255 : index
    %446 = memref.load %arg1[%c255] : memref<288xf32, #tpu.memory_space<smem>>
    %447 = vector.broadcast %446 : f32 to vector<1x8x8xf32>
    %448 = arith.mulf %447, %417 : vector<1x8x8xf32>
    %449 = arith.addf %415, %448 : vector<1x8x8xf32>
    %c0_54 = arith.constant 0 : index
    %c9_55 = arith.constant 9 : index
    %c0_56 = arith.constant 0 : index
    %c0_57 = arith.constant 0 : index
    %450 = vector.load %arg2[%c0_54, %c9_55, %c0_56, %c0_57] : memref<1x16x9x9xf32, #tpu.memory_space<vmem>>, vector<1x1x8x8xf32>
    %451 = vector.shape_cast %450 : vector<1x1x8x8xf32> to vector<1x8x8xf32>
    %c12 = arith.constant 12 : index
    %452 = memref.load %arg1[%c12] : memref<288xf32, #tpu.memory_space<smem>>
    %453 = vector.broadcast %452 : f32 to vector<1x8x8xf32>
    %454 = arith.mulf %453, %451 : vector<1x8x8xf32>
    %455 = arith.addf %421, %454 : vector<1x8x8xf32>
    %c48 = arith.constant 48 : index
    %456 = memref.load %arg1[%c48] : memref<288xf32, #tpu.memory_space<smem>>
    %457 = vector.broadcast %456 : f32 to vector<1x8x8xf32>
    %458 = arith.mulf %457, %451 : vector<1x8x8xf32>
    %459 = arith.addf %425, %458 : vector<1x8x8xf32>
    %c84 = arith.constant 84 : index
    %460 = memref.load %arg1[%c84] : memref<288xf32, #tpu.memory_space<smem>>
    %461 = vector.broadcast %460 : f32 to vector<1x8x8xf32>
    %462 = arith.mulf %461, %451 : vector<1x8x8xf32>
    %463 = arith.addf %429, %462 : vector<1x8x8xf32>
    %c120 = arith.constant 120 : index
    %464 = memref.load %arg1[%c120] : memref<288xf32, #tpu.memory_space<smem>>
    %465 = vector.broadcast %464 : f32 to vector<1x8x8xf32>
    %466 = arith.mulf %465, %451 : vector<1x8x8xf32>
    %467 = arith.addf %433, %466 : vector<1x8x8xf32>
    %c156 = arith.constant 156 : index
    %468 = memref.load %arg1[%c156] : memref<288xf32, #tpu.memory_space<smem>>
    %469 = vector.broadcast %468 : f32 to vector<1x8x8xf32>
    %470 = arith.mulf %469, %451 : vector<1x8x8xf32>
    %471 = arith.addf %437, %470 : vector<1x8x8xf32>
    %c192 = arith.constant 192 : index
    %472 = memref.load %arg1[%c192] : memref<288xf32, #tpu.memory_space<smem>>
    %473 = vector.broadcast %472 : f32 to vector<1x8x8xf32>
    %474 = arith.mulf %473, %451 : vector<1x8x8xf32>
    %475 = arith.addf %441, %474 : vector<1x8x8xf32>
    %c228 = arith.constant 228 : index
    %476 = memref.load %arg1[%c228] : memref<288xf32, #tpu.memory_space<smem>>
    %477 = vector.broadcast %476 : f32 to vector<1x8x8xf32>
    %478 = arith.mulf %477, %451 : vector<1x8x8xf32>
    %479 = arith.addf %445, %478 : vector<1x8x8xf32>
    %c264 = arith.constant 264 : index
    %480 = memref.load %arg1[%c264] : memref<288xf32, #tpu.memory_space<smem>>
    %481 = vector.broadcast %480 : f32 to vector<1x8x8xf32>
    %482 = arith.mulf %481, %451 : vector<1x8x8xf32>
    %483 = arith.addf %449, %482 : vector<1x8x8xf32>
    %c0_58 = arith.constant 0 : index
    %c10_59 = arith.constant 10 : index
    %c0_60 = arith.constant 0 : index
    %c0_61 = arith.constant 0 : index
    %484 = vector.load %arg2[%c0_58, %c10_59, %c0_60, %c0_61] : memref<1x16x9x9xf32, #tpu.memory_space<vmem>>, vector<1x1x8x8xf32>
    %485 = vector.shape_cast %484 : vector<1x1x8x8xf32> to vector<1x8x8xf32>
    %c21 = arith.constant 21 : index
    %486 = memref.load %arg1[%c21] : memref<288xf32, #tpu.memory_space<smem>>
    %487 = vector.broadcast %486 : f32 to vector<1x8x8xf32>
    %488 = arith.mulf %487, %485 : vector<1x8x8xf32>
    %489 = arith.addf %455, %488 : vector<1x8x8xf32>
    %c57 = arith.constant 57 : index
    %490 = memref.load %arg1[%c57] : memref<288xf32, #tpu.memory_space<smem>>
    %491 = vector.broadcast %490 : f32 to vector<1x8x8xf32>
    %492 = arith.mulf %491, %485 : vector<1x8x8xf32>
    %493 = arith.addf %459, %492 : vector<1x8x8xf32>
    %c93 = arith.constant 93 : index
    %494 = memref.load %arg1[%c93] : memref<288xf32, #tpu.memory_space<smem>>
    %495 = vector.broadcast %494 : f32 to vector<1x8x8xf32>
    %496 = arith.mulf %495, %485 : vector<1x8x8xf32>
    %497 = arith.addf %463, %496 : vector<1x8x8xf32>
    %c129 = arith.constant 129 : index
    %498 = memref.load %arg1[%c129] : memref<288xf32, #tpu.memory_space<smem>>
    %499 = vector.broadcast %498 : f32 to vector<1x8x8xf32>
    %500 = arith.mulf %499, %485 : vector<1x8x8xf32>
    %501 = arith.addf %467, %500 : vector<1x8x8xf32>
    %c165 = arith.constant 165 : index
    %502 = memref.load %arg1[%c165] : memref<288xf32, #tpu.memory_space<smem>>
    %503 = vector.broadcast %502 : f32 to vector<1x8x8xf32>
    %504 = arith.mulf %503, %485 : vector<1x8x8xf32>
    %505 = arith.addf %471, %504 : vector<1x8x8xf32>
    %c201 = arith.constant 201 : index
    %506 = memref.load %arg1[%c201] : memref<288xf32, #tpu.memory_space<smem>>
    %507 = vector.broadcast %506 : f32 to vector<1x8x8xf32>
    %508 = arith.mulf %507, %485 : vector<1x8x8xf32>
    %509 = arith.addf %475, %508 : vector<1x8x8xf32>
    %c237 = arith.constant 237 : index
    %510 = memref.load %arg1[%c237] : memref<288xf32, #tpu.memory_space<smem>>
    %511 = vector.broadcast %510 : f32 to vector<1x8x8xf32>
    %512 = arith.mulf %511, %485 : vector<1x8x8xf32>
    %513 = arith.addf %479, %512 : vector<1x8x8xf32>
    %c273 = arith.constant 273 : index
    %514 = memref.load %arg1[%c273] : memref<288xf32, #tpu.memory_space<smem>>
    %515 = vector.broadcast %514 : f32 to vector<1x8x8xf32>
    %516 = arith.mulf %515, %485 : vector<1x8x8xf32>
    %517 = arith.addf %483, %516 : vector<1x8x8xf32>
    %c0_62 = arith.constant 0 : index
    %c11_63 = arith.constant 11 : index
    %c0_64 = arith.constant 0 : index
    %c0_65 = arith.constant 0 : index
    %518 = vector.load %arg2[%c0_62, %c11_63, %c0_64, %c0_65] : memref<1x16x9x9xf32, #tpu.memory_space<vmem>>, vector<1x1x8x8xf32>
    %519 = vector.shape_cast %518 : vector<1x1x8x8xf32> to vector<1x8x8xf32>
    %c30 = arith.constant 30 : index
    %520 = memref.load %arg1[%c30] : memref<288xf32, #tpu.memory_space<smem>>
    %521 = vector.broadcast %520 : f32 to vector<1x8x8xf32>
    %522 = arith.mulf %521, %519 : vector<1x8x8xf32>
    %523 = arith.addf %489, %522 : vector<1x8x8xf32>
    %c66 = arith.constant 66 : index
    %524 = memref.load %arg1[%c66] : memref<288xf32, #tpu.memory_space<smem>>
    %525 = vector.broadcast %524 : f32 to vector<1x8x8xf32>
    %526 = arith.mulf %525, %519 : vector<1x8x8xf32>
    %527 = arith.addf %493, %526 : vector<1x8x8xf32>
    %c102 = arith.constant 102 : index
    %528 = memref.load %arg1[%c102] : memref<288xf32, #tpu.memory_space<smem>>
    %529 = vector.broadcast %528 : f32 to vector<1x8x8xf32>
    %530 = arith.mulf %529, %519 : vector<1x8x8xf32>
    %531 = arith.addf %497, %530 : vector<1x8x8xf32>
    %c138 = arith.constant 138 : index
    %532 = memref.load %arg1[%c138] : memref<288xf32, #tpu.memory_space<smem>>
    %533 = vector.broadcast %532 : f32 to vector<1x8x8xf32>
    %534 = arith.mulf %533, %519 : vector<1x8x8xf32>
    %535 = arith.addf %501, %534 : vector<1x8x8xf32>
    %c174 = arith.constant 174 : index
    %536 = memref.load %arg1[%c174] : memref<288xf32, #tpu.memory_space<smem>>
    %537 = vector.broadcast %536 : f32 to vector<1x8x8xf32>
    %538 = arith.mulf %537, %519 : vector<1x8x8xf32>
    %539 = arith.addf %505, %538 : vector<1x8x8xf32>
    %c210 = arith.constant 210 : index
    %540 = memref.load %arg1[%c210] : memref<288xf32, #tpu.memory_space<smem>>
    %541 = vector.broadcast %540 : f32 to vector<1x8x8xf32>
    %542 = arith.mulf %541, %519 : vector<1x8x8xf32>
    %543 = arith.addf %509, %542 : vector<1x8x8xf32>
    %c246 = arith.constant 246 : index
    %544 = memref.load %arg1[%c246] : memref<288xf32, #tpu.memory_space<smem>>
    %545 = vector.broadcast %544 : f32 to vector<1x8x8xf32>
    %546 = arith.mulf %545, %519 : vector<1x8x8xf32>
    %547 = arith.addf %513, %546 : vector<1x8x8xf32>
    %c282 = arith.constant 282 : index
    %548 = memref.load %arg1[%c282] : memref<288xf32, #tpu.memory_space<smem>>
    %549 = vector.broadcast %548 : f32 to vector<1x8x8xf32>
    %550 = arith.mulf %549, %519 : vector<1x8x8xf32>
    %551 = arith.addf %517, %550 : vector<1x8x8xf32>
    %c0_66 = arith.constant 0 : index
    %c12_67 = arith.constant 12 : index
    %c0_68 = arith.constant 0 : index
    %c0_69 = arith.constant 0 : index
    %552 = vector.load %arg2[%c0_66, %c12_67, %c0_68, %c0_69] : memref<1x16x9x9xf32, #tpu.memory_space<vmem>>, vector<1x1x8x8xf32>
    %553 = vector.shape_cast %552 : vector<1x1x8x8xf32> to vector<1x8x8xf32>
    %c4_70 = arith.constant 4 : index
    %554 = memref.load %arg1[%c4_70] : memref<288xf32, #tpu.memory_space<smem>>
    %555 = vector.broadcast %554 : f32 to vector<1x8x8xf32>
    %556 = arith.mulf %555, %553 : vector<1x8x8xf32>
    %557 = arith.addf %523, %556 : vector<1x8x8xf32>
    %c40 = arith.constant 40 : index
    %558 = memref.load %arg1[%c40] : memref<288xf32, #tpu.memory_space<smem>>
    %559 = vector.broadcast %558 : f32 to vector<1x8x8xf32>
    %560 = arith.mulf %559, %553 : vector<1x8x8xf32>
    %561 = arith.addf %527, %560 : vector<1x8x8xf32>
    %c76 = arith.constant 76 : index
    %562 = memref.load %arg1[%c76] : memref<288xf32, #tpu.memory_space<smem>>
    %563 = vector.broadcast %562 : f32 to vector<1x8x8xf32>
    %564 = arith.mulf %563, %553 : vector<1x8x8xf32>
    %565 = arith.addf %531, %564 : vector<1x8x8xf32>
    %c112 = arith.constant 112 : index
    %566 = memref.load %arg1[%c112] : memref<288xf32, #tpu.memory_space<smem>>
    %567 = vector.broadcast %566 : f32 to vector<1x8x8xf32>
    %568 = arith.mulf %567, %553 : vector<1x8x8xf32>
    %569 = arith.addf %535, %568 : vector<1x8x8xf32>
    %c148 = arith.constant 148 : index
    %570 = memref.load %arg1[%c148] : memref<288xf32, #tpu.memory_space<smem>>
    %571 = vector.broadcast %570 : f32 to vector<1x8x8xf32>
    %572 = arith.mulf %571, %553 : vector<1x8x8xf32>
    %573 = arith.addf %539, %572 : vector<1x8x8xf32>
    %c184 = arith.constant 184 : index
    %574 = memref.load %arg1[%c184] : memref<288xf32, #tpu.memory_space<smem>>
    %575 = vector.broadcast %574 : f32 to vector<1x8x8xf32>
    %576 = arith.mulf %575, %553 : vector<1x8x8xf32>
    %577 = arith.addf %543, %576 : vector<1x8x8xf32>
    %c220 = arith.constant 220 : index
    %578 = memref.load %arg1[%c220] : memref<288xf32, #tpu.memory_space<smem>>
    %579 = vector.broadcast %578 : f32 to vector<1x8x8xf32>
    %580 = arith.mulf %579, %553 : vector<1x8x8xf32>
    %581 = arith.addf %547, %580 : vector<1x8x8xf32>
    %c256 = arith.constant 256 : index
    %582 = memref.load %arg1[%c256] : memref<288xf32, #tpu.memory_space<smem>>
    %583 = vector.broadcast %582 : f32 to vector<1x8x8xf32>
    %584 = arith.mulf %583, %553 : vector<1x8x8xf32>
    %585 = arith.addf %551, %584 : vector<1x8x8xf32>
    %c0_71 = arith.constant 0 : index
    %c13 = arith.constant 13 : index
    %c0_72 = arith.constant 0 : index
    %c0_73 = arith.constant 0 : index
    %586 = vector.load %arg2[%c0_71, %c13, %c0_72, %c0_73] : memref<1x16x9x9xf32, #tpu.memory_space<vmem>>, vector<1x1x8x8xf32>
    %587 = vector.shape_cast %586 : vector<1x1x8x8xf32> to vector<1x8x8xf32>
    %c13_74 = arith.constant 13 : index
    %588 = memref.load %arg1[%c13_74] : memref<288xf32, #tpu.memory_space<smem>>
    %589 = vector.broadcast %588 : f32 to vector<1x8x8xf32>
    %590 = arith.mulf %589, %587 : vector<1x8x8xf32>
    %591 = arith.addf %557, %590 : vector<1x8x8xf32>
    %c49 = arith.constant 49 : index
    %592 = memref.load %arg1[%c49] : memref<288xf32, #tpu.memory_space<smem>>
    %593 = vector.broadcast %592 : f32 to vector<1x8x8xf32>
    %594 = arith.mulf %593, %587 : vector<1x8x8xf32>
    %595 = arith.addf %561, %594 : vector<1x8x8xf32>
    %c85 = arith.constant 85 : index
    %596 = memref.load %arg1[%c85] : memref<288xf32, #tpu.memory_space<smem>>
    %597 = vector.broadcast %596 : f32 to vector<1x8x8xf32>
    %598 = arith.mulf %597, %587 : vector<1x8x8xf32>
    %599 = arith.addf %565, %598 : vector<1x8x8xf32>
    %c121 = arith.constant 121 : index
    %600 = memref.load %arg1[%c121] : memref<288xf32, #tpu.memory_space<smem>>
    %601 = vector.broadcast %600 : f32 to vector<1x8x8xf32>
    %602 = arith.mulf %601, %587 : vector<1x8x8xf32>
    %603 = arith.addf %569, %602 : vector<1x8x8xf32>
    %c157 = arith.constant 157 : index
    %604 = memref.load %arg1[%c157] : memref<288xf32, #tpu.memory_space<smem>>
    %605 = vector.broadcast %604 : f32 to vector<1x8x8xf32>
    %606 = arith.mulf %605, %587 : vector<1x8x8xf32>
    %607 = arith.addf %573, %606 : vector<1x8x8xf32>
    %c193 = arith.constant 193 : index
    %608 = memref.load %arg1[%c193] : memref<288xf32, #tpu.memory_space<smem>>
    %609 = vector.broadcast %608 : f32 to vector<1x8x8xf32>
    %610 = arith.mulf %609, %587 : vector<1x8x8xf32>
    %611 = arith.addf %577, %610 : vector<1x8x8xf32>
    %c229 = arith.constant 229 : index
    %612 = memref.load %arg1[%c229] : memref<288xf32, #tpu.memory_space<smem>>
    %613 = vector.broadcast %612 : f32 to vector<1x8x8xf32>
    %614 = arith.mulf %613, %587 : vector<1x8x8xf32>
    %615 = arith.addf %581, %614 : vector<1x8x8xf32>
    %c265 = arith.constant 265 : index
    %616 = memref.load %arg1[%c265] : memref<288xf32, #tpu.memory_space<smem>>
    %617 = vector.broadcast %616 : f32 to vector<1x8x8xf32>
    %618 = arith.mulf %617, %587 : vector<1x8x8xf32>
    %619 = arith.addf %585, %618 : vector<1x8x8xf32>
    %c0_75 = arith.constant 0 : index
    %c14 = arith.constant 14 : index
    %c0_76 = arith.constant 0 : index
    %c0_77 = arith.constant 0 : index
    %620 = vector.load %arg2[%c0_75, %c14, %c0_76, %c0_77] : memref<1x16x9x9xf32, #tpu.memory_space<vmem>>, vector<1x1x8x8xf32>
    %621 = vector.shape_cast %620 : vector<1x1x8x8xf32> to vector<1x8x8xf32>
    %c22 = arith.constant 22 : index
    %622 = memref.load %arg1[%c22] : memref<288xf32, #tpu.memory_space<smem>>
    %623 = vector.broadcast %622 : f32 to vector<1x8x8xf32>
    %624 = arith.mulf %623, %621 : vector<1x8x8xf32>
    %625 = arith.addf %591, %624 : vector<1x8x8xf32>
    %c58 = arith.constant 58 : index
    %626 = memref.load %arg1[%c58] : memref<288xf32, #tpu.memory_space<smem>>
    %627 = vector.broadcast %626 : f32 to vector<1x8x8xf32>
    %628 = arith.mulf %627, %621 : vector<1x8x8xf32>
    %629 = arith.addf %595, %628 : vector<1x8x8xf32>
    %c94 = arith.constant 94 : index
    %630 = memref.load %arg1[%c94] : memref<288xf32, #tpu.memory_space<smem>>
    %631 = vector.broadcast %630 : f32 to vector<1x8x8xf32>
    %632 = arith.mulf %631, %621 : vector<1x8x8xf32>
    %633 = arith.addf %599, %632 : vector<1x8x8xf32>
    %c130 = arith.constant 130 : index
    %634 = memref.load %arg1[%c130] : memref<288xf32, #tpu.memory_space<smem>>
    %635 = vector.broadcast %634 : f32 to vector<1x8x8xf32>
    %636 = arith.mulf %635, %621 : vector<1x8x8xf32>
    %637 = arith.addf %603, %636 : vector<1x8x8xf32>
    %c166 = arith.constant 166 : index
    %638 = memref.load %arg1[%c166] : memref<288xf32, #tpu.memory_space<smem>>
    %639 = vector.broadcast %638 : f32 to vector<1x8x8xf32>
    %640 = arith.mulf %639, %621 : vector<1x8x8xf32>
    %641 = arith.addf %607, %640 : vector<1x8x8xf32>
    %c202 = arith.constant 202 : index
    %642 = memref.load %arg1[%c202] : memref<288xf32, #tpu.memory_space<smem>>
    %643 = vector.broadcast %642 : f32 to vector<1x8x8xf32>
    %644 = arith.mulf %643, %621 : vector<1x8x8xf32>
    %645 = arith.addf %611, %644 : vector<1x8x8xf32>
    %c238 = arith.constant 238 : index
    %646 = memref.load %arg1[%c238] : memref<288xf32, #tpu.memory_space<smem>>
    %647 = vector.broadcast %646 : f32 to vector<1x8x8xf32>
    %648 = arith.mulf %647, %621 : vector<1x8x8xf32>
    %649 = arith.addf %615, %648 : vector<1x8x8xf32>
    %c274 = arith.constant 274 : index
    %650 = memref.load %arg1[%c274] : memref<288xf32, #tpu.memory_space<smem>>
    %651 = vector.broadcast %650 : f32 to vector<1x8x8xf32>
    %652 = arith.mulf %651, %621 : vector<1x8x8xf32>
    %653 = arith.addf %619, %652 : vector<1x8x8xf32>
    %c0_78 = arith.constant 0 : index
    %c15 = arith.constant 15 : index
    %c0_79 = arith.constant 0 : index
    %c0_80 = arith.constant 0 : index
    %654 = vector.load %arg2[%c0_78, %c15, %c0_79, %c0_80] : memref<1x16x9x9xf32, #tpu.memory_space<vmem>>, vector<1x1x8x8xf32>
    %655 = vector.shape_cast %654 : vector<1x1x8x8xf32> to vector<1x8x8xf32>
    %c31 = arith.constant 31 : index
    %656 = memref.load %arg1[%c31] : memref<288xf32, #tpu.memory_space<smem>>
    %657 = vector.broadcast %656 : f32 to vector<1x8x8xf32>
    %658 = arith.mulf %657, %655 : vector<1x8x8xf32>
    %659 = arith.addf %625, %658 : vector<1x8x8xf32>
    %c67 = arith.constant 67 : index
    %660 = memref.load %arg1[%c67] : memref<288xf32, #tpu.memory_space<smem>>
    %661 = vector.broadcast %660 : f32 to vector<1x8x8xf32>
    %662 = arith.mulf %661, %655 : vector<1x8x8xf32>
    %663 = arith.addf %629, %662 : vector<1x8x8xf32>
    %c103 = arith.constant 103 : index
    %664 = memref.load %arg1[%c103] : memref<288xf32, #tpu.memory_space<smem>>
    %665 = vector.broadcast %664 : f32 to vector<1x8x8xf32>
    %666 = arith.mulf %665, %655 : vector<1x8x8xf32>
    %667 = arith.addf %633, %666 : vector<1x8x8xf32>
    %c139 = arith.constant 139 : index
    %668 = memref.load %arg1[%c139] : memref<288xf32, #tpu.memory_space<smem>>
    %669 = vector.broadcast %668 : f32 to vector<1x8x8xf32>
    %670 = arith.mulf %669, %655 : vector<1x8x8xf32>
    %671 = arith.addf %637, %670 : vector<1x8x8xf32>
    %c175 = arith.constant 175 : index
    %672 = memref.load %arg1[%c175] : memref<288xf32, #tpu.memory_space<smem>>
    %673 = vector.broadcast %672 : f32 to vector<1x8x8xf32>
    %674 = arith.mulf %673, %655 : vector<1x8x8xf32>
    %675 = arith.addf %641, %674 : vector<1x8x8xf32>
    %c211 = arith.constant 211 : index
    %676 = memref.load %arg1[%c211] : memref<288xf32, #tpu.memory_space<smem>>
    %677 = vector.broadcast %676 : f32 to vector<1x8x8xf32>
    %678 = arith.mulf %677, %655 : vector<1x8x8xf32>
    %679 = arith.addf %645, %678 : vector<1x8x8xf32>
    %c247 = arith.constant 247 : index
    %680 = memref.load %arg1[%c247] : memref<288xf32, #tpu.memory_space<smem>>
    %681 = vector.broadcast %680 : f32 to vector<1x8x8xf32>
    %682 = arith.mulf %681, %655 : vector<1x8x8xf32>
    %683 = arith.addf %649, %682 : vector<1x8x8xf32>
    %c283 = arith.constant 283 : index
    %684 = memref.load %arg1[%c283] : memref<288xf32, #tpu.memory_space<smem>>
    %685 = vector.broadcast %684 : f32 to vector<1x8x8xf32>
    %686 = arith.mulf %685, %655 : vector<1x8x8xf32>
    %687 = arith.addf %653, %686 : vector<1x8x8xf32>
    %c0_81 = arith.constant 0 : index
    %c8_82 = arith.constant 8 : index
    %c0_83 = arith.constant 0 : index
    %c1_84 = arith.constant 1 : index
    %688 = vector.load %arg2[%c0_81, %c8_82, %c0_83, %c1_84] : memref<1x16x9x9xf32, #tpu.memory_space<vmem>>, vector<1x1x8x8xf32>
    %689 = vector.shape_cast %688 : vector<1x1x8x8xf32> to vector<1x8x8xf32>
    %c5_85 = arith.constant 5 : index
    %690 = memref.load %arg1[%c5_85] : memref<288xf32, #tpu.memory_space<smem>>
    %691 = vector.broadcast %690 : f32 to vector<1x8x8xf32>
    %692 = arith.mulf %691, %689 : vector<1x8x8xf32>
    %693 = arith.addf %659, %692 : vector<1x8x8xf32>
    %c41 = arith.constant 41 : index
    %694 = memref.load %arg1[%c41] : memref<288xf32, #tpu.memory_space<smem>>
    %695 = vector.broadcast %694 : f32 to vector<1x8x8xf32>
    %696 = arith.mulf %695, %689 : vector<1x8x8xf32>
    %697 = arith.addf %663, %696 : vector<1x8x8xf32>
    %c77 = arith.constant 77 : index
    %698 = memref.load %arg1[%c77] : memref<288xf32, #tpu.memory_space<smem>>
    %699 = vector.broadcast %698 : f32 to vector<1x8x8xf32>
    %700 = arith.mulf %699, %689 : vector<1x8x8xf32>
    %701 = arith.addf %667, %700 : vector<1x8x8xf32>
    %c113 = arith.constant 113 : index
    %702 = memref.load %arg1[%c113] : memref<288xf32, #tpu.memory_space<smem>>
    %703 = vector.broadcast %702 : f32 to vector<1x8x8xf32>
    %704 = arith.mulf %703, %689 : vector<1x8x8xf32>
    %705 = arith.addf %671, %704 : vector<1x8x8xf32>
    %c149 = arith.constant 149 : index
    %706 = memref.load %arg1[%c149] : memref<288xf32, #tpu.memory_space<smem>>
    %707 = vector.broadcast %706 : f32 to vector<1x8x8xf32>
    %708 = arith.mulf %707, %689 : vector<1x8x8xf32>
    %709 = arith.addf %675, %708 : vector<1x8x8xf32>
    %c185 = arith.constant 185 : index
    %710 = memref.load %arg1[%c185] : memref<288xf32, #tpu.memory_space<smem>>
    %711 = vector.broadcast %710 : f32 to vector<1x8x8xf32>
    %712 = arith.mulf %711, %689 : vector<1x8x8xf32>
    %713 = arith.addf %679, %712 : vector<1x8x8xf32>
    %c221 = arith.constant 221 : index
    %714 = memref.load %arg1[%c221] : memref<288xf32, #tpu.memory_space<smem>>
    %715 = vector.broadcast %714 : f32 to vector<1x8x8xf32>
    %716 = arith.mulf %715, %689 : vector<1x8x8xf32>
    %717 = arith.addf %683, %716 : vector<1x8x8xf32>
    %c257 = arith.constant 257 : index
    %718 = memref.load %arg1[%c257] : memref<288xf32, #tpu.memory_space<smem>>
    %719 = vector.broadcast %718 : f32 to vector<1x8x8xf32>
    %720 = arith.mulf %719, %689 : vector<1x8x8xf32>
    %721 = arith.addf %687, %720 : vector<1x8x8xf32>
    %c0_86 = arith.constant 0 : index
    %c9_87 = arith.constant 9 : index
    %c0_88 = arith.constant 0 : index
    %c1_89 = arith.constant 1 : index
    %722 = vector.load %arg2[%c0_86, %c9_87, %c0_88, %c1_89] : memref<1x16x9x9xf32, #tpu.memory_space<vmem>>, vector<1x1x8x8xf32>
    %723 = vector.shape_cast %722 : vector<1x1x8x8xf32> to vector<1x8x8xf32>
    %c14_90 = arith.constant 14 : index
    %724 = memref.load %arg1[%c14_90] : memref<288xf32, #tpu.memory_space<smem>>
    %725 = vector.broadcast %724 : f32 to vector<1x8x8xf32>
    %726 = arith.mulf %725, %723 : vector<1x8x8xf32>
    %727 = arith.addf %693, %726 : vector<1x8x8xf32>
    %c50 = arith.constant 50 : index
    %728 = memref.load %arg1[%c50] : memref<288xf32, #tpu.memory_space<smem>>
    %729 = vector.broadcast %728 : f32 to vector<1x8x8xf32>
    %730 = arith.mulf %729, %723 : vector<1x8x8xf32>
    %731 = arith.addf %697, %730 : vector<1x8x8xf32>
    %c86 = arith.constant 86 : index
    %732 = memref.load %arg1[%c86] : memref<288xf32, #tpu.memory_space<smem>>
    %733 = vector.broadcast %732 : f32 to vector<1x8x8xf32>
    %734 = arith.mulf %733, %723 : vector<1x8x8xf32>
    %735 = arith.addf %701, %734 : vector<1x8x8xf32>
    %c122 = arith.constant 122 : index
    %736 = memref.load %arg1[%c122] : memref<288xf32, #tpu.memory_space<smem>>
    %737 = vector.broadcast %736 : f32 to vector<1x8x8xf32>
    %738 = arith.mulf %737, %723 : vector<1x8x8xf32>
    %739 = arith.addf %705, %738 : vector<1x8x8xf32>
    %c158 = arith.constant 158 : index
    %740 = memref.load %arg1[%c158] : memref<288xf32, #tpu.memory_space<smem>>
    %741 = vector.broadcast %740 : f32 to vector<1x8x8xf32>
    %742 = arith.mulf %741, %723 : vector<1x8x8xf32>
    %743 = arith.addf %709, %742 : vector<1x8x8xf32>
    %c194 = arith.constant 194 : index
    %744 = memref.load %arg1[%c194] : memref<288xf32, #tpu.memory_space<smem>>
    %745 = vector.broadcast %744 : f32 to vector<1x8x8xf32>
    %746 = arith.mulf %745, %723 : vector<1x8x8xf32>
    %747 = arith.addf %713, %746 : vector<1x8x8xf32>
    %c230 = arith.constant 230 : index
    %748 = memref.load %arg1[%c230] : memref<288xf32, #tpu.memory_space<smem>>
    %749 = vector.broadcast %748 : f32 to vector<1x8x8xf32>
    %750 = arith.mulf %749, %723 : vector<1x8x8xf32>
    %751 = arith.addf %717, %750 : vector<1x8x8xf32>
    %c266 = arith.constant 266 : index
    %752 = memref.load %arg1[%c266] : memref<288xf32, #tpu.memory_space<smem>>
    %753 = vector.broadcast %752 : f32 to vector<1x8x8xf32>
    %754 = arith.mulf %753, %723 : vector<1x8x8xf32>
    %755 = arith.addf %721, %754 : vector<1x8x8xf32>
    %c0_91 = arith.constant 0 : index
    %c10_92 = arith.constant 10 : index
    %c0_93 = arith.constant 0 : index
    %c1_94 = arith.constant 1 : index
    %756 = vector.load %arg2[%c0_91, %c10_92, %c0_93, %c1_94] : memref<1x16x9x9xf32, #tpu.memory_space<vmem>>, vector<1x1x8x8xf32>
    %757 = vector.shape_cast %756 : vector<1x1x8x8xf32> to vector<1x8x8xf32>
    %c23 = arith.constant 23 : index
    %758 = memref.load %arg1[%c23] : memref<288xf32, #tpu.memory_space<smem>>
    %759 = vector.broadcast %758 : f32 to vector<1x8x8xf32>
    %760 = arith.mulf %759, %757 : vector<1x8x8xf32>
    %761 = arith.addf %727, %760 : vector<1x8x8xf32>
    %c59 = arith.constant 59 : index
    %762 = memref.load %arg1[%c59] : memref<288xf32, #tpu.memory_space<smem>>
    %763 = vector.broadcast %762 : f32 to vector<1x8x8xf32>
    %764 = arith.mulf %763, %757 : vector<1x8x8xf32>
    %765 = arith.addf %731, %764 : vector<1x8x8xf32>
    %c95 = arith.constant 95 : index
    %766 = memref.load %arg1[%c95] : memref<288xf32, #tpu.memory_space<smem>>
    %767 = vector.broadcast %766 : f32 to vector<1x8x8xf32>
    %768 = arith.mulf %767, %757 : vector<1x8x8xf32>
    %769 = arith.addf %735, %768 : vector<1x8x8xf32>
    %c131 = arith.constant 131 : index
    %770 = memref.load %arg1[%c131] : memref<288xf32, #tpu.memory_space<smem>>
    %771 = vector.broadcast %770 : f32 to vector<1x8x8xf32>
    %772 = arith.mulf %771, %757 : vector<1x8x8xf32>
    %773 = arith.addf %739, %772 : vector<1x8x8xf32>
    %c167 = arith.constant 167 : index
    %774 = memref.load %arg1[%c167] : memref<288xf32, #tpu.memory_space<smem>>
    %775 = vector.broadcast %774 : f32 to vector<1x8x8xf32>
    %776 = arith.mulf %775, %757 : vector<1x8x8xf32>
    %777 = arith.addf %743, %776 : vector<1x8x8xf32>
    %c203 = arith.constant 203 : index
    %778 = memref.load %arg1[%c203] : memref<288xf32, #tpu.memory_space<smem>>
    %779 = vector.broadcast %778 : f32 to vector<1x8x8xf32>
    %780 = arith.mulf %779, %757 : vector<1x8x8xf32>
    %781 = arith.addf %747, %780 : vector<1x8x8xf32>
    %c239 = arith.constant 239 : index
    %782 = memref.load %arg1[%c239] : memref<288xf32, #tpu.memory_space<smem>>
    %783 = vector.broadcast %782 : f32 to vector<1x8x8xf32>
    %784 = arith.mulf %783, %757 : vector<1x8x8xf32>
    %785 = arith.addf %751, %784 : vector<1x8x8xf32>
    %c275 = arith.constant 275 : index
    %786 = memref.load %arg1[%c275] : memref<288xf32, #tpu.memory_space<smem>>
    %787 = vector.broadcast %786 : f32 to vector<1x8x8xf32>
    %788 = arith.mulf %787, %757 : vector<1x8x8xf32>
    %789 = arith.addf %755, %788 : vector<1x8x8xf32>
    %c0_95 = arith.constant 0 : index
    %c11_96 = arith.constant 11 : index
    %c0_97 = arith.constant 0 : index
    %c1_98 = arith.constant 1 : index
    %790 = vector.load %arg2[%c0_95, %c11_96, %c0_97, %c1_98] : memref<1x16x9x9xf32, #tpu.memory_space<vmem>>, vector<1x1x8x8xf32>
    %791 = vector.shape_cast %790 : vector<1x1x8x8xf32> to vector<1x8x8xf32>
    %c32 = arith.constant 32 : index
    %792 = memref.load %arg1[%c32] : memref<288xf32, #tpu.memory_space<smem>>
    %793 = vector.broadcast %792 : f32 to vector<1x8x8xf32>
    %794 = arith.mulf %793, %791 : vector<1x8x8xf32>
    %795 = arith.addf %761, %794 : vector<1x8x8xf32>
    %c68 = arith.constant 68 : index
    %796 = memref.load %arg1[%c68] : memref<288xf32, #tpu.memory_space<smem>>
    %797 = vector.broadcast %796 : f32 to vector<1x8x8xf32>
    %798 = arith.mulf %797, %791 : vector<1x8x8xf32>
    %799 = arith.addf %765, %798 : vector<1x8x8xf32>
    %c104 = arith.constant 104 : index
    %800 = memref.load %arg1[%c104] : memref<288xf32, #tpu.memory_space<smem>>
    %801 = vector.broadcast %800 : f32 to vector<1x8x8xf32>
    %802 = arith.mulf %801, %791 : vector<1x8x8xf32>
    %803 = arith.addf %769, %802 : vector<1x8x8xf32>
    %c140 = arith.constant 140 : index
    %804 = memref.load %arg1[%c140] : memref<288xf32, #tpu.memory_space<smem>>
    %805 = vector.broadcast %804 : f32 to vector<1x8x8xf32>
    %806 = arith.mulf %805, %791 : vector<1x8x8xf32>
    %807 = arith.addf %773, %806 : vector<1x8x8xf32>
    %c176 = arith.constant 176 : index
    %808 = memref.load %arg1[%c176] : memref<288xf32, #tpu.memory_space<smem>>
    %809 = vector.broadcast %808 : f32 to vector<1x8x8xf32>
    %810 = arith.mulf %809, %791 : vector<1x8x8xf32>
    %811 = arith.addf %777, %810 : vector<1x8x8xf32>
    %c212 = arith.constant 212 : index
    %812 = memref.load %arg1[%c212] : memref<288xf32, #tpu.memory_space<smem>>
    %813 = vector.broadcast %812 : f32 to vector<1x8x8xf32>
    %814 = arith.mulf %813, %791 : vector<1x8x8xf32>
    %815 = arith.addf %781, %814 : vector<1x8x8xf32>
    %c248 = arith.constant 248 : index
    %816 = memref.load %arg1[%c248] : memref<288xf32, #tpu.memory_space<smem>>
    %817 = vector.broadcast %816 : f32 to vector<1x8x8xf32>
    %818 = arith.mulf %817, %791 : vector<1x8x8xf32>
    %819 = arith.addf %785, %818 : vector<1x8x8xf32>
    %c284 = arith.constant 284 : index
    %820 = memref.load %arg1[%c284] : memref<288xf32, #tpu.memory_space<smem>>
    %821 = vector.broadcast %820 : f32 to vector<1x8x8xf32>
    %822 = arith.mulf %821, %791 : vector<1x8x8xf32>
    %823 = arith.addf %789, %822 : vector<1x8x8xf32>
    %c0_99 = arith.constant 0 : index
    %c0_100 = arith.constant 0 : index
    %c1_101 = arith.constant 1 : index
    %c0_102 = arith.constant 0 : index
    %824 = vector.load %arg2[%c0_99, %c0_100, %c1_101, %c0_102] : memref<1x16x9x9xf32, #tpu.memory_space<vmem>>, vector<1x1x8x8xf32>
    %825 = vector.shape_cast %824 : vector<1x1x8x8xf32> to vector<1x8x8xf32>
    %c6_103 = arith.constant 6 : index
    %826 = memref.load %arg1[%c6_103] : memref<288xf32, #tpu.memory_space<smem>>
    %827 = vector.broadcast %826 : f32 to vector<1x8x8xf32>
    %828 = arith.mulf %827, %825 : vector<1x8x8xf32>
    %829 = arith.addf %795, %828 : vector<1x8x8xf32>
    %c42 = arith.constant 42 : index
    %830 = memref.load %arg1[%c42] : memref<288xf32, #tpu.memory_space<smem>>
    %831 = vector.broadcast %830 : f32 to vector<1x8x8xf32>
    %832 = arith.mulf %831, %825 : vector<1x8x8xf32>
    %833 = arith.addf %799, %832 : vector<1x8x8xf32>
    %c78 = arith.constant 78 : index
    %834 = memref.load %arg1[%c78] : memref<288xf32, #tpu.memory_space<smem>>
    %835 = vector.broadcast %834 : f32 to vector<1x8x8xf32>
    %836 = arith.mulf %835, %825 : vector<1x8x8xf32>
    %837 = arith.addf %803, %836 : vector<1x8x8xf32>
    %c114 = arith.constant 114 : index
    %838 = memref.load %arg1[%c114] : memref<288xf32, #tpu.memory_space<smem>>
    %839 = vector.broadcast %838 : f32 to vector<1x8x8xf32>
    %840 = arith.mulf %839, %825 : vector<1x8x8xf32>
    %841 = arith.addf %807, %840 : vector<1x8x8xf32>
    %c150 = arith.constant 150 : index
    %842 = memref.load %arg1[%c150] : memref<288xf32, #tpu.memory_space<smem>>
    %843 = vector.broadcast %842 : f32 to vector<1x8x8xf32>
    %844 = arith.mulf %843, %825 : vector<1x8x8xf32>
    %845 = arith.addf %811, %844 : vector<1x8x8xf32>
    %c186 = arith.constant 186 : index
    %846 = memref.load %arg1[%c186] : memref<288xf32, #tpu.memory_space<smem>>
    %847 = vector.broadcast %846 : f32 to vector<1x8x8xf32>
    %848 = arith.mulf %847, %825 : vector<1x8x8xf32>
    %849 = arith.addf %815, %848 : vector<1x8x8xf32>
    %c222 = arith.constant 222 : index
    %850 = memref.load %arg1[%c222] : memref<288xf32, #tpu.memory_space<smem>>
    %851 = vector.broadcast %850 : f32 to vector<1x8x8xf32>
    %852 = arith.mulf %851, %825 : vector<1x8x8xf32>
    %853 = arith.addf %819, %852 : vector<1x8x8xf32>
    %c258 = arith.constant 258 : index
    %854 = memref.load %arg1[%c258] : memref<288xf32, #tpu.memory_space<smem>>
    %855 = vector.broadcast %854 : f32 to vector<1x8x8xf32>
    %856 = arith.mulf %855, %825 : vector<1x8x8xf32>
    %857 = arith.addf %823, %856 : vector<1x8x8xf32>
    %c0_104 = arith.constant 0 : index
    %c1_105 = arith.constant 1 : index
    %c1_106 = arith.constant 1 : index
    %c0_107 = arith.constant 0 : index
    %858 = vector.load %arg2[%c0_104, %c1_105, %c1_106, %c0_107] : memref<1x16x9x9xf32, #tpu.memory_space<vmem>>, vector<1x1x8x8xf32>
    %859 = vector.shape_cast %858 : vector<1x1x8x8xf32> to vector<1x8x8xf32>
    %c15_108 = arith.constant 15 : index
    %860 = memref.load %arg1[%c15_108] : memref<288xf32, #tpu.memory_space<smem>>
    %861 = vector.broadcast %860 : f32 to vector<1x8x8xf32>
    %862 = arith.mulf %861, %859 : vector<1x8x8xf32>
    %863 = arith.addf %829, %862 : vector<1x8x8xf32>
    %c51 = arith.constant 51 : index
    %864 = memref.load %arg1[%c51] : memref<288xf32, #tpu.memory_space<smem>>
    %865 = vector.broadcast %864 : f32 to vector<1x8x8xf32>
    %866 = arith.mulf %865, %859 : vector<1x8x8xf32>
    %867 = arith.addf %833, %866 : vector<1x8x8xf32>
    %c87 = arith.constant 87 : index
    %868 = memref.load %arg1[%c87] : memref<288xf32, #tpu.memory_space<smem>>
    %869 = vector.broadcast %868 : f32 to vector<1x8x8xf32>
    %870 = arith.mulf %869, %859 : vector<1x8x8xf32>
    %871 = arith.addf %837, %870 : vector<1x8x8xf32>
    %c123 = arith.constant 123 : index
    %872 = memref.load %arg1[%c123] : memref<288xf32, #tpu.memory_space<smem>>
    %873 = vector.broadcast %872 : f32 to vector<1x8x8xf32>
    %874 = arith.mulf %873, %859 : vector<1x8x8xf32>
    %875 = arith.addf %841, %874 : vector<1x8x8xf32>
    %c159 = arith.constant 159 : index
    %876 = memref.load %arg1[%c159] : memref<288xf32, #tpu.memory_space<smem>>
    %877 = vector.broadcast %876 : f32 to vector<1x8x8xf32>
    %878 = arith.mulf %877, %859 : vector<1x8x8xf32>
    %879 = arith.addf %845, %878 : vector<1x8x8xf32>
    %c195 = arith.constant 195 : index
    %880 = memref.load %arg1[%c195] : memref<288xf32, #tpu.memory_space<smem>>
    %881 = vector.broadcast %880 : f32 to vector<1x8x8xf32>
    %882 = arith.mulf %881, %859 : vector<1x8x8xf32>
    %883 = arith.addf %849, %882 : vector<1x8x8xf32>
    %c231 = arith.constant 231 : index
    %884 = memref.load %arg1[%c231] : memref<288xf32, #tpu.memory_space<smem>>
    %885 = vector.broadcast %884 : f32 to vector<1x8x8xf32>
    %886 = arith.mulf %885, %859 : vector<1x8x8xf32>
    %887 = arith.addf %853, %886 : vector<1x8x8xf32>
    %c267 = arith.constant 267 : index
    %888 = memref.load %arg1[%c267] : memref<288xf32, #tpu.memory_space<smem>>
    %889 = vector.broadcast %888 : f32 to vector<1x8x8xf32>
    %890 = arith.mulf %889, %859 : vector<1x8x8xf32>
    %891 = arith.addf %857, %890 : vector<1x8x8xf32>
    %c0_109 = arith.constant 0 : index
    %c2_110 = arith.constant 2 : index
    %c1_111 = arith.constant 1 : index
    %c0_112 = arith.constant 0 : index
    %892 = vector.load %arg2[%c0_109, %c2_110, %c1_111, %c0_112] : memref<1x16x9x9xf32, #tpu.memory_space<vmem>>, vector<1x1x8x8xf32>
    %893 = vector.shape_cast %892 : vector<1x1x8x8xf32> to vector<1x8x8xf32>
    %c24 = arith.constant 24 : index
    %894 = memref.load %arg1[%c24] : memref<288xf32, #tpu.memory_space<smem>>
    %895 = vector.broadcast %894 : f32 to vector<1x8x8xf32>
    %896 = arith.mulf %895, %893 : vector<1x8x8xf32>
    %897 = arith.addf %863, %896 : vector<1x8x8xf32>
    %c60 = arith.constant 60 : index
    %898 = memref.load %arg1[%c60] : memref<288xf32, #tpu.memory_space<smem>>
    %899 = vector.broadcast %898 : f32 to vector<1x8x8xf32>
    %900 = arith.mulf %899, %893 : vector<1x8x8xf32>
    %901 = arith.addf %867, %900 : vector<1x8x8xf32>
    %c96 = arith.constant 96 : index
    %902 = memref.load %arg1[%c96] : memref<288xf32, #tpu.memory_space<smem>>
    %903 = vector.broadcast %902 : f32 to vector<1x8x8xf32>
    %904 = arith.mulf %903, %893 : vector<1x8x8xf32>
    %905 = arith.addf %871, %904 : vector<1x8x8xf32>
    %c132 = arith.constant 132 : index
    %906 = memref.load %arg1[%c132] : memref<288xf32, #tpu.memory_space<smem>>
    %907 = vector.broadcast %906 : f32 to vector<1x8x8xf32>
    %908 = arith.mulf %907, %893 : vector<1x8x8xf32>
    %909 = arith.addf %875, %908 : vector<1x8x8xf32>
    %c168 = arith.constant 168 : index
    %910 = memref.load %arg1[%c168] : memref<288xf32, #tpu.memory_space<smem>>
    %911 = vector.broadcast %910 : f32 to vector<1x8x8xf32>
    %912 = arith.mulf %911, %893 : vector<1x8x8xf32>
    %913 = arith.addf %879, %912 : vector<1x8x8xf32>
    %c204 = arith.constant 204 : index
    %914 = memref.load %arg1[%c204] : memref<288xf32, #tpu.memory_space<smem>>
    %915 = vector.broadcast %914 : f32 to vector<1x8x8xf32>
    %916 = arith.mulf %915, %893 : vector<1x8x8xf32>
    %917 = arith.addf %883, %916 : vector<1x8x8xf32>
    %c240 = arith.constant 240 : index
    %918 = memref.load %arg1[%c240] : memref<288xf32, #tpu.memory_space<smem>>
    %919 = vector.broadcast %918 : f32 to vector<1x8x8xf32>
    %920 = arith.mulf %919, %893 : vector<1x8x8xf32>
    %921 = arith.addf %887, %920 : vector<1x8x8xf32>
    %c276 = arith.constant 276 : index
    %922 = memref.load %arg1[%c276] : memref<288xf32, #tpu.memory_space<smem>>
    %923 = vector.broadcast %922 : f32 to vector<1x8x8xf32>
    %924 = arith.mulf %923, %893 : vector<1x8x8xf32>
    %925 = arith.addf %891, %924 : vector<1x8x8xf32>
    %c0_113 = arith.constant 0 : index
    %c3_114 = arith.constant 3 : index
    %c1_115 = arith.constant 1 : index
    %c0_116 = arith.constant 0 : index
    %926 = vector.load %arg2[%c0_113, %c3_114, %c1_115, %c0_116] : memref<1x16x9x9xf32, #tpu.memory_space<vmem>>, vector<1x1x8x8xf32>
    %927 = vector.shape_cast %926 : vector<1x1x8x8xf32> to vector<1x8x8xf32>
    %c33 = arith.constant 33 : index
    %928 = memref.load %arg1[%c33] : memref<288xf32, #tpu.memory_space<smem>>
    %929 = vector.broadcast %928 : f32 to vector<1x8x8xf32>
    %930 = arith.mulf %929, %927 : vector<1x8x8xf32>
    %931 = arith.addf %897, %930 : vector<1x8x8xf32>
    %c69 = arith.constant 69 : index
    %932 = memref.load %arg1[%c69] : memref<288xf32, #tpu.memory_space<smem>>
    %933 = vector.broadcast %932 : f32 to vector<1x8x8xf32>
    %934 = arith.mulf %933, %927 : vector<1x8x8xf32>
    %935 = arith.addf %901, %934 : vector<1x8x8xf32>
    %c105 = arith.constant 105 : index
    %936 = memref.load %arg1[%c105] : memref<288xf32, #tpu.memory_space<smem>>
    %937 = vector.broadcast %936 : f32 to vector<1x8x8xf32>
    %938 = arith.mulf %937, %927 : vector<1x8x8xf32>
    %939 = arith.addf %905, %938 : vector<1x8x8xf32>
    %c141 = arith.constant 141 : index
    %940 = memref.load %arg1[%c141] : memref<288xf32, #tpu.memory_space<smem>>
    %941 = vector.broadcast %940 : f32 to vector<1x8x8xf32>
    %942 = arith.mulf %941, %927 : vector<1x8x8xf32>
    %943 = arith.addf %909, %942 : vector<1x8x8xf32>
    %c177 = arith.constant 177 : index
    %944 = memref.load %arg1[%c177] : memref<288xf32, #tpu.memory_space<smem>>
    %945 = vector.broadcast %944 : f32 to vector<1x8x8xf32>
    %946 = arith.mulf %945, %927 : vector<1x8x8xf32>
    %947 = arith.addf %913, %946 : vector<1x8x8xf32>
    %c213 = arith.constant 213 : index
    %948 = memref.load %arg1[%c213] : memref<288xf32, #tpu.memory_space<smem>>
    %949 = vector.broadcast %948 : f32 to vector<1x8x8xf32>
    %950 = arith.mulf %949, %927 : vector<1x8x8xf32>
    %951 = arith.addf %917, %950 : vector<1x8x8xf32>
    %c249 = arith.constant 249 : index
    %952 = memref.load %arg1[%c249] : memref<288xf32, #tpu.memory_space<smem>>
    %953 = vector.broadcast %952 : f32 to vector<1x8x8xf32>
    %954 = arith.mulf %953, %927 : vector<1x8x8xf32>
    %955 = arith.addf %921, %954 : vector<1x8x8xf32>
    %c285 = arith.constant 285 : index
    %956 = memref.load %arg1[%c285] : memref<288xf32, #tpu.memory_space<smem>>
    %957 = vector.broadcast %956 : f32 to vector<1x8x8xf32>
    %958 = arith.mulf %957, %927 : vector<1x8x8xf32>
    %959 = arith.addf %925, %958 : vector<1x8x8xf32>
    %c0_117 = arith.constant 0 : index
    %c4_118 = arith.constant 4 : index
    %c1_119 = arith.constant 1 : index
    %c0_120 = arith.constant 0 : index
    %960 = vector.load %arg2[%c0_117, %c4_118, %c1_119, %c0_120] : memref<1x16x9x9xf32, #tpu.memory_space<vmem>>, vector<1x1x8x8xf32>
    %961 = vector.shape_cast %960 : vector<1x1x8x8xf32> to vector<1x8x8xf32>
    %c7_121 = arith.constant 7 : index
    %962 = memref.load %arg1[%c7_121] : memref<288xf32, #tpu.memory_space<smem>>
    %963 = vector.broadcast %962 : f32 to vector<1x8x8xf32>
    %964 = arith.mulf %963, %961 : vector<1x8x8xf32>
    %965 = arith.addf %931, %964 : vector<1x8x8xf32>
    %c43 = arith.constant 43 : index
    %966 = memref.load %arg1[%c43] : memref<288xf32, #tpu.memory_space<smem>>
    %967 = vector.broadcast %966 : f32 to vector<1x8x8xf32>
    %968 = arith.mulf %967, %961 : vector<1x8x8xf32>
    %969 = arith.addf %935, %968 : vector<1x8x8xf32>
    %c79 = arith.constant 79 : index
    %970 = memref.load %arg1[%c79] : memref<288xf32, #tpu.memory_space<smem>>
    %971 = vector.broadcast %970 : f32 to vector<1x8x8xf32>
    %972 = arith.mulf %971, %961 : vector<1x8x8xf32>
    %973 = arith.addf %939, %972 : vector<1x8x8xf32>
    %c115 = arith.constant 115 : index
    %974 = memref.load %arg1[%c115] : memref<288xf32, #tpu.memory_space<smem>>
    %975 = vector.broadcast %974 : f32 to vector<1x8x8xf32>
    %976 = arith.mulf %975, %961 : vector<1x8x8xf32>
    %977 = arith.addf %943, %976 : vector<1x8x8xf32>
    %c151 = arith.constant 151 : index
    %978 = memref.load %arg1[%c151] : memref<288xf32, #tpu.memory_space<smem>>
    %979 = vector.broadcast %978 : f32 to vector<1x8x8xf32>
    %980 = arith.mulf %979, %961 : vector<1x8x8xf32>
    %981 = arith.addf %947, %980 : vector<1x8x8xf32>
    %c187 = arith.constant 187 : index
    %982 = memref.load %arg1[%c187] : memref<288xf32, #tpu.memory_space<smem>>
    %983 = vector.broadcast %982 : f32 to vector<1x8x8xf32>
    %984 = arith.mulf %983, %961 : vector<1x8x8xf32>
    %985 = arith.addf %951, %984 : vector<1x8x8xf32>
    %c223 = arith.constant 223 : index
    %986 = memref.load %arg1[%c223] : memref<288xf32, #tpu.memory_space<smem>>
    %987 = vector.broadcast %986 : f32 to vector<1x8x8xf32>
    %988 = arith.mulf %987, %961 : vector<1x8x8xf32>
    %989 = arith.addf %955, %988 : vector<1x8x8xf32>
    %c259 = arith.constant 259 : index
    %990 = memref.load %arg1[%c259] : memref<288xf32, #tpu.memory_space<smem>>
    %991 = vector.broadcast %990 : f32 to vector<1x8x8xf32>
    %992 = arith.mulf %991, %961 : vector<1x8x8xf32>
    %993 = arith.addf %959, %992 : vector<1x8x8xf32>
    %c0_122 = arith.constant 0 : index
    %c5_123 = arith.constant 5 : index
    %c1_124 = arith.constant 1 : index
    %c0_125 = arith.constant 0 : index
    %994 = vector.load %arg2[%c0_122, %c5_123, %c1_124, %c0_125] : memref<1x16x9x9xf32, #tpu.memory_space<vmem>>, vector<1x1x8x8xf32>
    %995 = vector.shape_cast %994 : vector<1x1x8x8xf32> to vector<1x8x8xf32>
    %c16 = arith.constant 16 : index
    %996 = memref.load %arg1[%c16] : memref<288xf32, #tpu.memory_space<smem>>
    %997 = vector.broadcast %996 : f32 to vector<1x8x8xf32>
    %998 = arith.mulf %997, %995 : vector<1x8x8xf32>
    %999 = arith.addf %965, %998 : vector<1x8x8xf32>
    %c52 = arith.constant 52 : index
    %1000 = memref.load %arg1[%c52] : memref<288xf32, #tpu.memory_space<smem>>
    %1001 = vector.broadcast %1000 : f32 to vector<1x8x8xf32>
    %1002 = arith.mulf %1001, %995 : vector<1x8x8xf32>
    %1003 = arith.addf %969, %1002 : vector<1x8x8xf32>
    %c88 = arith.constant 88 : index
    %1004 = memref.load %arg1[%c88] : memref<288xf32, #tpu.memory_space<smem>>
    %1005 = vector.broadcast %1004 : f32 to vector<1x8x8xf32>
    %1006 = arith.mulf %1005, %995 : vector<1x8x8xf32>
    %1007 = arith.addf %973, %1006 : vector<1x8x8xf32>
    %c124 = arith.constant 124 : index
    %1008 = memref.load %arg1[%c124] : memref<288xf32, #tpu.memory_space<smem>>
    %1009 = vector.broadcast %1008 : f32 to vector<1x8x8xf32>
    %1010 = arith.mulf %1009, %995 : vector<1x8x8xf32>
    %1011 = arith.addf %977, %1010 : vector<1x8x8xf32>
    %c160 = arith.constant 160 : index
    %1012 = memref.load %arg1[%c160] : memref<288xf32, #tpu.memory_space<smem>>
    %1013 = vector.broadcast %1012 : f32 to vector<1x8x8xf32>
    %1014 = arith.mulf %1013, %995 : vector<1x8x8xf32>
    %1015 = arith.addf %981, %1014 : vector<1x8x8xf32>
    %c196 = arith.constant 196 : index
    %1016 = memref.load %arg1[%c196] : memref<288xf32, #tpu.memory_space<smem>>
    %1017 = vector.broadcast %1016 : f32 to vector<1x8x8xf32>
    %1018 = arith.mulf %1017, %995 : vector<1x8x8xf32>
    %1019 = arith.addf %985, %1018 : vector<1x8x8xf32>
    %c232 = arith.constant 232 : index
    %1020 = memref.load %arg1[%c232] : memref<288xf32, #tpu.memory_space<smem>>
    %1021 = vector.broadcast %1020 : f32 to vector<1x8x8xf32>
    %1022 = arith.mulf %1021, %995 : vector<1x8x8xf32>
    %1023 = arith.addf %989, %1022 : vector<1x8x8xf32>
    %c268 = arith.constant 268 : index
    %1024 = memref.load %arg1[%c268] : memref<288xf32, #tpu.memory_space<smem>>
    %1025 = vector.broadcast %1024 : f32 to vector<1x8x8xf32>
    %1026 = arith.mulf %1025, %995 : vector<1x8x8xf32>
    %1027 = arith.addf %993, %1026 : vector<1x8x8xf32>
    %c0_126 = arith.constant 0 : index
    %c6_127 = arith.constant 6 : index
    %c1_128 = arith.constant 1 : index
    %c0_129 = arith.constant 0 : index
    %1028 = vector.load %arg2[%c0_126, %c6_127, %c1_128, %c0_129] : memref<1x16x9x9xf32, #tpu.memory_space<vmem>>, vector<1x1x8x8xf32>
    %1029 = vector.shape_cast %1028 : vector<1x1x8x8xf32> to vector<1x8x8xf32>
    %c25 = arith.constant 25 : index
    %1030 = memref.load %arg1[%c25] : memref<288xf32, #tpu.memory_space<smem>>
    %1031 = vector.broadcast %1030 : f32 to vector<1x8x8xf32>
    %1032 = arith.mulf %1031, %1029 : vector<1x8x8xf32>
    %1033 = arith.addf %999, %1032 : vector<1x8x8xf32>
    %c61 = arith.constant 61 : index
    %1034 = memref.load %arg1[%c61] : memref<288xf32, #tpu.memory_space<smem>>
    %1035 = vector.broadcast %1034 : f32 to vector<1x8x8xf32>
    %1036 = arith.mulf %1035, %1029 : vector<1x8x8xf32>
    %1037 = arith.addf %1003, %1036 : vector<1x8x8xf32>
    %c97 = arith.constant 97 : index
    %1038 = memref.load %arg1[%c97] : memref<288xf32, #tpu.memory_space<smem>>
    %1039 = vector.broadcast %1038 : f32 to vector<1x8x8xf32>
    %1040 = arith.mulf %1039, %1029 : vector<1x8x8xf32>
    %1041 = arith.addf %1007, %1040 : vector<1x8x8xf32>
    %c133 = arith.constant 133 : index
    %1042 = memref.load %arg1[%c133] : memref<288xf32, #tpu.memory_space<smem>>
    %1043 = vector.broadcast %1042 : f32 to vector<1x8x8xf32>
    %1044 = arith.mulf %1043, %1029 : vector<1x8x8xf32>
    %1045 = arith.addf %1011, %1044 : vector<1x8x8xf32>
    %c169 = arith.constant 169 : index
    %1046 = memref.load %arg1[%c169] : memref<288xf32, #tpu.memory_space<smem>>
    %1047 = vector.broadcast %1046 : f32 to vector<1x8x8xf32>
    %1048 = arith.mulf %1047, %1029 : vector<1x8x8xf32>
    %1049 = arith.addf %1015, %1048 : vector<1x8x8xf32>
    %c205 = arith.constant 205 : index
    %1050 = memref.load %arg1[%c205] : memref<288xf32, #tpu.memory_space<smem>>
    %1051 = vector.broadcast %1050 : f32 to vector<1x8x8xf32>
    %1052 = arith.mulf %1051, %1029 : vector<1x8x8xf32>
    %1053 = arith.addf %1019, %1052 : vector<1x8x8xf32>
    %c241 = arith.constant 241 : index
    %1054 = memref.load %arg1[%c241] : memref<288xf32, #tpu.memory_space<smem>>
    %1055 = vector.broadcast %1054 : f32 to vector<1x8x8xf32>
    %1056 = arith.mulf %1055, %1029 : vector<1x8x8xf32>
    %1057 = arith.addf %1023, %1056 : vector<1x8x8xf32>
    %c277 = arith.constant 277 : index
    %1058 = memref.load %arg1[%c277] : memref<288xf32, #tpu.memory_space<smem>>
    %1059 = vector.broadcast %1058 : f32 to vector<1x8x8xf32>
    %1060 = arith.mulf %1059, %1029 : vector<1x8x8xf32>
    %1061 = arith.addf %1027, %1060 : vector<1x8x8xf32>
    %c0_130 = arith.constant 0 : index
    %c7_131 = arith.constant 7 : index
    %c1_132 = arith.constant 1 : index
    %c0_133 = arith.constant 0 : index
    %1062 = vector.load %arg2[%c0_130, %c7_131, %c1_132, %c0_133] : memref<1x16x9x9xf32, #tpu.memory_space<vmem>>, vector<1x1x8x8xf32>
    %1063 = vector.shape_cast %1062 : vector<1x1x8x8xf32> to vector<1x8x8xf32>
    %c34 = arith.constant 34 : index
    %1064 = memref.load %arg1[%c34] : memref<288xf32, #tpu.memory_space<smem>>
    %1065 = vector.broadcast %1064 : f32 to vector<1x8x8xf32>
    %1066 = arith.mulf %1065, %1063 : vector<1x8x8xf32>
    %1067 = arith.addf %1033, %1066 : vector<1x8x8xf32>
    %c70 = arith.constant 70 : index
    %1068 = memref.load %arg1[%c70] : memref<288xf32, #tpu.memory_space<smem>>
    %1069 = vector.broadcast %1068 : f32 to vector<1x8x8xf32>
    %1070 = arith.mulf %1069, %1063 : vector<1x8x8xf32>
    %1071 = arith.addf %1037, %1070 : vector<1x8x8xf32>
    %c106 = arith.constant 106 : index
    %1072 = memref.load %arg1[%c106] : memref<288xf32, #tpu.memory_space<smem>>
    %1073 = vector.broadcast %1072 : f32 to vector<1x8x8xf32>
    %1074 = arith.mulf %1073, %1063 : vector<1x8x8xf32>
    %1075 = arith.addf %1041, %1074 : vector<1x8x8xf32>
    %c142 = arith.constant 142 : index
    %1076 = memref.load %arg1[%c142] : memref<288xf32, #tpu.memory_space<smem>>
    %1077 = vector.broadcast %1076 : f32 to vector<1x8x8xf32>
    %1078 = arith.mulf %1077, %1063 : vector<1x8x8xf32>
    %1079 = arith.addf %1045, %1078 : vector<1x8x8xf32>
    %c178 = arith.constant 178 : index
    %1080 = memref.load %arg1[%c178] : memref<288xf32, #tpu.memory_space<smem>>
    %1081 = vector.broadcast %1080 : f32 to vector<1x8x8xf32>
    %1082 = arith.mulf %1081, %1063 : vector<1x8x8xf32>
    %1083 = arith.addf %1049, %1082 : vector<1x8x8xf32>
    %c214 = arith.constant 214 : index
    %1084 = memref.load %arg1[%c214] : memref<288xf32, #tpu.memory_space<smem>>
    %1085 = vector.broadcast %1084 : f32 to vector<1x8x8xf32>
    %1086 = arith.mulf %1085, %1063 : vector<1x8x8xf32>
    %1087 = arith.addf %1053, %1086 : vector<1x8x8xf32>
    %c250 = arith.constant 250 : index
    %1088 = memref.load %arg1[%c250] : memref<288xf32, #tpu.memory_space<smem>>
    %1089 = vector.broadcast %1088 : f32 to vector<1x8x8xf32>
    %1090 = arith.mulf %1089, %1063 : vector<1x8x8xf32>
    %1091 = arith.addf %1057, %1090 : vector<1x8x8xf32>
    %c286 = arith.constant 286 : index
    %1092 = memref.load %arg1[%c286] : memref<288xf32, #tpu.memory_space<smem>>
    %1093 = vector.broadcast %1092 : f32 to vector<1x8x8xf32>
    %1094 = arith.mulf %1093, %1063 : vector<1x8x8xf32>
    %1095 = arith.addf %1061, %1094 : vector<1x8x8xf32>
    %c0_134 = arith.constant 0 : index
    %c0_135 = arith.constant 0 : index
    %c1_136 = arith.constant 1 : index
    %c1_137 = arith.constant 1 : index
    %1096 = vector.load %arg2[%c0_134, %c0_135, %c1_136, %c1_137] : memref<1x16x9x9xf32, #tpu.memory_space<vmem>>, vector<1x1x8x8xf32>
    %1097 = vector.shape_cast %1096 : vector<1x1x8x8xf32> to vector<1x8x8xf32>
    %c8_138 = arith.constant 8 : index
    %1098 = memref.load %arg1[%c8_138] : memref<288xf32, #tpu.memory_space<smem>>
    %1099 = vector.broadcast %1098 : f32 to vector<1x8x8xf32>
    %1100 = arith.mulf %1099, %1097 : vector<1x8x8xf32>
    %1101 = arith.addf %1067, %1100 : vector<1x8x8xf32>
    %c44 = arith.constant 44 : index
    %1102 = memref.load %arg1[%c44] : memref<288xf32, #tpu.memory_space<smem>>
    %1103 = vector.broadcast %1102 : f32 to vector<1x8x8xf32>
    %1104 = arith.mulf %1103, %1097 : vector<1x8x8xf32>
    %1105 = arith.addf %1071, %1104 : vector<1x8x8xf32>
    %c80 = arith.constant 80 : index
    %1106 = memref.load %arg1[%c80] : memref<288xf32, #tpu.memory_space<smem>>
    %1107 = vector.broadcast %1106 : f32 to vector<1x8x8xf32>
    %1108 = arith.mulf %1107, %1097 : vector<1x8x8xf32>
    %1109 = arith.addf %1075, %1108 : vector<1x8x8xf32>
    %c116 = arith.constant 116 : index
    %1110 = memref.load %arg1[%c116] : memref<288xf32, #tpu.memory_space<smem>>
    %1111 = vector.broadcast %1110 : f32 to vector<1x8x8xf32>
    %1112 = arith.mulf %1111, %1097 : vector<1x8x8xf32>
    %1113 = arith.addf %1079, %1112 : vector<1x8x8xf32>
    %c152 = arith.constant 152 : index
    %1114 = memref.load %arg1[%c152] : memref<288xf32, #tpu.memory_space<smem>>
    %1115 = vector.broadcast %1114 : f32 to vector<1x8x8xf32>
    %1116 = arith.mulf %1115, %1097 : vector<1x8x8xf32>
    %1117 = arith.addf %1083, %1116 : vector<1x8x8xf32>
    %c188 = arith.constant 188 : index
    %1118 = memref.load %arg1[%c188] : memref<288xf32, #tpu.memory_space<smem>>
    %1119 = vector.broadcast %1118 : f32 to vector<1x8x8xf32>
    %1120 = arith.mulf %1119, %1097 : vector<1x8x8xf32>
    %1121 = arith.addf %1087, %1120 : vector<1x8x8xf32>
    %c224 = arith.constant 224 : index
    %1122 = memref.load %arg1[%c224] : memref<288xf32, #tpu.memory_space<smem>>
    %1123 = vector.broadcast %1122 : f32 to vector<1x8x8xf32>
    %1124 = arith.mulf %1123, %1097 : vector<1x8x8xf32>
    %1125 = arith.addf %1091, %1124 : vector<1x8x8xf32>
    %c260 = arith.constant 260 : index
    %1126 = memref.load %arg1[%c260] : memref<288xf32, #tpu.memory_space<smem>>
    %1127 = vector.broadcast %1126 : f32 to vector<1x8x8xf32>
    %1128 = arith.mulf %1127, %1097 : vector<1x8x8xf32>
    %1129 = arith.addf %1095, %1128 : vector<1x8x8xf32>
    %c0_139 = arith.constant 0 : index
    %c1_140 = arith.constant 1 : index
    %c1_141 = arith.constant 1 : index
    %c1_142 = arith.constant 1 : index
    %1130 = vector.load %arg2[%c0_139, %c1_140, %c1_141, %c1_142] : memref<1x16x9x9xf32, #tpu.memory_space<vmem>>, vector<1x1x8x8xf32>
    %1131 = vector.shape_cast %1130 : vector<1x1x8x8xf32> to vector<1x8x8xf32>
    %c17 = arith.constant 17 : index
    %1132 = memref.load %arg1[%c17] : memref<288xf32, #tpu.memory_space<smem>>
    %1133 = vector.broadcast %1132 : f32 to vector<1x8x8xf32>
    %1134 = arith.mulf %1133, %1131 : vector<1x8x8xf32>
    %1135 = arith.addf %1101, %1134 : vector<1x8x8xf32>
    %c53 = arith.constant 53 : index
    %1136 = memref.load %arg1[%c53] : memref<288xf32, #tpu.memory_space<smem>>
    %1137 = vector.broadcast %1136 : f32 to vector<1x8x8xf32>
    %1138 = arith.mulf %1137, %1131 : vector<1x8x8xf32>
    %1139 = arith.addf %1105, %1138 : vector<1x8x8xf32>
    %c89 = arith.constant 89 : index
    %1140 = memref.load %arg1[%c89] : memref<288xf32, #tpu.memory_space<smem>>
    %1141 = vector.broadcast %1140 : f32 to vector<1x8x8xf32>
    %1142 = arith.mulf %1141, %1131 : vector<1x8x8xf32>
    %1143 = arith.addf %1109, %1142 : vector<1x8x8xf32>
    %c125 = arith.constant 125 : index
    %1144 = memref.load %arg1[%c125] : memref<288xf32, #tpu.memory_space<smem>>
    %1145 = vector.broadcast %1144 : f32 to vector<1x8x8xf32>
    %1146 = arith.mulf %1145, %1131 : vector<1x8x8xf32>
    %1147 = arith.addf %1113, %1146 : vector<1x8x8xf32>
    %c161 = arith.constant 161 : index
    %1148 = memref.load %arg1[%c161] : memref<288xf32, #tpu.memory_space<smem>>
    %1149 = vector.broadcast %1148 : f32 to vector<1x8x8xf32>
    %1150 = arith.mulf %1149, %1131 : vector<1x8x8xf32>
    %1151 = arith.addf %1117, %1150 : vector<1x8x8xf32>
    %c197 = arith.constant 197 : index
    %1152 = memref.load %arg1[%c197] : memref<288xf32, #tpu.memory_space<smem>>
    %1153 = vector.broadcast %1152 : f32 to vector<1x8x8xf32>
    %1154 = arith.mulf %1153, %1131 : vector<1x8x8xf32>
    %1155 = arith.addf %1121, %1154 : vector<1x8x8xf32>
    %c233 = arith.constant 233 : index
    %1156 = memref.load %arg1[%c233] : memref<288xf32, #tpu.memory_space<smem>>
    %1157 = vector.broadcast %1156 : f32 to vector<1x8x8xf32>
    %1158 = arith.mulf %1157, %1131 : vector<1x8x8xf32>
    %1159 = arith.addf %1125, %1158 : vector<1x8x8xf32>
    %c269 = arith.constant 269 : index
    %1160 = memref.load %arg1[%c269] : memref<288xf32, #tpu.memory_space<smem>>
    %1161 = vector.broadcast %1160 : f32 to vector<1x8x8xf32>
    %1162 = arith.mulf %1161, %1131 : vector<1x8x8xf32>
    %1163 = arith.addf %1129, %1162 : vector<1x8x8xf32>
    %c0_143 = arith.constant 0 : index
    %c2_144 = arith.constant 2 : index
    %c1_145 = arith.constant 1 : index
    %c1_146 = arith.constant 1 : index
    %1164 = vector.load %arg2[%c0_143, %c2_144, %c1_145, %c1_146] : memref<1x16x9x9xf32, #tpu.memory_space<vmem>>, vector<1x1x8x8xf32>
    %1165 = vector.shape_cast %1164 : vector<1x1x8x8xf32> to vector<1x8x8xf32>
    %c26 = arith.constant 26 : index
    %1166 = memref.load %arg1[%c26] : memref<288xf32, #tpu.memory_space<smem>>
    %1167 = vector.broadcast %1166 : f32 to vector<1x8x8xf32>
    %1168 = arith.mulf %1167, %1165 : vector<1x8x8xf32>
    %1169 = arith.addf %1135, %1168 : vector<1x8x8xf32>
    %c62 = arith.constant 62 : index
    %1170 = memref.load %arg1[%c62] : memref<288xf32, #tpu.memory_space<smem>>
    %1171 = vector.broadcast %1170 : f32 to vector<1x8x8xf32>
    %1172 = arith.mulf %1171, %1165 : vector<1x8x8xf32>
    %1173 = arith.addf %1139, %1172 : vector<1x8x8xf32>
    %c98 = arith.constant 98 : index
    %1174 = memref.load %arg1[%c98] : memref<288xf32, #tpu.memory_space<smem>>
    %1175 = vector.broadcast %1174 : f32 to vector<1x8x8xf32>
    %1176 = arith.mulf %1175, %1165 : vector<1x8x8xf32>
    %1177 = arith.addf %1143, %1176 : vector<1x8x8xf32>
    %c134 = arith.constant 134 : index
    %1178 = memref.load %arg1[%c134] : memref<288xf32, #tpu.memory_space<smem>>
    %1179 = vector.broadcast %1178 : f32 to vector<1x8x8xf32>
    %1180 = arith.mulf %1179, %1165 : vector<1x8x8xf32>
    %1181 = arith.addf %1147, %1180 : vector<1x8x8xf32>
    %c170 = arith.constant 170 : index
    %1182 = memref.load %arg1[%c170] : memref<288xf32, #tpu.memory_space<smem>>
    %1183 = vector.broadcast %1182 : f32 to vector<1x8x8xf32>
    %1184 = arith.mulf %1183, %1165 : vector<1x8x8xf32>
    %1185 = arith.addf %1151, %1184 : vector<1x8x8xf32>
    %c206 = arith.constant 206 : index
    %1186 = memref.load %arg1[%c206] : memref<288xf32, #tpu.memory_space<smem>>
    %1187 = vector.broadcast %1186 : f32 to vector<1x8x8xf32>
    %1188 = arith.mulf %1187, %1165 : vector<1x8x8xf32>
    %1189 = arith.addf %1155, %1188 : vector<1x8x8xf32>
    %c242 = arith.constant 242 : index
    %1190 = memref.load %arg1[%c242] : memref<288xf32, #tpu.memory_space<smem>>
    %1191 = vector.broadcast %1190 : f32 to vector<1x8x8xf32>
    %1192 = arith.mulf %1191, %1165 : vector<1x8x8xf32>
    %1193 = arith.addf %1159, %1192 : vector<1x8x8xf32>
    %c278 = arith.constant 278 : index
    %1194 = memref.load %arg1[%c278] : memref<288xf32, #tpu.memory_space<smem>>
    %1195 = vector.broadcast %1194 : f32 to vector<1x8x8xf32>
    %1196 = arith.mulf %1195, %1165 : vector<1x8x8xf32>
    %1197 = arith.addf %1163, %1196 : vector<1x8x8xf32>
    %c0_147 = arith.constant 0 : index
    %c3_148 = arith.constant 3 : index
    %c1_149 = arith.constant 1 : index
    %c1_150 = arith.constant 1 : index
    %1198 = vector.load %arg2[%c0_147, %c3_148, %c1_149, %c1_150] : memref<1x16x9x9xf32, #tpu.memory_space<vmem>>, vector<1x1x8x8xf32>
    %1199 = vector.shape_cast %1198 : vector<1x1x8x8xf32> to vector<1x8x8xf32>
    %c35 = arith.constant 35 : index
    %1200 = memref.load %arg1[%c35] : memref<288xf32, #tpu.memory_space<smem>>
    %1201 = vector.broadcast %1200 : f32 to vector<1x8x8xf32>
    %1202 = arith.mulf %1201, %1199 : vector<1x8x8xf32>
    %1203 = arith.addf %1169, %1202 : vector<1x8x8xf32>
    %c71 = arith.constant 71 : index
    %1204 = memref.load %arg1[%c71] : memref<288xf32, #tpu.memory_space<smem>>
    %1205 = vector.broadcast %1204 : f32 to vector<1x8x8xf32>
    %1206 = arith.mulf %1205, %1199 : vector<1x8x8xf32>
    %1207 = arith.addf %1173, %1206 : vector<1x8x8xf32>
    %c107 = arith.constant 107 : index
    %1208 = memref.load %arg1[%c107] : memref<288xf32, #tpu.memory_space<smem>>
    %1209 = vector.broadcast %1208 : f32 to vector<1x8x8xf32>
    %1210 = arith.mulf %1209, %1199 : vector<1x8x8xf32>
    %1211 = arith.addf %1177, %1210 : vector<1x8x8xf32>
    %c143 = arith.constant 143 : index
    %1212 = memref.load %arg1[%c143] : memref<288xf32, #tpu.memory_space<smem>>
    %1213 = vector.broadcast %1212 : f32 to vector<1x8x8xf32>
    %1214 = arith.mulf %1213, %1199 : vector<1x8x8xf32>
    %1215 = arith.addf %1181, %1214 : vector<1x8x8xf32>
    %c179 = arith.constant 179 : index
    %1216 = memref.load %arg1[%c179] : memref<288xf32, #tpu.memory_space<smem>>
    %1217 = vector.broadcast %1216 : f32 to vector<1x8x8xf32>
    %1218 = arith.mulf %1217, %1199 : vector<1x8x8xf32>
    %1219 = arith.addf %1185, %1218 : vector<1x8x8xf32>
    %c215 = arith.constant 215 : index
    %1220 = memref.load %arg1[%c215] : memref<288xf32, #tpu.memory_space<smem>>
    %1221 = vector.broadcast %1220 : f32 to vector<1x8x8xf32>
    %1222 = arith.mulf %1221, %1199 : vector<1x8x8xf32>
    %1223 = arith.addf %1189, %1222 : vector<1x8x8xf32>
    %c251 = arith.constant 251 : index
    %1224 = memref.load %arg1[%c251] : memref<288xf32, #tpu.memory_space<smem>>
    %1225 = vector.broadcast %1224 : f32 to vector<1x8x8xf32>
    %1226 = arith.mulf %1225, %1199 : vector<1x8x8xf32>
    %1227 = arith.addf %1193, %1226 : vector<1x8x8xf32>
    %c287 = arith.constant 287 : index
    %1228 = memref.load %arg1[%c287] : memref<288xf32, #tpu.memory_space<smem>>
    %1229 = vector.broadcast %1228 : f32 to vector<1x8x8xf32>
    %1230 = arith.mulf %1229, %1199 : vector<1x8x8xf32>
    %1231 = arith.addf %1197, %1230 : vector<1x8x8xf32>
    %1232 = vector.shape_cast %1203 : vector<1x8x8xf32> to vector<1x1x8x8xf32>
    %1233 = vector.shape_cast %1207 : vector<1x8x8xf32> to vector<1x1x8x8xf32>
    %1234 = vector.shape_cast %1211 : vector<1x8x8xf32> to vector<1x1x8x8xf32>
    %1235 = vector.shape_cast %1215 : vector<1x8x8xf32> to vector<1x1x8x8xf32>
    %1236 = vector.shape_cast %1219 : vector<1x8x8xf32> to vector<1x1x8x8xf32>
    %1237 = vector.shape_cast %1223 : vector<1x8x8xf32> to vector<1x1x8x8xf32>
    %1238 = vector.shape_cast %1227 : vector<1x8x8xf32> to vector<1x1x8x8xf32>
    %1239 = vector.shape_cast %1231 : vector<1x8x8xf32> to vector<1x1x8x8xf32>
    %1240 = tpu.concatenate %1232, %1233, %1234, %1235, %1236, %1237, %1238, %1239 in 1 : vector<1x1x8x8xf32>, vector<1x1x8x8xf32>, vector<1x1x8x8xf32>, vector<1x1x8x8xf32>, vector<1x1x8x8xf32>, vector<1x1x8x8xf32>, vector<1x1x8x8xf32>, vector<1x1x8x8xf32> -> vector<1x8x8x8xf32>
    %cst_151 = arith.constant dense<0.000000e+00> : vector<1x8x8xf32>
    %1241 = vector.multi_reduction <add>, %1240, %cst_151 [3] : vector<1x8x8x8xf32> to vector<1x8x8xf32>
    %1242 = vector.shape_cast %1241 : vector<1x8x8xf32> to vector<1x8x8x1xf32>
    %cst_152 = arith.constant dense<0.000000e+00> : vector<1x8x1xf32>
    %1243 = vector.multi_reduction <add>, %1242, %cst_152 [2] : vector<1x8x8x1xf32> to vector<1x8x1xf32>
    %1244 = vector.shape_cast %1243 : vector<1x8x1xf32> to vector<1x8x1x1xf32>
    %cst_153 = arith.constant 1.562500e-02 : f32
    %1245 = vector.broadcast %cst_153 : f32 to vector<1x8x1x1xf32>
    %1246 = arith.mulf %1244, %1245 : vector<1x8x1x1xf32>
    %1247 = vector.broadcast %1246 : vector<1x8x1x1xf32> to vector<1x8x8x8xf32>
    %1248 = arith.subf %1240, %1247 : vector<1x8x8x8xf32>
    %1249 = arith.mulf %1248, %1248 : vector<1x8x8x8xf32>
    %cst_154 = arith.constant dense<0.000000e+00> : vector<1x8x8xf32>
    %1250 = vector.multi_reduction <add>, %1249, %cst_154 [3] : vector<1x8x8x8xf32> to vector<1x8x8xf32>
    %1251 = vector.shape_cast %1250 : vector<1x8x8xf32> to vector<1x8x8x1xf32>
    %cst_155 = arith.constant dense<0.000000e+00> : vector<1x8x1xf32>
    %1252 = vector.multi_reduction <add>, %1251, %cst_155 [2] : vector<1x8x8x1xf32> to vector<1x8x1xf32>
    %1253 = vector.shape_cast %1252 : vector<1x8x1xf32> to vector<1x8x1x1xf32>
    %cst_156 = arith.constant 1.562500e-02 : f32
    %1254 = vector.broadcast %cst_156 : f32 to vector<1x8x1x1xf32>
    %1255 = arith.mulf %1253, %1254 : vector<1x8x1x1xf32>
    %cst_157 = arith.constant 9.99999974E-6 : f32
    %1256 = vector.broadcast %cst_157 : f32 to vector<1x8x1x1xf32>
    %1257 = arith.addf %1255, %1256 : vector<1x8x1x1xf32>
    %1258 = math.rsqrt %1257 : vector<1x8x1x1xf32>
    %1259 = vector.broadcast %1258 : vector<1x8x1x1xf32> to vector<1x8x8x8xf32>
    %1260 = arith.mulf %1248, %1259 : vector<1x8x8x8xf32>
    %cst_158 = arith.constant 0.000000e+00 : f32
    %1261 = vector.broadcast %cst_158 : f32 to vector<1x8x8x8xf32>
    %1262 = arith.cmpf oge, %1260, %1261 : vector<1x8x8x8xf32>
    %cst_159 = arith.constant 2.000000e-01 : f32
    %1263 = vector.broadcast %cst_159 : f32 to vector<1x8x8x8xf32>
    %1264 = arith.mulf %1263, %1260 : vector<1x8x8x8xf32>
    %1265 = arith.select %1262, %1260, %1264 : vector<1x8x8x8xi1>, vector<1x8x8x8xf32>
    %c0_160 = arith.constant 0 : index
    %c0_161 = arith.constant 0 : index
    %c0_162 = arith.constant 0 : index
    %c0_163 = arith.constant 0 : index
    %1266 = vector.load %arg3[%c0_160, %c0_161, %c0_162, %c0_163] : memref<1x8x8x8xf32, #tpu.memory_space<vmem>>, vector<1x8x8x8xf32>
    tpu.vector_store %arg3[%c0_160, %c0_161, %c0_162, %c0_163], %1265 {strides = array<i32>} : memref<1x8x8x8xf32, #tpu.memory_space<vmem>>, vector<1x8x8x8xf32>,
    return
  }
  func.func @transform_0(%arg0: i32) -> i32 {
    %c0_i32 = arith.constant 0 : i32
    %c0_i32_0 = arith.constant 0 : i32
    return %c0_i32 : i32
  }
  func.func @transform_1(%arg0: i32) -> (i32, i32, i32, i32) {
    %c0_i32 = arith.constant 0 : i32
    %c0_i32_0 = arith.constant 0 : i32
    %c0_i32_1 = arith.constant 0 : i32
    %c0_i32_2 = arith.constant 0 : i32
    return %arg0, %c0_i32, %c0_i32_0, %c0_i32_1 : i32, i32, i32, i32
  }
  func.func @transform_2(%arg0: i32) -> (i32, i32, i32, i32) {
    %c0_i32 = arith.constant 0 : i32
    %c0_i32_0 = arith.constant 0 : i32
    %c0_i32_1 = arith.constant 0 : i32
    %c0_i32_2 = arith.constant 0 : i32
    return %arg0, %c0_i32, %c0_i32_0, %c0_i32_1 : i32, i32, i32, i32
  }
}

</mosaic_0001>

<bundles_post_ra>
// kernel: tpu_custom_call.1
= control target key start
LH: loop header
LB: loop body
LE: loop exit
PB: predicated region body
PF: predicated region fallthrough
CT: control target
= control target key end

     0   :  { %s4647_s0 = inlined_call_operand.vmem [shape: f32[288], index: 0, kind: input, shape index: {}]   ;;  %s4648_s1 = inlined_call_operand.vmem [shape: f32[2,16,9,9], index: 1, kind: input, shape index: {}]   ;;  %s4649_s2 = inlined_call_operand.hbm [shape: f32[2,8,8,8], index: 2, kind: output, shape index: {}]  }
   0x1   :  { %4656 = sst [smem:[#allocation37_spill]] %s4647_s0 }
   0x2   :  { %4657 = sst [smem:[#allocation38_spill]] %s4648_s1 }
   0x3   :  { %7 = vsyncpa [#allocation4], 0 }
   0x4   :  { %8 = vsyncpa [#allocation3], 0 }
   0x5   :  { %10 = vsyncpa [#allocation3 + $0x1], 0  ;;  %s2553_s9 = smov 0   ;;  %s2555_s10 = smov 0  }
   0x6   :  { %s2557_s11 = smov 0   ;;  %s2559_s12 = smov 0  }
   0x7 LB: > { %s2574_s13 = sadd.s32 4294967295, %s2531_s12   ;;  %s2052_s14 = sadd.s32 4294967294, %s2531_s12   ;;  %s2531_s12 = sphi %s2559_s12, %s4725_s12   ;;  %s2527_s11 = sphi %s2557_s11, %s4724_s11   ;;  %s2523_s10 = sphi %s2555_s10, %s4723_s10   ;;  %s2519_s9 = sphi %s2553_s9, %s4722_s9  }
   0x8   : > { %s2578_s15 = sadd.s32 1, %s2531_s12   ;;  %s70_s16 = sadd.s32 1, %s2527_s11 }
   0x9   : > { %s67_s17 = ssub.s32 %s2531_s12, %s2578_s15  ;;  %p80_p0 = scmp.ne.s32.totalorder %s2527_s11, %s2523_s10 }
   0xa   : > { %p68_p1 = scmp.eq.s32.totalorder %s67_s17, 0  ;;  %p81_p2 = scmp.eq.s32.totalorder %s2574_s13, 1 }
   0xb   : > { %p86_p3 = scmp.ne.s32.totalorder %s2523_s10, %s2519_s9  ;;  %p87_p4 = scmp.eq.s32.totalorder %s2052_s14, 1 }
   0xc   : > { %s2589_s18 = scalar_select %p68_p1, %s2527_s11, %s70_s16  }
   0xd   : > { %p2591_p5 = por %p81_p2, %p80_p0  ;;  %p2595_p6 = por %p87_p4, %p86_p3 }
   0xe   : > { %p2053_p7 = scmp.ge.s32.totalorder %s2531_s12, 1  ;;  %p94_p8 = scmp.lt.s32.totalorder %s2531_s12, 3 }
   0xf   : > { %p2391_p9 = scmp.eq.s32.totalorder %s2574_s13, 0  ;;  %s4661_s0 = sld [smem:[#allocation37_spill]] }
  0x10   : > { %p2602_p10 = pnand %p2053_p7, %p94_p8 }
  0x12   : > { %p2383_p11 = pneg %p2602_p10 }
  0x14   : > { %p2384_p12 = pnand %p2391_p9, %p2383_p11 }
  0x15   : > { %s107_s24 = sshll.u32 %s4661_s0, 4  ;;  %s108_s24 = int_to_ptr.vmem [resolvable:$true] %s107_s24 }
  0x16   : > { %s2450_s25 = scalar_lea.vmem %s108_s24, 48  ;;  %p2452_p0 = pneg %p2384_p12 }
  0x17   : > { %p2451_p13 = scmp.ne.s32.totalorder %s108_s24, %s2450_s25  ;;  %s2457_s26 = scalar_lea.vmem %s108_s24, 64 }
  0x18   : > { %p2458_p3 = scmp.lt.s32.totalorder %s108_s24, %s108_s24  ;;  %p2459_p4 = scmp.lt.s32.totalorder %s2457_s26, %s2450_s25 }
  0x19   : > { %p2453_p1 = pnand %p2452_p0, %p2451_p13 }
  0x1a   : > { %p2460_p7 = por %p2459_p4, %p2458_p3 }
  0x1b   : > { %p2454_p2 = pneg %p2453_p1 }
  0x1d   : > { %p2461_p8 = pnand %p2460_p7, %p2454_p2 }
  0x1f   : > { %2464 = shalt.err (!%p2461_p8)
}
  0x20   : > { %s2533_s27 = smov [#allocation2]   ;;  %128 = sbr.rel (%p2602_p10) target bundleno = 717 (0x2cd), region = 28 }
  0x21   : > { %2386 = dma.vmem_to_smem (!%p2384_p12), %s108_s24, 48, %s2533_s27, [#allocation4]  }
  0x27   : > { %2510 = dma.done.wait (%p2391_p9), [#allocation4], 48  }
  0x28   : > { %2512 = vsyncadd (%p2391_p9), [#allocation4], 4294967248 }
  0x29   : > { %134 = sfence }
  0x2a   : > { %p151_p11 = scmp.lt.s32.totalorder %s2574_s13, 1  ;;  %s2133_s28 = sld [smem:[#allocation2 + $0x4a]]  ;;  %vm1731_vm0 = vcmask 64512  }
  0x2b   : > { %s2131_s29 = sld [smem:[#allocation2 + $0x2]]  ;;  %s2134_s3 = sld [smem:[#allocation2 + $0x6e]] }
  0x2c   : > { %s152_s30 = scalar_select %p151_p11, %s2574_s13, 1 }
  0x2d   : > { %s2132_s4 = sld [smem:[#allocation2 + $0x26]]  ;;  %s4662_s1 = sld [smem:[#allocation38_spill]] }
  0x2e   : > { %s2375_s5 = sshll.u32 %s152_s30, 8  ;;  %s2136_s6 = sld [smem:[#allocation2 + $0xb6]] }
  0x2f   : > { %s2135_s16 = sld [smem:[#allocation2 + $0x92]]  ;;  %s2138_s17 = sld [smem:[#allocation2 + $0xfe]] }
  0x30   : > { %v444_v1 = vstv %s2133_s28  ;;  %s2137_s21 = sld [smem:[#allocation2 + $0xda]]  ;;  %s4650_s22 = smov 127  }
  0x31   : > { %v428_v2 = vstv %s2131_s29  ;;  %v452_v5 = vstv %s2134_s3  ;;  %s2140_s23 = sld [smem:[#allocation2 + $0x2f]]  ;;  %s2139_s24 = sld [smem:[#allocation2 + $0xb]] }
  0x32   : > { %s2142_s25 = sld [smem:[#allocation2 + $0x77]]  ;;  %s2141_s26 = sld [smem:[#allocation2 + $0x53]] }
  0x33   : > { %s2624_s14 = scalar_lea.vmem %s4662_s1, %s2375_s5  ;;  %v436_v6 = vstv %s2132_s4  ;;  %s2144_s27 = sld [smem:[#allocation2 + $0xbf]] }
  0x34   : > { %v2627_v0 = vld [vmem:[%s2624_s14] sm:$0xff]  ;;  %v468_v9 = vstv %s2136_s6  ;;  %v2644_v17 = vld [vmem:[%s2624_s14 + $0x10] sm:$0xff]  ;;  %s2143_s28 = sld [smem:[#allocation2 + $0x9b]]  ;;  %s2146_s29 = sld [smem:[#allocation2 + $0x107]] }
  0x35   : > { %v445_v3 = vmul.f32 %v444_v1, %v2627_v0  ;;  %v429_v4 = vmul.f32 %v428_v2, %v2627_v0  ;;  %v453_v7 = vmul.f32 %v452_v5, %v2627_v0  ;;  %v437_v8 = vmul.f32 %v436_v6, %v2627_v0  ;;  %s2145_s30 = sld [smem:[#allocation2 + $0xe3]]  ;;  %s2654_s3 = sld [smem:[#allocation2 + $0x38]]  ;;  %v2677_v34 = vld [vmem:[%s2624_s14 + $0x20] sm:$0xff]  ;;  %v2709_v50 = vld [vmem:[%s2624_s14 + $0x30] sm:$0xff] }
  0x36   : > { %v460_v10 = vstv %s2135_s16  ;;  %v469_v11 = vmul.f32 %v468_v9, %v2627_v0  ;;  %v484_v13 = vstv %s2138_s17  ;;  %v476_v14 = vstv %s2137_s21  ;;  %s2656_s4 = sld [smem:[#allocation2 + $0x14]]  ;;  %s2658_s5 = sld [smem:[#allocation2 + $0x80]] }
  0x37   : > { %447 = vrot.lane.b32.xlu1 %v445_v3, %s4650_s22  ;;  %431 = vrot.lane.b32.xlu0 %v429_v4, %s4650_s22  ;;  %v461_v12 = vmul.f32 %v460_v10, %v2627_v0  ;;  %v485_v15 = vmul.f32 %v484_v13, %v2627_v0  ;;  %v477_v16 = vmul.f32 %v476_v14, %v2627_v0  ;;  %v500_v18 = vstv %s2140_s23  ;;  %s2660_s6 = sld [smem:[#allocation2 + $0x5c]]  ;;  %s2666_s7 = sld [smem:[#allocation2 + $0x48]] }
  0x38   : > { %v492_v19 = vstv %s2139_s24  ;;  %v501_v20 = vmul.f32 %v2644_v17, %v500_v18  ;;  %v516_v22 = vstv %s2142_s25  ;;  %v508_v23 = vstv %s2141_s26  ;;  %s2071_s8 = sld [smem:[#allocation2 + $0x51]]  ;;  %s2080_s16 = sld [smem:[#allocation2 + $0x5a]] }
  0x39   : > { %v493_v21 = vmul.f32 %v2644_v17, %v492_v19  ;;  %v517_v24 = vmul.f32 %v2644_v17, %v516_v22  ;;  %v509_v25 = vmul.f32 %v2644_v17, %v508_v23  ;;  %v532_v26 = vstv %s2144_s27  ;;  %s2668_s17 = sld [smem:[#allocation2 + $0x63]]  ;;  %s2674_s21 = sld [smem:[#allocation2 + $0xc8]] }
  0x3a   : > { %v524_v27 = vstv %s2143_s28  ;;  %v533_v28 = vmul.f32 %v2644_v17, %v532_v26  ;;  %v548_v30 = vstv %s2146_s29  ;;  %s2681_s23 = sld [smem:[#allocation2 + $0xa4]]  ;;  %s2683_s24 = sld [smem:[#allocation2]] }
  0x3b   : > { %455 = vrot.lane.b32.xlu1 %v453_v7, %s4650_s22  ;;  %439 = vrot.lane.b32.xlu0 %v437_v8, %s4650_s22  ;;  %v525_v29 = vmul.f32 %v2644_v17, %v524_v27  ;;  %v540_v31 = vstv %s2145_s30  ;;  %v549_v32 = vmul.f32 %v2644_v17, %v548_v30  ;;  %v564_v35 = vstv %s2654_s3  ;;  %s2685_s25 = sld [smem:[#allocation2 + $0x9]]  ;;  %s2689_s26 = sld [smem:[#allocation2 + $0x12]] }
  0x3c   : > { %v541_v33 = vmul.f32 %v2644_v17, %v540_v31  ;;  %v556_v36 = vstv %s2656_s4  ;;  %v580_v37 = vstv %s2658_s5  ;;  %s2691_s27 = sld [smem:[#allocation2 + $0x1b]]  ;;  %v565_v39 = vmul.f32 %v2677_v34, %v564_v35  ;;  %s2698_s28 = sld [smem:[#allocation2 + $0x110]] }
  0x3d   : > { %v572_v38 = vstv %s2660_s6  ;;  %v557_v40 = vmul.f32 %v2677_v34, %v556_v36  ;;  %v166_v41 = vstv %s2666_s7  ;;  %s2700_s29 = sld [smem:[#allocation2 + $0xec]]  ;;  %v581_v48 = vmul.f32 %v2677_v34, %v580_v37  ;;  %s2711_s30 = sld [smem:[#allocation2 + $0x75]] }
  0x3e   : > { %v200_v42 = vstv %s2071_s8  ;;  %v234_v44 = vstv %s2080_s16  ;;  %v167_v46 = vmul.f32 %v166_v41, %v2627_v0  ;;  %v573_v49 = vmul.f32 %v2677_v34, %v572_v38  ;;  %s2718_s3 = sld [smem:[#allocation2 + $0x6c]]  ;;  %s2720_s4 = sld [smem:[#allocation2 + $0x7e]] }
  0x3f   : > { %471 = vrot.lane.b32.xlu1 %v469_v11, %s4650_s22  ;;  %463 = vrot.lane.b32.xlu0 %v461_v12, %s4650_s22  ;;  %v201_v43 = vmul.f32 %v2644_v17, %v200_v42  ;;  %v268_v45 = vstv %s2668_s17  ;;  %v235_v47 = vmul.f32 %v2677_v34, %v234_v44  ;;  %v596_v51 = vstv %s2674_s21  ;;  %s2723_s5 = sld [smem:[#allocation2 + $0x41]]  ;;  %s2725_s6 = sld [smem:[#allocation2 + $0x1d]] }
  0x40   : > { %v269_v52 = vmul.f32 %v2709_v50, %v268_v45  ;;  %v158_v54 = vstv %s2683_s24  ;;  %v588_v55 = vstv %s2681_s23  ;;  %s2732_s7 = sld [smem:[#allocation2 + $0x87]]  ;;  %s2734_s8 = sld [smem:[#allocation2 + $0x89]]  ;;  %v597_v63 = vmul.f32 %v2677_v34, %v596_v51 }
  0x41   : > { %v202_v53 = vadd.f32 %v201_v43, %v167_v46  ;;  %v192_v56 = vstv %s2685_s25  ;;  %v226_v57 = vstv %s2689_s26  ;;  %v159_v58 = vmul.f32 %v158_v54, %v2627_v0  ;;  %s2741_s16 = sld [smem:[#allocation2 + $0x65]]  ;;  %s2750_s21 = sld [smem:[#allocation2 + $0x24]] }
  0x42   : > { %v193_v60 = vmul.f32 %v2644_v17, %v192_v56  ;;  %v260_v61 = vstv %s2691_s27  ;;  %v227_v62 = vmul.f32 %v2677_v34, %v226_v57  ;;  %v589_v1 = vmul.f32 %v2677_v34, %v588_v55  ;;  %s2745_s17 = sld [smem:[#allocation2 + $0x2d]]  ;;  %s2752_s23 = sld [smem:[#allocation2 + $0x36]] }
  0x43   : > { %487 = vrot.lane.b32.xlu1 %v485_v15, %s4650_s22  ;;  %479 = vrot.lane.b32.xlu0 %v477_v16, %s4650_s22  ;;  %v236_v59 = vadd.f32 %v235_v47, %v202_v53  ;;  %v612_v3 = vstv %s2698_s28  ;;  %v604_v4 = vstv %s2700_s29  ;;  %v261_v5 = vmul.f32 %v2709_v50, %v260_v61  ;;  %s2755_s24 = sld [smem:[#allocation2 + $0x3f]]  ;;  %s2765_s25 = sld [smem:[#allocation2 + $0xd1]] }
  0x44   : > { %v194_v6 = vadd.f32 %v193_v60, %v159_v58  ;;  %v204_v7 = vstv %s2711_s30  ;;  %v613_v9 = vmul.f32 %v2677_v34, %v612_v3  ;;  %v605_v10 = vmul.f32 %v2677_v34, %v604_v4  ;;  %s2767_s26 = sld [smem:[#allocation2 + $0xad]]  ;;  %s2783_s28 = sld [smem:[#allocation2 + $0x119]] }
  0x45   : > { %v2743_v2 = vadd.f32 %v269_v52, %v236_v59  ;;  %v170_v11 = vstv %s2718_s3  ;;  %v238_v12 = vstv %s2720_s4  ;;  %v628_v13 = vstv %s2723_s5  ;;  %s2776_s27 = sld [smem:[#allocation2 + $0xbd]]  ;;  %s2791_s30 = sld [smem:[#allocation2 + $0xb4]]  ;;  %v2854_v59 = vld [vmem:[%s2624_s14 + $0x80] sm:$0xff] }
  0x46   : > { %v228_v8 = vadd.f32 %v227_v62, %v194_v6  ;;  %v620_v14 = vstv %s2725_s6  ;;  %v205_v16 = vmul.f32 %v2644_v17, %v204_v7  ;;  %v272_v18 = vstv %s2732_s7  ;;  %s2785_s29 = sld [smem:[#allocation2 + $0xf5]]  ;;  %s2793_s3 = sld [smem:[#allocation2 + $0xc6]] }
  0x47   : > { %503 = vrot.lane.b32.xlu1 %v501_v20, %s4650_s22  ;;  %495 = vrot.lane.b32.xlu0 %v493_v21, %s4650_s22  ;;  %v644_v19 = vstv %s2734_s8  ;;  %v239_v20 = vmul.f32 %v2677_v34, %v238_v12  ;;  %v171_v21 = vmul.f32 %v170_v11, %v2627_v0  ;;  %v629_v22 = vmul.f32 %v2709_v50, %v628_v13  ;;  %s2798_s4 = sld [smem:[#allocation2 + $0xcf]]  ;;  %s2803_s5 = sld [smem:[#allocation2 + $0x29]] }
  0x48   : > { %v2769_v15 = vadd.f32 %v261_v5, %v228_v8  ;;  %v621_v23 = vmul.f32 %v2709_v50, %v620_v14  ;;  %v273_v26 = vmul.f32 %v2709_v50, %v272_v18  ;;  %v645_v31 = vmul.f32 %v2709_v50, %v644_v19  ;;  %s2809_s6 = sld [smem:[#allocation2 + $0x5]]  ;;  %s2813_s7 = sld [smem:[#allocation2 + $0x99]] }
  0x49   : > { %v206_v27 = vadd.f32 %v205_v16, %v171_v21  ;;  %v660_v38 = vstv %s2765_s25  ;;  %s2816_s8 = sld [smem:[#allocation2 + $0x90]]  ;;  %s2842_s25 = sld [smem:[#allocation2 + $0xfc]] }
  0x4a   : > { %v661_v44 = vmul.f32 %v2709_v50, %v660_v38  ;;  %v676_v46 = vstv %s2783_s28  ;;  %s2858_s28 = sld [smem:[#allocation2 + $0x95]]  ;;  %s2977_s0 = sld [smem:[#allocation2 + $0x44]] }
  0x4b   : > { %519 = vrot.lane.b32.xlu1 %v517_v24, %s4650_s22  ;;  %511 = vrot.lane.b32.xlu0 %v509_v25, %s4650_s22  ;;  %v636_v24 = vstv %s2741_s16  ;;  %v196_v25 = vstv %s2745_s17  ;;  %s2818_s16 = sld [smem:[#allocation2 + $0xa2]]  ;;  %s2820_s17 = sld [smem:[#allocation2 + $0x71]]  ;;  %v677_v54 = vmul.f32 %v2709_v50, %v676_v46 }
  0x4c   : > { %v197_v30 = vmul.f32 %v2644_v17, %v196_v25  ;;  %v637_v35 = vmul.f32 %v2709_v50, %v636_v24  ;;  %v212_v43 = vstv %s2776_s27  ;;  %v246_v51 = vstv %s2793_s3  ;;  %s2851_s27 = sld [smem:[#allocation2 + $0x10e]]  ;;  %s2876_s3 = sld [smem:[#allocation2 + $0xdd]]  ;;  %v2935_v46 = vld [vmem:[%s2624_s14 + $0x90] sm:$0xff] }
  0x4d   : > { %v213_v53 = vmul.f32 %v2644_v17, %v212_v43  ;;  %v280_v55 = vstv %s2798_s4  ;;  %v247_v57 = vmul.f32 %v2677_v34, %v246_v51  ;;  %v964_v60 = vstv %s2803_s5  ;;  %s2880_s4 = sld [smem:[#allocation2 + $0xe1]]  ;;  %s2888_s5 = sld [smem:[#allocation2 + $0xd8]] }
  0x4e   : > { %v956_v61 = vstv %s2809_s6  ;;  %v208_v62 = vstv %s2813_s7  ;;  %v965_v7 = vmul.f32 %v2854_v59, %v964_v60  ;;  %s2890_s6 = sld [smem:[#allocation2 + $0xea]]  ;;  %s2983_s1 = sld [smem:[#allocation2 + $0x5b]] }
  0x4f   : > { %535 = vrot.lane.b32.xlu1 %v533_v28, %s4650_s22  ;;  %527 = vrot.lane.b32.xlu0 %v525_v29, %s4650_s22  ;;  %v162_v28 = vstv %s2750_s21  ;;  %v230_v29 = vstv %s2752_s23  ;;  %s2828_s21 = sld [smem:[#allocation2 + $0xab]]  ;;  %s2831_s23 = sld [smem:[#allocation2 + $0x4d]]  ;;  %v209_v6 = vmul.f32 %v2644_v17, %v208_v62  ;;  %v957_v8 = vmul.f32 %v2854_v59, %v956_v61 }
  0x50   : > { %v231_v36 = vmul.f32 %v2677_v34, %v230_v29  ;;  %v163_v37 = vmul.f32 %v162_v28, %v2627_v0  ;;  %v174_v3 = vstv %s2816_s8  ;;  %v186_v21 = vstv %s2842_s25  ;;  %s2895_s7 = sld [smem:[#allocation2 + $0x32]]  ;;  %s2901_s8 = sld [smem:[#allocation2 + $0xe]] }
  0x51   : > { %v242_v4 = vstv %s2818_s16  ;;  %v980_v5 = vstv %s2820_s17  ;;  %v175_v13 = vmul.f32 %v174_v3, %v2627_v0  ;;  %v187_v25 = vmul.f32 %v186_v21, %v2627_v0  ;;  %s2905_s16 = sld [smem:[#allocation2 + $0xf3]]  ;;  %s2917_s17 = sld [smem:[#allocation2 + $0x7a]] }
  0x52   : > { %v198_v42 = vadd.f32 %v197_v30, %v163_v37  ;;  %v243_v12 = vmul.f32 %v2677_v34, %v242_v4  ;;  %v981_v14 = vmul.f32 %v2854_v59, %v980_v5  ;;  %v254_v24 = vstv %s2851_s27  ;;  %s2927_s25 = sld [smem:[#allocation2 + $0x49]]  ;;  %s2940_s27 = sld [smem:[#allocation2 + $0xe6]] }
  0x53   : > { %551 = vrot.lane.b32.xlu1 %v549_v32, %s4650_s22  ;;  %543 = vrot.lane.b32.xlu0 %v541_v33, %s4650_s22  ;;  %v240_v32 = vadd.f32 %v239_v20, %v206_v27  ;;  %v264_v33 = vstv %s2755_s24  ;;  %s2839_s24 = sld [smem:[#allocation2 + $0xb9]]  ;;  %v210_v20 = vadd.f32 %v209_v6, %v175_v13  ;;  %v255_v30 = vmul.f32 %v2677_v34, %v254_v24 }
  0x54   : > { %v265_v41 = vmul.f32 %v2709_v50, %v264_v33  ;;  %v232_v47 = vadd.f32 %v231_v36, %v198_v42  ;;  %v1004_v38 = vstv %s2876_s3  ;;  %v182_v43 = vstv %s2888_s5  ;;  %s2953_s3 = sld [smem:[#allocation2 + $0x5f]]  ;;  %s2960_s5 = sld [smem:[#allocation2 + $0x52]] }
  0x55   : > { %v972_v11 = vstv %s2831_s23  ;;  %v244_v27 = vadd.f32 %v243_v12, %v210_v20  ;;  %s2922_s23 = sld [smem:[#allocation2 + $0xc2]] }
  0x56   : > { %v2835_v52 = vadd.f32 %v265_v41, %v232_v47  ;;  %v1028_v47 = vstv %s2895_s7  ;;  %v1020_v51 = vstv %s2901_s8  ;;  %s2967_s7 = sld [smem:[#allocation2 + $0x1]]  ;;  %s2972_s8 = sld [smem:[#allocation2 + $0x113]] }
  0x57   : > { %567 = vrot.lane.b32.xlu1 %v565_v39, %s4650_s22  ;;  %559 = vrot.lane.b32.xlu0 %v557_v40, %s4650_s22  ;;  %v652_v39 = vstv %s2767_s26  ;;  %v2811_v40 = vadd.f32 %v273_v26, %v240_v32  ;;  %s2849_s26 = sld [smem:[#allocation2 + $0x105]]  ;;  %v988_v26 = vstv %s2858_s28  ;;  %s2946_s28 = sld [smem:[#allocation2 + $0x3b]] }
  0x58   : > { %v653_v45 = vmul.f32 %v2709_v50, %v652_v39  ;;  %v989_v33 = vmul.f32 %v2854_v59, %v988_v26  ;;  %v216_v39 = vstv %s2880_s4  ;;  %s2958_s4 = sld [smem:[#allocation2 + $0xcb]]  ;;  %v1068_v6 = vstv %s2940_s27  ;;  %s3015_s27 = sld [smem:[#allocation2 + $0x25]] }
  0x59   : > { %v996_v18 = vstv %s2839_s24  ;;  %s2925_s24 = sld [smem:[#allocation2 + $0x9e]]  ;;  %v1069_v21 = vmul.f32 %v2935_v46, %v1068_v6 }
  0x5a   : > { %v336_v20 = vstv %s2960_s5  ;;  %s3059_s5 = sld [smem:[#allocation2 + $0x2e]] }
  0x5b   : > { %583 = vrot.lane.b32.xlu1 %v581_v48, %s4650_s22  ;;  %575 = vrot.lane.b32.xlu0 %v573_v49, %s4650_s22  ;;  %v668_v48 = vstv %s2785_s29  ;;  %v178_v49 = vstv %s2791_s30  ;;  %s2861_s29 = sld [smem:[#allocation2 + $0x117]]  ;;  %s2872_s30 = sld [smem:[#allocation2 + $0x101]] }
  0x5c   : > { %v669_v56 = vmul.f32 %v2709_v50, %v668_v48  ;;  %v179_v58 = vmul.f32 %v178_v49, %v2627_v0  ;;  %v217_v49 = vmul.f32 %v2644_v17, %v216_v39  ;;  %v1060_v60 = vstv %s2922_s23  ;;  %s2992_s23 = sld [smem:[#allocation2 + $0x6d]] }
  0x5d   : > { %v1061_v5 = vmul.f32 %v2935_v46, %v1060_v60  ;;  %v294_v24 = vstv %s2967_s7  ;;  %v370_v39 = vstv %s2983_s1  ;;  %s3092_s1 = sld [smem:[#allocation2 + $0x37]]  ;;  %s3094_s7 = sld [smem:[#allocation2 + $0xbe]] }
  0x5f   : > { %599 = vrot.lane.b32.xlu1 %v597_v63, %s4650_s22  ;;  %591 = vrot.lane.b32.xlu0 %v589_v1, %s4650_s22  ;;  %v281_v63 = vmul.f32 %v2709_v50, %v280_v55  ;;  %v214_v1 = vadd.f32 %v213_v53, %v179_v58  ;;  %v284_v53 = vstv %s2905_s16  ;;  %v183_v55 = vmul.f32 %v182_v43, %v2627_v0  ;;  %s2974_s16 = sld [smem:[#allocation2 + $0xef]] }
  0x60   : > { %v285_v0 = vmul.f32 %v2709_v50, %v284_v53  ;;  %v1052_v62 = vstv %s2925_s24  ;;  %s3005_s24 = sld [smem:[#allocation2 + $0x64]] }
  0x61   : > { %v288_v29 = vstv %s2861_s29  ;;  %s2948_s29 = sld [smem:[#allocation2 + $0x17]] }
  0x62   : > { %v289_v36 = vmul.f32 %v2709_v50, %v288_v29  ;;  %v3042_v29 = vld [vmem:[%s2624_s14 + $0x50] sm:$0xff] }
  0x63   : > { %615 = vrot.lane.b32.xlu1 %v613_v9, %s4650_s22  ;;  %607 = vrot.lane.b32.xlu0 %v605_v10, %s4650_s22  ;;  %v248_v9 = vadd.f32 %v247_v57, %v214_v1  ;;  %v276_v10 = vstv %s2828_s21  ;;  %s2919_s21 = sld [smem:[#allocation2 + $0x56]]  ;;  %v1044_v57 = vstv %s2917_s17  ;;  %s4663_s17 = smov 127  }
  0x64   : > { %v277_v19 = vmul.f32 %v2709_v50, %v276_v10  ;;  %v302_v50 = vstv %s2927_s25  ;;  %s3007_s25 = sld [smem:[#allocation2 + $0x13]]  ;;  %v1053_v10 = vmul.f32 %v2935_v46, %v1052_v62 }
  0x65   : > { %v2883_v16 = vadd.f32 %v281_v63, %v248_v9  ;;  %v1045_v63 = vmul.f32 %v2935_v46, %v1044_v57  ;;  %v3003_v9 = vld [vmem:[%s2624_s14 + $0x40] sm:$0xff] }
  0x66   : > { %v2909_v32 = vadd.f32 %v277_v19, %v244_v27  ;;  %v303_v13 = vmul.f32 %v3003_v9, %v302_v50  ;;  %v1124_v19 = vstv %s2958_s4  ;;  %v1140_v27 = vstv %s2972_s8  ;;  %s3057_s4 = sld [smem:[#allocation2 + $0x7f]]  ;;  %s3108_s8 = sld [smem:[#allocation2 + $0xfd]] }
  0x67   : > { %631 = vrot.lane.b32.xlu1 %v629_v22, %s4650_s22  ;;  %623 = vrot.lane.b32.xlu0 %v621_v23, %s4650_s22  ;;  %v973_v22 = vmul.f32 %v2854_v59, %v972_v11  ;;  %v220_v23 = vstv %s2849_s26  ;;  %s2938_s26 = sld [smem:[#allocation2 + $0x10a]]  ;;  %v1084_v11 = vstv %s2948_s29  ;;  %s3031_s29 = sld [smem:[#allocation2 + $0x8c]] }
  0x68   : > { %v221_v28 = vmul.f32 %v2644_v17, %v220_v23  ;;  %v1021_v17 = vmul.f32 %v2935_v46, %v1020_v51  ;;  %v404_v51 = vstv %s3005_s24  ;;  %s3128_s24 = sld [smem:[#allocation2 + $0xc7]] }
  0x69   : > { %v1036_v58 = vstv %s2919_s21  ;;  %s2990_s21 = sld [smem:[#allocation2 + $0xa]] }
  0x6a   : > { %v222_v37 = vadd.f32 %v221_v28, %v187_v25  ;;  %v1037_v1 = vmul.f32 %v2935_v46, %v1036_v58  ;;  %v1132_v28 = vstv %s2974_s16  ;;  %v362_v53 = vstv %s3007_s25  ;;  %s3118_s16 = sld [smem:[#allocation2 + $0x40]]  ;;  %s3133_s25 = sld [smem:[#allocation2 + $0xa3]] }
  0x6b   : > { %647 = vrot.lane.b32.xlu1 %v645_v31, %s4650_s22  ;;  %639 = vrot.lane.b32.xlu0 %v637_v35, %s4650_s22  ;;  %v997_v31 = vmul.f32 %v2854_v59, %v996_v18  ;;  %v1012_v35 = vstv %s2872_s30  ;;  %s2951_s30 = sld [smem:[#allocation2 + $0x83]]  ;;  %v1100_v18 = vstv %s2953_s3  ;;  %s3046_s3 = sld [smem:[#allocation2 + $0xb5]] }
  0x6c   : > { %v256_v41 = vadd.f32 %v255_v30, %v222_v37  ;;  %v1013_v42 = vmul.f32 %v2854_v59, %v1012_v35  ;;  %v337_v35 = vmul.f32 %v3042_v29, %v336_v20 }
  0x6d   : > { %v1076_v3 = vstv %s2938_s26  ;;  %s3013_s26 = sld [smem:[#allocation2 + $0x1c]]  ;;  %v1172_v50 = vstv %s3031_s29  ;;  %s3164_s29 = sld [smem:[#allocation2 + $0xd9]] }
  0x6e   : > { %v2942_v48 = vadd.f32 %v289_v36, %v256_v41  ;;  %v304_v36 = vadd.f32 %v303_v13, %v2743_v2  ;;  %v295_v41 = vmul.f32 %v3003_v9, %v294_v24  ;;  %v348_v24 = vstv %s3094_s7  ;;  %s3201_s7 = sld [smem:[#allocation2 + $0x2c]] }
  0x6f   : > { %663 = vrot.lane.b32.xlu1 %v661_v44, %s4650_s22  ;;  %655 = vrot.lane.b32.xlu0 %v653_v45, %s4650_s22  ;;  %v250_v44 = vstv %s2890_s6  ;;  %v1005_v45 = vmul.f32 %v2854_v59, %v1004_v38  ;;  %s2965_s6 = sld [smem:[#allocation2 + $0xa7]]  ;;  %v328_v43 = vstv %s2990_s21  ;;  %s3120_s21 = sld [smem:[#allocation2 + $0xd4]] }
  0x70   : > { %v296_v57 = vadd.f32 %v295_v41, %v2769_v15 }
  0x71   : > { %v1108_v12 = vstv %s2951_s30  ;;  %s3044_s30 = sld [smem:[#allocation2 + $0x68]] }
  0x73   : > { %679 = vrot.lane.b32.xlu1 %v677_v54, %s4650_s22  ;;  %671 = vrot.lane.b32.xlu0 %v669_v56, %s4650_s22  ;;  %v251_v54 = vmul.f32 %v2677_v34, %v250_v44  ;;  %v1029_v56 = vmul.f32 %v2935_v46, %v1028_v47  ;;  %v218_v34 = vadd.f32 %v217_v49, %v183_v55  ;;  %v306_v44 = vstv %s2992_s23  ;;  %v3088_v49 = vld [vmem:[%s2624_s14 + $0x60] sm:$0xff]  ;;  %s3125_s23 = sld [smem:[#allocation2 + $0xb0]] }
  0x74   : > { %v3098_v55 = vld [vmem:[%s2624_s14 + $0x70] sm:$0xff]  ;;  %v307_v58 = vmul.f32 %v3003_v9, %v306_v44  ;;  %v363_v15 = vmul.f32 %v3088_v49, %v362_v53  ;;  %v349_v44 = vmul.f32 %v3042_v29, %v348_v24 }
  0x75   : > { %v252_v61 = vadd.f32 %v251_v54, %v218_v34  ;;  %v1116_v23 = vstv %s2965_s6  ;;  %s3071_s6 = sld [smem:[#allocation2 + $0x91]]  ;;  %v371_v54 = vmul.f32 %v3088_v49, %v370_v39  ;;  %v329_v34 = vmul.f32 %v3042_v29, %v328_v43 }
  0x76   : > { %v405_v62 = vmul.f32 %v3098_v55, %v404_v51  ;;  %v322_v39 = vstv %s3108_s8  ;;  %v400_v43 = vstv %s3118_s16  ;;  %v1188_v53 = vstv %s3120_s21  ;;  %s3214_s8 = sld [smem:[#allocation2 + $0x74]]  ;;  %s3221_s16 = sld [smem:[#allocation2 + $0x50]] }
  0x77   : > { %967 = vrot.lane.b32.xlu1 %v965_v7, %s4650_s22  ;;  %959 = vrot.lane.b32.xlu0 %v957_v8, %s4650_s22  ;;  %v2994_v4 = vadd.f32 %v285_v0, %v252_v61  ;;  %v2999_v7 = vld [vmem:[%s2624_s14 + $0xa0] sm:$0xff]  ;;  %v1092_v8 = vstv %s2946_s28  ;;  %s3021_s28 = sld [smem:[#allocation2 + $0x76]]  ;;  %s3223_s21 = sld [smem:[#allocation2 + $0xbc]] }
  0x78   : > { %v3034_v25 = vmul.f32 %v2999_v7, %v1084_v11  ;;  %v3037_v26 = vmul.f32 %v2999_v7, %v1108_v12  ;;  %v3049_v30 = vmul.f32 %v2999_v7, %v1100_v18  ;;  %v3062_v37 = vmul.f32 %v2999_v7, %v1124_v19 }
  0x79   : > { %v3065_v38 = vmul.f32 %v2999_v7, %v1116_v23  ;;  %v3076_v2 = vmul.f32 %v2999_v7, %v1140_v27  ;;  %v298_v0 = vstv %s3015_s27  ;;  %v332_v11 = vstv %s3059_s5  ;;  %s3151_s27 = sld [smem:[#allocation2 + $0xd0]] }
  0x7a   : > { %v330_v12 = vadd.f32 %v329_v34, %v296_v57  ;;  %v366_v23 = vstv %s3092_s1  ;;  %s3182_s5 = sld [smem:[#allocation2 + $0x118]]  ;;  %v401_v57 = vmul.f32 %v3098_v55, %v400_v43  ;;  %s3199_s1 = sld [smem:[#allocation2 + $0xf4]] }
  0x7b   : > { %983 = vrot.lane.b32.xlu1 %v981_v14, %s4650_s22  ;;  %975 = vrot.lane.b32.xlu0 %v973_v22, %s4650_s22  ;;  %v1077_v14 = vmul.f32 %v2935_v46, %v1076_v3  ;;  %v3027_v22 = vmul.f32 %v2999_v7, %v1092_v8  ;;  %v299_v3 = vmul.f32 %v3003_v9, %v298_v0  ;;  %v310_v18 = vstv %s3071_s6  ;;  %s3189_s6 = sld [smem:[#allocation2 + $0xeb]] }
  0x7c   : > { %v367_v41 = vmul.f32 %v3088_v49, %v366_v23 }
  0x7d   : > { %v340_v60 = vstv %s3021_s28  ;;  %s3157_s28 = sld [smem:[#allocation2 + $0xac]] }
  0x7e   : > { %v341_v8 = vmul.f32 %v3042_v29, %v340_v60 }
  0x7f   : > { %999 = vrot.lane.b32.xlu1 %v997_v31, %s4650_s22  ;;  %991 = vrot.lane.b32.xlu0 %v989_v33, %s4650_s22  ;;  %v3052_v31 = vld [vmem:[%s2624_s14 + $0xb0] sm:$0xff]  ;;  %v1156_v33 = vstv %s2977_s0  ;;  %s3069_s0 = sld [smem:[#allocation2 + $0x88]] }
  0x80   : > { %v3145_v19 = vmul.f32 %v3052_v31, %v1172_v50 }
  0x83   : > { %1015 = vrot.lane.b32.xlu1 %v1013_v42, %s4650_s22  ;;  %1007 = vrot.lane.b32.xlu0 %v1005_v45, %s4650_s22  ;;  %s2980_s22 = sld [smem:[#allocation2 + $0x20]]  ;;  %v3079_v42 = vmul.f32 %v2999_v7, %v1132_v28  ;;  %v3084_v45 = vmul.f32 %v3052_v31, %v1156_v33  ;;  %v311_v33 = vmul.f32 %v3003_v9, %v310_v18  ;;  %v424_v18 = vstv %s3182_s5  ;;  %s3285_s5 = sld [smem:[#allocation2 + $0xe9]] }
  0x85   : > { %v408_v13 = vstv %s3069_s0  ;;  %s3187_s0 = sld [smem:[#allocation2 + $0xe2]] }
  0x86   : > { %v409_v28 = vmul.f32 %v3098_v55, %v408_v13 }
  0x87   : > { %1031 = vrot.lane.b32.xlu1 %v1029_v56, %s4663_s17  ;;  %1023 = vrot.lane.b32.xlu0 %v1021_v17, %s4663_s17  ;;  %v338_v56 = vadd.f32 %v337_v35, %v304_v36  ;;  %v396_v17 = vstv %s3013_s26  ;;  %s3138_s26 = sld [smem:[#allocation2 + $0x106]]  ;;  %v364_v35 = vadd.f32 %v363_v15, %v330_v12 }
  0x89   : > { %v1148_v47 = vstv %s2980_s22  ;;  %s3106_s22 = sld [smem:[#allocation2 + $0x9a]]  ;;  %v372_v6 = vadd.f32 %v371_v54, %v338_v56  ;;  %v1180_v54 = vstv %s3125_s23  ;;  %v382_v56 = vstv %s3128_s24  ;;  %s3228_s23 = sld [smem:[#allocation2 + $0x98]] }
  0x8a   : > { %v3113_v61 = vmul.f32 %v3052_v31, %v1148_v47  ;;  %v383_v60 = vmul.f32 %v3088_v49, %v382_v56  ;;  %s3235_s24 = sld [smem:[#allocation2 + $0x104]] }
  0x8b   : > { %1047 = vrot.lane.b32.xlu1 %v1045_v63, %s4663_s17  ;;  %1039 = vrot.lane.b32.xlu0 %v1037_v1, %s4663_s17  ;;  %v397_v63 = vmul.f32 %v3098_v55, %v396_v17  ;;  %v1164_v1 = vstv %s3044_s30  ;;  %s3167_s30 = sld [smem:[#allocation2 + $0x11c]]  ;;  %v312_v17 = vadd.f32 %v311_v33, %v2909_v32  ;;  %v3208_v32 = vmul.f32 %v3052_v31, %v1188_v53 }
  0x8c   : > { %v3148_v20 = vmul.f32 %v3052_v31, %v1164_v1  ;;  %v352_v23 = vstv %s3187_s0  ;;  %v420_v33 = vstv %s3199_s1  ;;  %s3287_s0 = sld [smem:[#allocation2 + $0x3e]]  ;;  %s3295_s1 = sld [smem:[#allocation2 + $0x27]] }
  0x8d   : > { %v3195_v0 = vadd.f32 %v397_v63, %v364_v35  ;;  %v412_v63 = vstv %s3157_s28  ;;  %s3255_s28 = sld [smem:[#allocation2 + $0x7d]]  ;;  %v1211_v35 = vld [vmem:[%s2624_s14 + $0x1] sm:$0xff] }
  0x8e   : > { %v413_v13 = vmul.f32 %v3098_v55, %v412_v63 }
  0x8f   : > { %1063 = vrot.lane.b32.xlu1 %v1061_v5, %s4663_s17  ;;  %1055 = vrot.lane.b32.xlu0 %v1053_v10, %s4663_s17  ;;  %v314_v5 = vstv %s3046_s3  ;;  %v374_v10 = vstv %s3057_s4  ;;  %s3170_s3 = sld [smem:[#allocation2 + $0x10f]]  ;;  %s3180_s4 = sld [smem:[#allocation2 + $0xf8]] }
  0x90   : > { %v375_v27 = vmul.f32 %v3088_v49, %v374_v10 }
  0x93   : > { %1079 = vrot.lane.b32.xlu1 %v1077_v14, %s4663_s17  ;;  %1071 = vrot.lane.b32.xlu0 %v1069_v21, %s4663_s17  ;;  %v308_v14 = vadd.f32 %v307_v58, %v2811_v40  ;;  %v315_v21 = vmul.f32 %v3003_v9, %v314_v5  ;;  %v333_v40 = vmul.f32 %v3042_v29, %v332_v11  ;;  %v356_v58 = vstv %s3138_s26  ;;  %s3246_s26 = sld [smem:[#allocation2 + $0x35]] }
  0x94   : > { %v1204_v11 = vstv %s3167_s30  ;;  %s3263_s30 = sld [smem:[#allocation2 + $0xc5]] }
  0x95   : > { %v342_v36 = vadd.f32 %v341_v8, %v308_v14  ;;  %v316_v47 = vadd.f32 %v315_v21, %v2883_v16  ;;  %v323_v16 = vmul.f32 %v3003_v9, %v322_v39  ;;  %v390_v12 = vstv %s3170_s3  ;;  %s3272_s3 = sld [smem:[#allocation2 + $0xa1]] }
  0x96   : > { %v1196_v14 = vstv %s3180_s4  ;;  %v391_v24 = vmul.f32 %v3088_v49, %v390_v12  ;;  %s3274_s4 = sld [smem:[#allocation2 + $0x10d]]  ;;  %v353_v39 = vmul.f32 %v3042_v29, %v352_v23 }
  0x97   : > { %1095 = vrot.lane.b32.xlu1 %v3027_v22, %s4663_s17  ;;  %1087 = vrot.lane.b32.xlu0 %v3034_v25, %s4663_s17  ;;  %v300_v22 = vadd.f32 %v299_v3, %v2835_v52  ;;  %v3159_v25 = vadd.f32 %v405_v62, %v372_v6  ;;  %v344_v52 = vstv %s3106_s22  ;;  %v376_v34 = vadd.f32 %v375_v27, %v342_v36  ;;  %s3212_s22 = sld [smem:[#allocation2 + $0x8]] }
  0x98   : > { %v416_v62 = vstv %s3151_s27  ;;  %v350_v15 = vadd.f32 %v349_v44, %v316_v47  ;;  %v357_v3 = vmul.f32 %v3042_v29, %v356_v58  ;;  %v324_v5 = vadd.f32 %v323_v16, %v2942_v48  ;;  %s3253_s27 = sld [smem:[#allocation2 + $0x11]]  ;;  %v3334_v58 = vld [vmem:[%s2624_s14 + $0x11] sm:$0xff] }
  0x99   : > { %v334_v51 = vadd.f32 %v333_v40, %v300_v22  ;;  %v318_v6 = vstv %s3164_s29  ;;  %v3230_v8 = vadd.f32 %v409_v28, %v376_v34  ;;  %v417_v10 = vmul.f32 %v3098_v55, %v416_v62  ;;  %s3261_s29 = sld [smem:[#allocation2 + $0x59]]  ;;  %4664 = vst [vmem:[#allocation8_spill] sm:$0xff] %v3334_v58 }
  0x9a   : > { %v384_v48 = vadd.f32 %v383_v60, %v350_v15  ;;  %v319_v40 = vmul.f32 %v3003_v9, %v318_v6  ;;  %v386_v22 = vstv %s3189_s6  ;;  %v358_v27 = vadd.f32 %v357_v3, %v324_v5  ;;  %s3293_s6 = sld [smem:[#allocation2 + $0x1a]] }
  0x9b   : > { %1111 = vrot.lane.b32.xlu1 %v3037_v26, %s4663_s17  ;;  %1103 = vrot.lane.b32.xlu0 %v3049_v30, %s4663_s17  ;;  %v345_v26 = vmul.f32 %v3042_v29, %v344_v52  ;;  %v378_v30 = vstv %s3133_s25  ;;  %v368_v50 = vadd.f32 %v367_v41, %v334_v51  ;;  %s3237_s25 = sld [smem:[#allocation2 + $0xe0]]  ;;  %v3266_v9 = vmul.f32 %v3052_v31, %v1196_v14 }
  0x9c   : > { %v425_v28 = vmul.f32 %v3098_v55, %v424_v18  ;;  %v1484_v36 = vstv %s3201_s7  ;;  %v3280_v52 = vadd.f32 %v417_v10, %v384_v48  ;;  %v387_v41 = vmul.f32 %v3088_v49, %v386_v22  ;;  %s3308_s7 = sld [smem:[#allocation2 + $0x30]] }
  0x9d   : > { %v346_v1 = vadd.f32 %v345_v26, %v312_v17  ;;  %v3248_v21 = vadd.f32 %v401_v57, %v368_v50  ;;  %v1476_v43 = vstv %s3212_s22  ;;  %v320_v44 = vadd.f32 %v319_v40, %v2994_v4  ;;  %s3315_s22 = sld [smem:[#allocation2 + $0x39]] }
  0x9e   : > { %v1492_v47 = vstv %s3221_s16  ;;  %v1516_v51 = vstv %s3223_s21  ;;  %v392_v53 = vadd.f32 %v391_v24, %v358_v27  ;;  %v3306_v56 = vmul.f32 %v1484_v36, %v1211_v35  ;;  %s3329_s16 = sld [smem:[#allocation2 + $0x3]]  ;;  %s3331_s21 = sld [smem:[#allocation2 + $0xc]] }
  0x9f   : > { %1127 = vrot.lane.b32.xlu1 %v3062_v37, %s4663_s17  ;;  %1119 = vrot.lane.b32.xlu0 %v3065_v38, %s4663_s17  ;;  %v3217_v37 = vmul.f32 %v3052_v31, %v1180_v54  ;;  %v379_v38 = vmul.f32 %v3088_v49, %v378_v30  ;;  %v3304_v54 = vmul.f32 %v3098_v55, %v420_v33  ;;  %v1508_v26 = vstv %s3228_s23  ;;  %s3339_s23 = sld [smem:[#allocation2 + $0x15]] }
  0xa0   : > { %v3310_v4 = vmul.f32 %v1476_v43, %v1211_v35  ;;  %v1532_v30 = vstv %s3235_s24  ;;  %v3325_v16 = vmul.f32 %v1492_v47, %v1211_v35  ;;  %v3327_v34 = vmul.f32 %v1516_v51, %v1211_v35  ;;  %s3341_s24 = sld [smem:[#allocation2 + $0x1e]] }
  0xa1   : > { %v1524_v17 = vstv %s3237_s25  ;;  %v354_v57 = vadd.f32 %v353_v39, %v320_v44  ;;  %v1540_v60 = vstv %s3253_s27  ;;  %v3347_v50 = vadd.f32 %v425_v28, %v392_v53  ;;  %s3355_s25 = sld [smem:[#allocation2 + $0x86]]  ;;  %s3363_s27 = sld [smem:[#allocation2 + $0x6f]] }
  0xa2   : > { %v3351_v63 = vmul.f32 %v1532_v30, %v1211_v35  ;;  %v1556_v3 = vstv %s3261_s29  ;;  %v1580_v5 = vstv %s3263_s30  ;;  %v1572_v6 = vstv %s3272_s3  ;;  %s3381_s29 = sld [smem:[#allocation2 + $0x81]]  ;;  %s3383_s30 = sld [smem:[#allocation2 + $0x8a]] }
  0xa3   : > { %1143 = vrot.lane.b32.xlu1 %v3076_v2, %s4663_s17  ;;  %1135 = vrot.lane.b32.xlu0 %v3079_v42, %s4663_s17  ;;  %v380_v2 = vadd.f32 %v379_v38, %v346_v1  ;;  %v3258_v42 = vmul.f32 %v3052_v31, %v1204_v11  ;;  %v3349_v38 = vmul.f32 %v1508_v26, %v1211_v35  ;;  %v1596_v10 = vstv %s3274_s4  ;;  %s3391_s3 = sld [smem:[#allocation2 + $0x4b]]  ;;  %s3393_s4 = sld [smem:[#allocation2 + $0x54]] }
  0xa4   : > { %v3353_v1 = vmul.f32 %v1524_v17, %v1211_v35  ;;  %v3375_v12 = vmul.f32 %v3334_v58, %v1540_v60  ;;  %v388_v14 = vadd.f32 %v387_v41, %v354_v57  ;;  %v1604_v18 = vstv %s3293_s6  ;;  %s3421_s6 = sld [smem:[#allocation2 + $0xce]] }
  0xa5   : > { %v690_v40 = vstv %s3295_s1  ;;  %v3403_v24 = vmul.f32 %v3334_v58, %v1580_v5  ;;  %v3406_v27 = vmul.f32 %v3334_v58, %v1572_v6  ;;  %v3409_v28 = vmul.f32 %v3334_v58, %v1596_v10  ;;  %s3423_s1 = sld [smem:[#allocation2 + $0xaa]] }
  0xa6   : > { %v758_v36 = vstv %s3315_s22  ;;  %v3436_v44 = vmul.f32 %v2854_v59, %v690_v40  ;;  %v3442_v47 = vadd.f32 %v3304_v54, %v388_v14  ;;  %v788_v51 = vstv %s3341_s24  ;;  %s3447_s22 = sld [smem:[#allocation2 + $0xc0]]  ;;  %s3477_s24 = sld [smem:[#allocation2 + $0xa5]] }
  0xa7   : > { %1159 = vrot.lane.b32.xlu1 %v3084_v45, %s4663_s17  ;;  %1151 = vrot.lane.b32.xlu0 %v3113_v61, %s4663_s17  ;;  %v1500_v45 = vstv %s3214_s8  ;;  %v3301_v61 = vadd.f32 %v413_v13, %v380_v2  ;;  %s3317_s8 = sld [smem:[#allocation2 + $0x42]]  ;;  %v1588_v13 = vstv %s3285_s5  ;;  %v3400_v2 = vmul.f32 %v3334_v58, %v1556_v3  ;;  %s3411_s5 = sld [smem:[#allocation2 + $0x5d]] }
  0xa8   : > { %v3323_v55 = vmul.f32 %v1500_v45, %v1211_v35  ;;  %v3416_v33 = vmul.f32 %v3334_v58, %v1588_v13  ;;  %v724_v35 = vstv %s3308_s7  ;;  %v686_v45 = vstv %s3329_s16  ;;  %s3439_s7 = sld [smem:[#allocation2 + $0xb7]]  ;;  %s3465_s16 = sld [smem:[#allocation2 + $0xd2]] }
  0xa9   : > { %v3297_v29 = vpop.permute.xlu1 %447  ;;  %v3299_v49 = vpop.permute.xlu0 %431  ;;  %v3456_v30 = vmul.f32 %v2935_v46, %v724_v35  ;;  %v3459_v17 = vmul.f32 %v2999_v7, %v758_v36  ;;  %v1628_v57 = vstv %s3355_s25  ;;  %v3490_v10 = vmul.f32 %v3052_v31, %v788_v51  ;;  %s3492_s25 = sld [smem:[#allocation2 + $0xae]] }
  0xaa   : > { %v800_v13 = vstv %s3383_s30  ;;  %v694_v14 = vstv %s3391_s3  ;;  %s3526_s30 = sld [smem:[#allocation2 + $0x111]]  ;;  %s3541_s3 = sld [smem:[#allocation2 + $0x11a]] }
  0xab   : > { %1175 = vrot.lane.b32.xlu1 %v3145_v19, %s4663_s17  ;;  %1167 = vrot.lane.b32.xlu0 %v3148_v20, %s4663_s17  ;;  %v1548_v19 = vstv %s3246_s26  ;;  %v1564_v20 = vstv %s3255_s28  ;;  %s3357_s26 = sld [smem:[#allocation2 + $0x62]]  ;;  %s3365_s28 = sld [smem:[#allocation2 + $0x78]]  ;;  %4667 = vst [vmem:[#allocation11_spill] sm:$0xff] %v3490_v10 }
  0xac   : > { %v3372_v11 = vmul.f32 %v3334_v58, %v1548_v19  ;;  %v3378_v48 = vmul.f32 %v3334_v58, %v1564_v20  ;;  %v3470_v19 = vmul.f32 %v2854_v59, %v686_v45  ;;  %v698_v20 = vstv %s3363_s27  ;;  %s3502_s27 = sld [smem:[#allocation2 + $0xf2]] }
  0xad   : > { %v3343_v62 = vpop.permute.xlu1 %455  ;;  %v3345_v15 = vpop.permute.xlu0 %439  ;;  %v792_v39 = vstv %s3317_s8  ;;  %s3449_s8 = sld [smem:[#allocation2 + $0xc9]]  ;;  %v3514_v35 = vmul.f32 %v2854_v59, %v698_v20  ;;  %v762_v45 = vstv %s3411_s5  ;;  %v1636_v51 = vstv %s3423_s1  ;;  %s3551_s5 = sld [smem:[#allocation2 + $0xe4]] }
  0xae   : > { %v3462_v54 = vmul.f32 %v3052_v31, %v792_v39  ;;  %v728_v39 = vstv %s3393_s4  ;;  %v3539_v20 = vmul.f32 %v2854_v59, %v694_v14  ;;  %s3549_s4 = sld [smem:[#allocation2 + $0xdb]]  ;;  %v3558_v14 = vmul.f32 %v2999_v7, %v762_v45  ;;  %s3577_s1 = sld [smem:[#allocation2 + $0x47]] }
  0xaf   : > { %1191 = vrot.lane.b32.xlu1 %v3208_v32, %s4663_s17  ;;  %1183 = vrot.lane.b32.xlu0 %v3217_v37, %s4663_s17  ;;  %v3386_v32 = vld [vmem:[%s2624_s14 + $0x21] sm:$0xff]  ;;  %v1612_v37 = vstv %s3287_s0  ;;  %s3413_s0 = sld [smem:[#allocation2 + $0x66]] }
  0xb0   : > { %4665 = vst [vmem:[#allocation9_spill] sm:$0xff] %v3386_v32  ;;  %v3430_v41 = vmul.f32 %v3386_v32, %v1612_v37  ;;  %v3433_v43 = vmul.f32 %v3386_v32, %v1604_v18  ;;  %4666 = vst [vmem:[#allocation10_spill] sm:$0xff] %v3462_v54 }
  0xb1   : > { %v3395_v23 = vpop.permute.xlu1 %471  ;;  %v3397_v22 = vpop.permute.xlu0 %463  ;;  %v1620_v60 = vstv %s3357_s26  ;;  %v732_v3 = vstv %s3365_s28  ;;  %s3494_s26 = sld [smem:[#allocation2 + $0x116]]  ;;  %s3504_s28 = sld [smem:[#allocation2 + $0xff]]  ;;  %4672 = vst [vmem:[#allocation16_spill] sm:$0xff] %v3558_v14 }
  0xb2   : > { %v3511_v40 = vmul.f32 %v3386_v32, %v1620_v60  ;;  %v3517_v36 = vmul.f32 %v2935_v46, %v732_v3  ;;  %v3536_v60 = vmul.f32 %v3052_v31, %v800_v13  ;;  %v3544_v3 = vmul.f32 %v2935_v46, %v728_v39 }
  0xb3   : > { %1207 = vrot.lane.b32.xlu1 %v3258_v42, %s4663_s17  ;;  %1199 = vrot.lane.b32.xlu0 %v3266_v9, %s4663_s17  ;;  %v720_v42 = vstv %s3331_s21  ;;  %v754_v9 = vstv %s3339_s23  ;;  %s3467_s21 = sld [smem:[#allocation2 + $0x93]]  ;;  %s3475_s23 = sld [smem:[#allocation2 + $0x9c]]  ;;  %v474_v10 = vadd.f32 %v3395_v23, %v3280_v52 }
  0xb4   : > { %v3484_v5 = vmul.f32 %v2935_v46, %v720_v42  ;;  %v3487_v6 = vmul.f32 %v2999_v7, %v754_v9  ;;  %4668 = vst [vmem:[#allocation12_spill] sm:$0xff] %v3517_v36  ;;  %v1644_v9 = vstv %s3421_s6  ;;  %4670 = vst [vmem:[#allocation14_spill] sm:$0xff] %v3536_v60  ;;  %v774_v58 = vstv %s3449_s8  ;;  %s3571_s6 = sld [smem:[#allocation2 + $0xf6]]  ;;  %s3602_s8 = sld [smem:[#allocation2 + $0x31]] }
  0xb5   : > { %v3451_v53 = vpop.permute.xlu1 %487  ;;  %v3453_v26 = vpop.permute.xlu0 %479  ;;  %v796_v42 = vstv %s3413_s0  ;;  %4671 = vst [vmem:[#allocation15_spill] sm:$0xff] %v3544_v3  ;;  %v3564_v60 = vmul.f32 %v3386_v32, %v1644_v9  ;;  %s3569_s0 = sld [smem:[#allocation2 + $0xed]]  ;;  %v808_v3 = vstv %s3465_s16  ;;  %v770_v36 = vstv %s3477_s24  ;;  %s3618_s16 = sld [smem:[#allocation2 + $0x3a]] }
  0xb6   : > { %v3561_v39 = vmul.f32 %v3052_v31, %v796_v42  ;;  %v1652_v54 = vstv %s3502_s27  ;;  %v3616_v23 = vmul.f32 %v2999_v7, %v770_v36  ;;  %s3649_s24 = sld [smem:[#allocation2 + $0xd]]  ;;  %s3665_s27 = sld [smem:[#allocation2 + $0x8f]] }
  0xb7   : > { %1487 = vrot.lane.b32.xlu1 %v3306_v56, %s4663_s17  ;;  %1479 = vrot.lane.b32.xlu0 %v3310_v4, %s4663_s17  ;;  %v3497_v56 = vmul.f32 %v3386_v32, %v1628_v57  ;;  %v766_v4 = vstv %s3381_s29  ;;  %s3524_s29 = sld [smem:[#allocation2 + $0x108]] }
  0xb8   : > { %v3533_v57 = vmul.f32 %v2999_v7, %v766_v4  ;;  %4673 = vst [vmem:[#allocation17_spill] sm:$0xff] %v3561_v39  ;;  %v804_v39 = vstv %s3492_s25  ;;  %s3651_s25 = sld [smem:[#allocation2 + $0x16]] }
  0xb9   : > { %v3506_v37 = vpop.permute.xlu1 %503  ;;  %v3508_v18 = vpop.permute.xlu0 %495  ;;  %v702_v45 = vstv %s3467_s21  ;;  %v736_v14 = vstv %s3475_s23  ;;  %s3640_s21 = sld [smem:[#allocation2 + $0x43]]  ;;  %s3642_s23 = sld [smem:[#allocation2 + $0x4]] }
  0xba   : > { %4669 = vst [vmem:[#allocation13_spill] sm:$0xff] %v3533_v57  ;;  %v3567_v57 = vmul.f32 %v3386_v32, %v1636_v51  ;;  %v3590_v51 = vmul.f32 %v2999_v7, %v774_v58  ;;  %v3607_v58 = vmul.f32 %v3052_v31, %v808_v3  ;;  %v3613_v52 = vmul.f32 %v2935_v46, %v736_v14 }
  0xbb   : > { %1503 = vrot.lane.b32.xlu1 %v3323_v55, %s4663_s17  ;;  %1495 = vrot.lane.b32.xlu0 %v3325_v16, %s4663_s17  ;;  %v706_v55 = vstv %s3439_s7  ;;  %v740_v16 = vstv %s3447_s22  ;;  %s3593_s7 = sld [smem:[#allocation2 + $0x23]]  ;;  %s3600_s22 = sld [smem:[#allocation2 + $0x28]]  ;;  %v3635_v14 = vmul.f32 %v3386_v32, %v1652_v54 }
  0xbc   : > { %v3584_v42 = vmul.f32 %v2854_v59, %v706_v55  ;;  %v3587_v9 = vmul.f32 %v2935_v46, %v740_v16  ;;  %4676 = vst [vmem:[#allocation20_spill] sm:$0xff] %v3590_v51  ;;  %4677 = vst [vmem:[#allocation21_spill] sm:$0xff] %v3607_v58  ;;  %v3610_v51 = vmul.f32 %v2854_v59, %v702_v45  ;;  %v782_v58 = vstv %s3526_s30  ;;  %s3705_s30 = sld [smem:[#allocation2 + $0x79]] }
  0xbd   : > { %v3553_v4 = vpop.permute.xlu1 %519  ;;  %v3555_v13 = vpop.permute.xlu0 %511  ;;  %v748_v3 = vstv %s3524_s29  ;;  %v744_v45 = vstv %s3551_s5  ;;  %s3693_s29 = sld [smem:[#allocation2 + $0x70]]  ;;  %s3746_s5 = sld [smem:[#allocation2 + $0x4c]] }
  0xbe   : > { %4674 = vst [vmem:[#allocation18_spill] sm:$0xff] %v3584_v42  ;;  %4675 = vst [vmem:[#allocation19_spill] sm:$0xff] %v3587_v9  ;;  %v3623_v42 = vmul.f32 %v3052_v31, %v804_v39  ;;  %v816_v39 = vstv %s3541_s3  ;;  %s3707_s3 = sld [smem:[#allocation2 + $0x82]] }
  0xbf   : > { %1519 = vrot.lane.b32.xlu1 %v3327_v34, %s4663_s17  ;;  %1511 = vrot.lane.b32.xlu0 %v3349_v38, %s4663_s17  ;;  %v1660_v34 = vstv %s3494_s26  ;;  %v714_v38 = vstv %s3504_s28  ;;  %s3663_s26 = sld [smem:[#allocation2 + $0x1f]]  ;;  %s3677_s28 = sld [smem:[#allocation2 + $0x6b]] }
  0xc0   : > { %4678 = vst [vmem:[#allocation22_spill] sm:$0xff] %v3623_v42  ;;  %v3632_v36 = vmul.f32 %v3386_v32, %v1660_v34  ;;  %v442_v32 = vadd.f32 %v3345_v15, %v3248_v21  ;;  %v2446_v21 = vld [vmem:[%s2624_s14 + $0x80] sm:$0xff]  ;;  %v3690_v15 = vmul.f32 %v2935_v46, %v744_v45 }
  0xc1   : > { %v536_v55 = vpop.permute.xlu1 %535  ;;  %v3604_v16 = vpop.permute.xlu0 %527  ;;  %v3698_v42 = vld [vmem:[%s2624_s14 + $0xc0] sm:$0xff] }
  0xc2   : > { %v3620_v9 = vadd.f32 %v536_v55, %v474_v10  ;;  %v3638_v10 = vmul.f32 %v2854_v59, %v714_v38  ;;  %v3656_v59 = vmul.f32 %v2935_v46, %v748_v3  ;;  %v3659_v38 = vmul.f32 %v2999_v7, %v782_v58  ;;  %v3674_v58 = vld [vmem:[%s2624_s14 + $0x31] sm:$0xff]  ;;  %4681 = vst [vmem:[#allocation25_spill] sm:$0xff] %v3690_v15 }
  0xc3   : > { %1535 = vrot.lane.b32.xlu1 %v3351_v63, %s4663_s17  ;;  %1527 = vrot.lane.b32.xlu0 %v3353_v1, %s4663_s17  ;;  %v490_v63 = vadd.f32 %v3451_v53, %v3347_v50  ;;  %v710_v1 = vstv %s3549_s4  ;;  %v778_v50 = vstv %s3569_s0  ;;  %v434_v55 = vadd.f32 %v3299_v49, %v3195_v0  ;;  %s3730_s4 = sld [smem:[#allocation2 + $0x8b]]  ;;  %s3748_s0 = sld [smem:[#allocation2 + $0x55]] }
  0xc4   : > { %4679 = vst [vmem:[#allocation23_spill] sm:$0xff] %v3659_v38  ;;  %v812_v53 = vstv %s3571_s6  ;;  %v1676_v38 = vstv %s3577_s1  ;;  %v3684_v0 = vmul.f32 %v3052_v31, %v816_v39  ;;  %v3687_v49 = vmul.f32 %v2446_v21, %v710_v1  ;;  %v3702_v39 = vld [vmem:[%s2624_s14 + $0xd0] sm:$0xff]  ;;  %s3757_s6 = sld [smem:[#allocation2 + $0x5e]]  ;;  %s3759_s1 = sld [smem:[#allocation2 + $0x67]] }
  0xc5   : > { %v552_v54 = vpop.permute.xlu1 %551  ;;  %v3653_v34 = vpop.permute.xlu0 %543  ;;  %v3710_v45 = vmul.f32 %v2999_v7, %v778_v50  ;;  %v458_v21 = vadd.f32 %v3343_v62, %v3230_v8  ;;  %v3728_v50 = vld [vmem:[%s2624_s14 + $0xe0] sm:$0xff] }
  0xc6   : > { %v3671_v3 = vadd.f32 %v552_v54, %v490_v63  ;;  %4680 = vst [vmem:[#allocation24_spill] sm:$0xff] %v3684_v0  ;;  %v1668_v63 = vstv %s3593_s7  ;;  %v506_v54 = vadd.f32 %v3506_v37, %v442_v32  ;;  %v860_v0 = vstv %s3602_s8  ;;  %s3767_s7 = sld [smem:[#allocation2 + $0xd7]]  ;;  %s3778_s8 = sld [smem:[#allocation2 + $0xb8]] }
  0xc7   : > { %1551 = vrot.lane.b32.xlu1 %v3372_v11, %s4663_s17  ;;  %1543 = vrot.lane.b32.xlu0 %v3375_v12, %s4663_s17  ;;  %v498_v11 = vadd.f32 %v3508_v18, %v434_v55  ;;  %v826_v12 = vstv %s3600_s22  ;;  %v3713_v32 = vmul.f32 %v3052_v31, %v812_v53  ;;  %v3716_v37 = vmul.f32 %v3674_v58, %v1676_v38  ;;  %s3769_s22 = sld [smem:[#allocation2 + $0xb3]] }
  0xc8   : > { %v894_v18 = vstv %s3618_s16  ;;  %v450_v55 = vadd.f32 %v3297_v29, %v3159_v25  ;;  %v3737_v31 = vmul.f32 %v3674_v58, %v1668_v63  ;;  %v3740_v25 = vmul.f32 %v3698_v42, %v826_v12  ;;  %s3780_s16 = sld [smem:[#allocation2 + $0xc1]] }
  0xc9   : > { %v568_v46 = vpop.permute.xlu1 %567  ;;  %v560_v1 = vpop.permute.xlu0 %559  ;;  %4682 = vst [vmem:[#allocation26_spill] sm:$0xff] %v3713_v32  ;;  %v3743_v8 = vmul.f32 %v3702_v39, %v860_v0  ;;  %v928_v29 = vstv %s3640_s21  ;;  %v522_v62 = vadd.f32 %v3553_v4, %v458_v21  ;;  %v822_v38 = vstv %s3642_s23  ;;  %s3795_s21 = sld [smem:[#allocation2 + $0xca]]  ;;  %s3801_s23 = sld [smem:[#allocation2 + $0xd3]] }
  0xca   : > { %v3723_v15 = vadd.f32 %v568_v46, %v506_v54  ;;  %v3725_v7 = vadd.f32 %v560_v1, %v498_v11  ;;  %v856_v53 = vstv %s3649_s24  ;;  %v3762_v54 = vmul.f32 %v3728_v50, %v894_v18  ;;  %s3803_s24 = sld [smem:[#allocation2 + $0x94]] }
  0xcb   : > { %1567 = vrot.lane.b32.xlu1 %v3378_v48, %s4663_s17  ;;  %1559 = vrot.lane.b32.xlu0 %v3400_v2, %s4663_s17  ;;  %v514_v48 = vadd.f32 %v3555_v13, %v450_v55  ;;  %v3753_v2 = vld [vmem:[%s2624_s14 + $0xf0] sm:$0xff]  ;;  %v890_v11 = vstv %s3651_s25  ;;  %v466_v4 = vadd.f32 %v3397_v22, %v3301_v61  ;;  %v3790_v61 = vmul.f32 %v3698_v42, %v822_v38  ;;  %s3825_s25 = sld [smem:[#allocation2 + $0x9d]] }
  0xcc   : > { %v924_v12 = vstv %s3663_s26  ;;  %v1692_v46 = vstv %s3665_s27  ;;  %v1684_v55 = vstv %s3677_s28  ;;  %v3787_v18 = vmul.f32 %v3753_v2, %v928_v29  ;;  %s3827_s26 = sld [smem:[#allocation2 + $0xa6]]  ;;  %s3842_s27 = sld [smem:[#allocation2 + $0xaf]] }
  0xcd   : > { %v584_v0 = vpop.permute.xlu1 %583  ;;  %v576_v63 = vpop.permute.xlu0 %575  ;;  %v3793_v22 = vmul.f32 %v3702_v39, %v856_v53  ;;  %v530_v21 = vadd.f32 %v3604_v16, %v466_v4  ;;  %v3806_v38 = vmul.f32 %v3728_v50, %v890_v11  ;;  %v3809_v53 = vmul.f32 %v3753_v2, %v924_v12  ;;  %s3848_s28 = sld [smem:[#allocation2 + $0x11f]] }
  0xce   : > { %v3773_v13 = vadd.f32 %v584_v0, %v522_v62  ;;  %v3775_v1 = vadd.f32 %v576_v63, %v514_v48  ;;  %v834_v62 = vstv %s3693_s29  ;;  %v868_v48 = vstv %s3705_s30  ;;  %s3850_s29 = sld [smem:[#allocation2 + $0xfb]]  ;;  %s3858_s30 = sld [smem:[#allocation2 + $0x100]] }
  0xcf   : > { %1583 = vrot.lane.b32.xlu1 %v3403_v24, %s4663_s17  ;;  %1575 = vrot.lane.b32.xlu0 %v3406_v27, %s4663_s17  ;;  %v902_v24 = vstv %s3707_s3  ;;  %4683 = vst [vmem:[#allocation27_spill] sm:$0xff] %v3809_v53  ;;  %v3812_v0 = vmul.f32 %v3674_v58, %v1692_v46  ;;  %v3815_v16 = vmul.f32 %v3674_v58, %v1684_v55  ;;  %v936_v32 = vstv %s3730_s4  ;;  %s3860_s3 = sld [smem:[#allocation2 + $0x109]]  ;;  %s3882_s4 = sld [smem:[#allocation2 + $0x112]] }
  0xd0   : > { %v482_v63 = vadd.f32 %v3453_v26, %v3442_v47  ;;  %v3834_v47 = vmul.f32 %v3698_v42, %v834_v62  ;;  %v3837_v26 = vmul.f32 %v3702_v39, %v868_v48  ;;  %v864_v46 = vstv %s3748_s0  ;;  %s3904_s0 = sld [smem:[#allocation2 + $0xe5]] }
  0xd1   : > { %v600_v27 = vpop.permute.xlu1 %599  ;;  %v592_v29 = vpop.permute.xlu0 %591  ;;  %v898_v55 = vstv %s3757_s6  ;;  %v3853_v62 = vmul.f32 %v3753_v2, %v936_v32  ;;  %v932_v48 = vstv %s3759_s1  ;;  %s3954_s6 = sld [smem:[#allocation2 + $0x11b]]  ;;  %s3981_s1 = sld [smem:[#allocation2 + $0xee]] }
  0xd2   : > { %v3820_v4 = vadd.f32 %v600_v27, %v3620_v9  ;;  %v3822_v11 = vadd.f32 %v592_v29, %v530_v21  ;;  %v3840_v9 = vmul.f32 %v3728_v50, %v902_v24  ;;  %v546_v12 = vadd.f32 %v3653_v34, %v482_v63 }
  0xd3   : > { %1599 = vrot.lane.b32.xlu1 %v3409_v28, %s4663_s17  ;;  %1591 = vrot.lane.b32.xlu0 %v3416_v33, %s4663_s17  ;;  %v830_v28 = vstv %s3746_s5  ;;  %4685 = vst [vmem:[#allocation29_spill] sm:$0xff] %v3853_v62  ;;  %v1708_v24 = vstv %s3767_s7  ;;  %v3877_v62 = vmul.f32 %v3702_v39, %v864_v46  ;;  %v3880_v53 = vmul.f32 %v3728_v50, %v898_v55  ;;  %s3902_s5 = sld [smem:[#allocation2 + $0xdc]]  ;;  %s4005_s7 = sld [smem:[#allocation2 + $0xf7]] }
  0xd4   : > { %4684 = vst [vmem:[#allocation28_spill] sm:$0xff] %v3840_v9  ;;  %v1700_v27 = vstv %s3769_s22  ;;  %v842_v63 = vstv %s3778_s8  ;;  %v876_v9 = vstv %s3780_s16  ;;  %v3874_v32 = vmul.f32 %v3698_v42, %v830_v28  ;;  %s4079_s22 = sld [smem:[#allocation2 + $0x33]]  ;;  %s4081_s8 = sld [smem:[#allocation2 + $0x3c]] }
  0xd5   : > { %v616_v33 = vpop.permute.xlu1 %615  ;;  %v608_v21 = vpop.permute.xlu0 %607  ;;  %4686 = vst [vmem:[#allocation30_spill] sm:$0xff] %v3880_v53  ;;  %v3891_v28 = vmul.f32 %v3674_v58, %v1708_v24  ;;  %v3894_v46 = vmul.f32 %v3674_v58, %v1700_v27  ;;  %v3897_v55 = vmul.f32 %v3698_v42, %v842_v63  ;;  %v3900_v53 = vmul.f32 %v3702_v39, %v876_v9  ;;  %s4083_s16 = sld [smem:[#allocation2 + $0x45]] }
  0xd6   : > { %v3863_v34 = vadd.f32 %v616_v33, %v3671_v3  ;;  %v3865_v29 = vadd.f32 %v608_v21, %v546_v12  ;;  %v3885_v3 = vmul.f32 %v3753_v2, %v932_v48  ;;  %v944_v12 = vstv %s3801_s23  ;;  %s4087_s23 = sld [smem:[#allocation2 + $0xf]] }
  0xd7   : > { %1615 = vrot.lane.b32.xlu1 %v3430_v41, %s4663_s17  ;;  %1607 = vrot.lane.b32.xlu0 %v3433_v43, %s4663_s17  ;;  %v910_v41 = vstv %s3795_s21  ;;  %v838_v33 = vstv %s3803_s24  ;;  %4688 = vst [vmem:[#allocation32_spill] sm:$0xff] %v3891_v28  ;;  %4689 = vst [vmem:[#allocation33_spill] sm:$0xff] %v3894_v46  ;;  %v3918_v63 = vmul.f32 %v3753_v2, %v944_v12  ;;  %s4085_s21 = sld [smem:[#allocation2 + $0x6]]  ;;  %s4089_s24 = sld [smem:[#allocation2 + $0x18]] }
  0xd8   : > { %4687 = vst [vmem:[#allocation31_spill] sm:$0xff] %v3885_v3  ;;  %4690 = vst [vmem:[#allocation34_spill] sm:$0xff] %v3900_v53  ;;  %v872_v3 = vstv %s3825_s25  ;;  %v906_v27 = vstv %s3827_s26  ;;  %v3915_v9 = vmul.f32 %v3728_v50, %v910_v41  ;;  %v1724_v53 = vstv %s3848_s28  ;;  %s4091_s25 = sld [smem:[#allocation2 + $0x21]]  ;;  %s4093_s26 = sld [smem:[#allocation2 + $0x72]] }
  0xd9   : > { %v632_v43 = vpop.permute.xlu1 %631  ;;  %v624_v21 = vpop.permute.xlu0 %623  ;;  %4692 = vst [vmem:[#allocation36_spill] sm:$0xff] %v3918_v63  ;;  %v1716_v46 = vstv %s3850_s29  ;;  %v3932_v41 = vmul.f32 %v3728_v50, %v906_v27  ;;  %v850_v12 = vstv %s3858_s30  ;;  %v884_v63 = vstv %s3860_s3  ;;  %s4097_s28 = sld [smem:[#allocation2 + $0x84]]  ;;  %s4099_s29 = sld [smem:[#allocation2 + $0x8d]] }
  0xda   : > { %v634_v48 = vadd.f32 %v632_v43, %v3723_v15  ;;  %v626_v24 = vadd.f32 %v624_v21, %v3725_v7  ;;  %4691 = vst [vmem:[#allocation35_spill] sm:$0xff] %v3915_v9  ;;  %v3921_v15 = vmul.f32 %v3698_v42, %v838_v33  ;;  %v940_v7 = vstv %s3842_s27  ;;  %s4095_s27 = sld [smem:[#allocation2 + $0x7b]]  ;;  %s4101_s30 = sld [smem:[#allocation2 + $0x4e]] }
  0xdb   : > { %1631 = vrot.lane.b32.xlu1 %v3497_v56, %s4663_s17  ;;  %1623 = vrot.lane.b32.xlu0 %v3511_v40, %s4663_s17  ;;  %v3929_v40 = vmul.f32 %v3702_v39, %v872_v3  ;;  %v3945_v3 = vmul.f32 %v3753_v2, %v940_v7  ;;  %v3961_v27 = vmul.f32 %v3698_v42, %v850_v12  ;;  %v880_v7 = vstv %s3904_s0  ;;  %v4697_v12 = vld [vmem:[#allocation13_spill] sm:$0xff]  ;;  %s4103_s3 = sld [smem:[#allocation2 + $0x57]]  ;;  %s4116_s0 = sld [smem:[#allocation2 + $0xba]] }
  0xdc   : > { %v692_v43 = vadd.f32 %v3436_v44, %v634_v48  ;;  %v688_v21 = vadd.f32 %v3470_v19, %v626_v24  ;;  %v3948_v48 = vmul.f32 %v3674_v58, %v1724_v53  ;;  %v3964_v53 = vmul.f32 %v3702_v39, %v884_v63 }
  0xdd   : > { %v648_v56 = vpop.permute.xlu1 %647  ;;  %v640_v28 = vpop.permute.xlu0 %639 }
  0xde   : > { %v726_v33 = vadd.f32 %v3456_v30, %v692_v43  ;;  %v722_v9 = vadd.f32 %v3484_v5, %v688_v21  ;;  %v650_v44 = vadd.f32 %v648_v56, %v3773_v13  ;;  %v642_v19 = vadd.f32 %v640_v28, %v3775_v1  ;;  %v4693_v43 = vld [vmem:[#allocation10_spill] sm:$0xff]  ;;  %v4694_v56 = vld [vmem:[#allocation11_spill] sm:$0xff] }
  0xdf   : > { %1647 = vrot.lane.b32.xlu1 %v3564_v60, %s4663_s17  ;;  %1639 = vrot.lane.b32.xlu0 %v3567_v57, %s4663_s17  ;;  %v3951_v30 = vmul.f32 %v3674_v58, %v1716_v46  ;;  %v918_v5 = vstv %s3882_s4  ;;  %v846_v46 = vstv %s3902_s5  ;;  %s4105_s4 = sld [smem:[#allocation2 + $0x60]]  ;;  %s4114_s5 = sld [smem:[#allocation2 + $0x69]] }
  0xe0   : > { %v760_v13 = vadd.f32 %v3459_v17, %v726_v33  ;;  %v756_v60 = vadd.f32 %v3487_v6, %v722_v9  ;;  %v700_v1 = vadd.f32 %v3514_v35, %v650_v44  ;;  %v696_v57 = vadd.f32 %v3539_v20, %v642_v19  ;;  %v4695_v33 = vld [vmem:[#allocation12_spill] sm:$0xff]  ;;  %v4696_v9 = vld [vmem:[#allocation15_spill] sm:$0xff] }
  0xe1   : > { %v664_v28 = vpop.permute.xlu1 %663  ;;  %v656_v24 = vpop.permute.xlu0 %655  ;;  %v3979_v63 = vmul.f32 %v3728_v50, %v918_v5  ;;  %v847_v5 = vmul.f32 %v3698_v42, %v846_v46 }
  0xe2   : > { %v794_v21 = vadd.f32 %v4693_v43, %v760_v13  ;;  %v790_v17 = vadd.f32 %v4694_v56, %v756_v60  ;;  %v734_v6 = vadd.f32 %v4695_v33, %v700_v1  ;;  %v730_v35 = vadd.f32 %v4696_v9, %v696_v57  ;;  %v4698_v13 = vld [vmem:[#allocation16_spill] sm:$0xff]  ;;  %v4700_v43 = vld [vmem:[#allocation14_spill] sm:$0xff]  ;;  %v4701_v33 = vld [vmem:[#allocation17_spill] sm:$0xff] }
  0xe3   : > { %v666_v20 = vadd.f32 %v664_v28, %v3820_v4  ;;  %v658_v44 = vadd.f32 %v656_v24, %v3822_v11  ;;  %1663 = vrot.lane.b32.xlu1 %v3632_v36, %s4663_s17  ;;  %1655 = vrot.lane.b32.xlu0 %v3635_v14, %s4663_s17  ;;  %v4699_v11 = vld [vmem:[#allocation18_spill] sm:$0xff]  ;;  %v3991_v24 = vmul.f32 %v3702_v39, %v880_v7 }
  0xe4   : > { %v768_v19 = vadd.f32 %v4697_v12, %v734_v6  ;;  %v764_v60 = vadd.f32 %v4698_v13, %v730_v35  ;;  %v828_v1 = vadd.f32 %v3740_v25, %v794_v21  ;;  %v824_v4 = vadd.f32 %v3790_v61, %v790_v17  ;;  %v4702_v21 = vld [vmem:[#allocation19_spill] sm:$0xff]  ;;  %v4706_v13 = vld [vmem:[#allocation22_spill] sm:$0xff] }
  0xe5   : > { %v708_v57 = vadd.f32 %v4699_v11, %v666_v20  ;;  %v704_v36 = vadd.f32 %v3610_v51, %v658_v44  ;;  %v680_v28 = vpop.permute.xlu1 %679  ;;  %v672_v14 = vpop.permute.xlu0 %671  ;;  %v952_v51 = vstv %s3954_s6  ;;  %s4120_s6 = sld [smem:[#allocation2 + $0xc3]] }
  0xe6   : > { %v802_v56 = vadd.f32 %v4700_v43, %v768_v19  ;;  %v798_v6 = vadd.f32 %v4701_v33, %v764_v60  ;;  %v682_v25 = vadd.f32 %v680_v28, %v3863_v34  ;;  %v674_v61 = vadd.f32 %v672_v14, %v3865_v29 }
  0xe7   : > { %v742_v17 = vadd.f32 %v4702_v21, %v708_v57  ;;  %v738_v9 = vadd.f32 %v3613_v52, %v704_v36  ;;  %1679 = vrot.lane.b32.xlu1 %v3716_v37, %s4663_s17  ;;  %1671 = vrot.lane.b32.xlu0 %v3737_v31, %s4663_s17  ;;  %v862_v42 = vadd.f32 %v3743_v8, %v828_v1  ;;  %v4703_v52 = vld [vmem:[#allocation20_spill] sm:$0xff] }
  0xe8   : > { %v716_v39 = vadd.f32 %v3638_v10, %v682_v25  ;;  %v712_v34 = vadd.f32 %v3687_v49, %v674_v61  ;;  %v858_v29 = vadd.f32 %v3793_v22, %v824_v4  ;;  %v836_v46 = vadd.f32 %v3834_v47, %v802_v56  ;;  %v4704_v10 = vld [vmem:[#allocation25_spill] sm:$0xff]  ;;  %v4711_v56 = vld [vmem:[#allocation26_spill] sm:$0xff] }
  0xe9   : > { %v776_v7 = vadd.f32 %v4703_v52, %v742_v17  ;;  %v772_v37 = vadd.f32 %v3616_v23, %v738_v9  ;;  %v968_v35 = vpop.permute.xlu1 %967  ;;  %v896_v31 = vadd.f32 %v3762_v54, %v862_v42  ;;  %v960_v8 = vpop.permute.xlu0 %959  ;;  %v832_v20 = vadd.f32 %v3874_v32, %v798_v6  ;;  %v4705_v47 = vld [vmem:[#allocation21_spill] sm:$0xff]  ;;  %v4713_v61 = vld [vmem:[#allocation30_spill] sm:$0xff]  ;;  %v4714_v17 = vld [vmem:[#allocation32_spill] sm:$0xff] }
  0xea   : > { %v750_v44 = vadd.f32 %v3656_v59, %v716_v39  ;;  %v746_v12 = vadd.f32 %v4704_v10, %v712_v34  ;;  %v892_v49 = vadd.f32 %v3806_v38, %v858_v29  ;;  %v870_v22 = vadd.f32 %v3837_v26, %v836_v46  ;;  %v4707_v59 = vld [vmem:[#allocation23_spill] sm:$0xff]  ;;  %v4709_v26 = vld [vmem:[#allocation28_spill] sm:$0xff]  ;;  %v4715_v9 = vld [vmem:[#allocation33_spill] sm:$0xff] }
  0xeb   : > { %v810_v19 = vadd.f32 %v4705_v47, %v776_v7  ;;  %v806_v60 = vadd.f32 %v4706_v13, %v772_v37  ;;  %v930_v23 = vadd.f32 %v3787_v18, %v896_v31  ;;  %1695 = vrot.lane.b32.xlu1 %v3812_v0, %s4663_s17  ;;  %1687 = vrot.lane.b32.xlu0 %v3815_v16, %s4663_s17  ;;  %v914_v54 = vstv %s3981_s1  ;;  %v4708_v38 = vld [vmem:[#allocation27_spill] sm:$0xff]  ;;  %v4710_v16 = vld [vmem:[#allocation24_spill] sm:$0xff]  ;;  %s4122_s1 = sld [smem:[#allocation2 + $0xcc]] }
  0xec   : > { %v784_v32 = vadd.f32 %v4707_v59, %v750_v44  ;;  %v780_v1 = vadd.f32 %v3710_v45, %v746_v12  ;;  %v926_v4 = vadd.f32 %v4708_v38, %v892_v49  ;;  %v904_v11 = vadd.f32 %v4709_v26, %v870_v22  ;;  %v4712_v45 = vld [vmem:[#allocation29_spill] sm:$0xff]  ;;  %v4717_v52 = vld [vmem:[#allocation31_spill] sm:$0xff]  ;;  %v4719_v49 = vld [vmem:[#allocation36_spill] sm:$0xff] }
  0xed   : > { %v970_v57 = vadd.f32 %v968_v35, %v930_v23  ;;  %v984_v36 = vpop.permute.xlu1 %983  ;;  %v976_v28 = vpop.permute.xlu0 %975  ;;  %v866_v18 = vadd.f32 %v3877_v62, %v832_v20  ;;  %v844_v0 = vadd.f32 %v3897_v55, %v810_v19  ;;  %v840_v14 = vadd.f32 %v3921_v15, %v806_v60  ;;  %v4716_v62 = vld [vmem:[#allocation34_spill] sm:$0xff]  ;;  %v4718_v35 = vld [vmem:[#allocation35_spill] sm:$0xff] }
  0xee   : > { %v818_v43 = vadd.f32 %v4710_v16, %v784_v32  ;;  %v814_v33 = vadd.f32 %v4711_v56, %v780_v1  ;;  %v962_v6 = vadd.f32 %v960_v8, %v926_v4  ;;  %v938_v25 = vadd.f32 %v4712_v45, %v904_v11 }
  0xef   : > { %v900_v21 = vadd.f32 %v4713_v61, %v866_v18  ;;  %1711 = vrot.lane.b32.xlu1 %v4714_v17, %s4663_s17  ;;  %1703 = vrot.lane.b32.xlu0 %v4715_v9, %s4663_s17  ;;  %v878_v42 = vadd.f32 %v4716_v62, %v844_v0  ;;  %v874_v55 = vadd.f32 %v3929_v40, %v840_v14  ;;  %v948_v15 = vstv %s4005_s7  ;;  %v4720_v9 = vld [vmem:[#allocation8_spill] sm:$0xff]  ;;  %s4138_s7 = sld [smem:[#allocation2 + $0xd5]] }
  0xf0   : > { %v986_v39 = vadd.f32 %v984_v36, %v938_v25  ;;  %v852_v34 = vadd.f32 %v3961_v27, %v818_v43  ;;  %v915_v29 = vmul.f32 %v3728_v50, %v914_v54  ;;  %v848_v46 = vadd.f32 %v847_v5, %v814_v33 }
  0xf1   : > { %v934_v7 = vadd.f32 %v4717_v52, %v900_v21  ;;  %v1000_v37 = vpop.permute.xlu1 %999  ;;  %v912_v31 = vadd.f32 %v4718_v35, %v878_v42  ;;  %v992_v8 = vpop.permute.xlu0 %991  ;;  %v908_v20 = vadd.f32 %v3932_v41, %v874_v55  ;;  %v953_v44 = vmul.f32 %v3753_v2, %v952_v51  ;;  %v4129_v21 = vld [vmem:[%s2624_s14 + $0x1] sm:$0xff] }
  0xf2   : > { %v886_v10 = vadd.f32 %v3964_v53, %v852_v34  ;;  %v949_v40 = vmul.f32 %v3753_v2, %v948_v15  ;;  %v882_v12 = vadd.f32 %v3991_v24, %v848_v46  ;;  %v1250_v56 = vstv %s4079_s22  ;;  %v4721_v42 = vld [vmem:[#allocation9_spill] sm:$0xff]  ;;  %s4146_s22 = sld [smem:[#allocation2 + $0x9f]] }
  0xf3   : > { %v978_v27 = vadd.f32 %v976_v28, %v934_v7  ;;  %v946_v50 = vadd.f32 %v4719_v49, %v912_v31  ;;  %v942_v5 = vadd.f32 %v3945_v3, %v908_v20  ;;  %1727 = vrot.lane.b32.xlu1 %v3948_v48, %s4663_s17  ;;  %1719 = vrot.lane.b32.xlu0 %v3951_v30, %s4663_s17  ;;  %s4073_s17 = sld [smem:[#allocation2 + $0x2a]]  ;;  %v1283_v33 = vstv %s4081_s8  ;;  %s4148_s8 = sld [smem:[#allocation2 + $0xa8]] }
  0xf4   : > { %v920_v41 = vadd.f32 %v3979_v63, %v886_v10  ;;  %v916_v51 = vadd.f32 %v915_v29, %v882_v12  ;;  %v1213_v45 = vstv %s4085_s21  ;;  %v4133_v62 = vmul.f32 %v4720_v9, %v1250_v56  ;;  %s4158_s21 = sld [smem:[#allocation2 + $0x102]] }
  0xf5   : > { %v1002_v22 = vadd.f32 %v1000_v37, %v946_v50  ;;  %v994_v53 = vadd.f32 %v992_v8, %v942_v5  ;;  %v1016_v47 = vpop.permute.xlu1 %1015  ;;  %v1008_v2 = vpop.permute.xlu0 %1007  ;;  %v4136_v55 = vmul.f32 %v4721_v42, %v1283_v33  ;;  %v1246_v15 = vstv %s4087_s23  ;;  %v4175_v50 = vld [vmem:[%s2624_s14 + $0x11] sm:$0xff]  ;;  %s4193_s23 = sld [smem:[#allocation2 + $0x10b]] }
  0xf6   : > { %v954_v19 = vadd.f32 %v953_v44, %v920_v41  ;;  %v950_v24 = vadd.f32 %v949_v40, %v916_v51  ;;  %v1312_v34 = vstv %s4091_s25  ;;  %v1225_v29 = vstv %s4093_s26  ;;  %s4207_s25 = sld [smem:[#allocation2 + $0x114]]  ;;  %s4209_s26 = sld [smem:[#allocation2 + $0xe7]] }
  0xf7   : > { %v1214_v52 = vmul.f32 %v4129_v21, %v1213_v45  ;;  %v1258_v7 = vstv %s4095_s27  ;;  %v1291_v37 = vstv %s4097_s28  ;;  %v1324_v35 = vstv %s4099_s29  ;;  %s4229_s27 = sld [smem:[#allocation2 + $0xf0]]  ;;  %s4235_s28 = sld [smem:[#allocation2 + $0x11d]] }
  0xf8   : > { %v1018_v13 = vadd.f32 %v1016_v47, %v954_v19  ;;  %v1010_v60 = vadd.f32 %v1008_v2, %v950_v24  ;;  %v1221_v31 = vstv %s4101_s30  ;;  %v1254_v8 = vstv %s4103_s3  ;;  %s4238_s29 = sld [smem:[#allocation2 + $0xf9]]  ;;  %s2304_s30 = sld [smem:[#allocation2 + $0x2b]] }
  0xf9   : > { %v1032_v23 = vpop.permute.xlu1 %1031  ;;  %v1024_v54 = vpop.permute.xlu0 %1023  ;;  %v1217_v43 = vstv %s4073_s17  ;;  %s4140_s17 = sld [smem:[#allocation2 + $0x96]]  ;;  %v1287_v20 = vstv %s4105_s4  ;;  %v1247_v40 = vmul.f32 %v4720_v9, %v1246_v15  ;;  %v1226_v49 = vmul.f32 %v4129_v21, %v1225_v29  ;;  %s2303_s3 = sld [smem:[#allocation2 + $0x7]] }
  0xfa   : > { %v4061_v3 = vadd.f32 %v1032_v23, %v970_v57  ;;  %v4063_v59 = vadd.f32 %v1024_v54, %v962_v6  ;;  %v1316_v6 = vstv %s4083_s16  ;;  %v1218_v17 = vmul.f32 %v4129_v21, %v1217_v43  ;;  %s4156_s16 = sld [smem:[#allocation2 + $0xb1]]  ;;  %s4300_s4 = sld [smem:[#allocation2 + $0x34]] }
  0xfb   : > { %v4151_v46 = vmul.f32 %v3674_v58, %v1316_v6  ;;  %v4178_v5 = vmul.f32 %v4175_v50, %v1258_v7  ;;  %v4181_v41 = vmul.f32 %v4721_v42, %v1291_v37  ;;  %v1320_v51 = vstv %s4114_s5  ;;  %v2449_v37 = vld [vmem:[%s2624_s14 + $0x21] sm:$0xff]  ;;  %s4302_s5 = sld [smem:[#allocation2 + $0x10]] }
  0xfc   : > { %v1222_v47 = vmul.f32 %v4129_v21, %v1221_v31  ;;  %v1255_v2 = vmul.f32 %v4175_v50, %v1254_v8  ;;  %v4191_v19 = vmul.f32 %v4721_v42, %v1287_v20  ;;  %v1299_v23 = vstv %s4122_s1  ;;  %s4308_s1 = sld [smem:[#allocation2 + $0x46]] }
  0xfd   : > { %v1048_v48 = vpop.permute.xlu1 %1047  ;;  %v1040_v32 = vpop.permute.xlu0 %1039  ;;  %v4215_v43 = vmul.f32 %v4721_v42, %v1299_v23  ;;  %v1241_v33 = vstv %s4158_s21  ;;  %v1274_v31 = vstv %s4193_s23  ;;  %v1307_v23 = vstv %s4207_s25  ;;  %s4324_s21 = sld [smem:[#allocation2 + $0x97]]  ;;  %s4333_s23 = sld [smem:[#allocation2 + $0x85]] }
  0xfe   : > { %v4065_v30 = vadd.f32 %v1048_v48, %v986_v39  ;;  %v4067_v63 = vadd.f32 %v1040_v32, %v978_v27  ;;  %v1279_v39 = vstv %s4089_s24  ;;  %v4171_v27 = vmul.f32 %v3674_v58, %v1312_v34  ;;  %s4195_s24 = sld [smem:[#allocation2 + $0xde]]  ;;  %s4341_s25 = sld [smem:[#allocation2 + $0xbb]] }
  0xff   : > { %v1280_v12 = vmul.f32 %v4721_v42, %v1279_v39  ;;  %v4202_v32 = vmul.f32 %v3674_v58, %v1320_v51 }
 0x100   : > { %v1328_v56 = vstv %s4156_s16  ;;  %s4322_s16 = sld [smem:[#allocation2 + $0x58]] }
 0x101   : > { %v1064_v1 = vpop.permute.xlu1 %1063  ;;  %v1056_v38 = vpop.permute.xlu0 %1055 }
 0x102   : > { %v4069_v4 = vadd.f32 %v1064_v1, %v1002_v22  ;;  %v4071_v26 = vadd.f32 %v1056_v38, %v994_v53  ;;  %v1233_v22 = vstv %s4116_s0  ;;  %v4186_v53 = vmul.f32 %v3674_v58, %v1324_v35  ;;  %s4304_s0 = sld [smem:[#allocation2 + $0x4f]] }
 0x103   : > { %v1234_v1 = vmul.f32 %v4129_v21, %v1233_v22  ;;  %v1332_v38 = vstv %s4138_s7  ;;  %s4314_s7 = sld [smem:[#allocation2 + $0x19]] }
 0x104   : > { %v4224_v29 = vmul.f32 %v3674_v58, %v1332_v38  ;;  %v1237_v8 = vstv %s4195_s24  ;;  %s4335_s24 = sld [smem:[#allocation2 + $0x61]] }
 0x105   : > { %v1080_v11 = vpop.permute.xlu1 %1079  ;;  %v1072_v36 = vpop.permute.xlu0 %1071 }
 0x106   : > { %v4075_v57 = vadd.f32 %v1080_v11, %v1018_v13  ;;  %v4077_v28 = vadd.f32 %v1072_v36, %v1010_v60  ;;  %v1266_v60 = vstv %s4120_s6  ;;  %v1229_v11 = vstv %s4140_s17  ;;  %s4306_s6 = sld [smem:[#allocation2 + $0x3d]]  ;;  %s4316_s17 = sld [smem:[#allocation2 + $0x73]] }
 0x107   : > { %v1230_v42 = vmul.f32 %v4129_v21, %v1229_v11 }
 0x109   : > { %v1096_v18 = vpop.permute.xlu1 %1095  ;;  %v1088_v0 = vpop.permute.xlu0 %1087 }
 0x10a   : > { %v1098_v24 = vadd.f32 %v1096_v18, %v4061_v3  ;;  %v1090_v13 = vadd.f32 %v1088_v0, %v4063_v59  ;;  %v1262_v59 = vstv %s4146_s22  ;;  %v1295_v18 = vstv %s4148_s8  ;;  %s4318_s22 = sld [smem:[#allocation2 + $0x22]]  ;;  %s4320_s8 = sld [smem:[#allocation2 + $0x7c]] }
 0x10b   : > { %v1267_v0 = vmul.f32 %v4175_v50, %v1266_v60  ;;  %v1263_v7 = vmul.f32 %v4175_v50, %v1262_v59  ;;  %v1296_v35 = vmul.f32 %v2449_v37, %v1295_v18 }
 0x10d   : > { %v4107_v14 = vpop.permute.xlu1 %1111  ;;  %v4109_v16 = vpop.permute.xlu0 %1103 }
 0x10e   : > { %v1114_v6 = vadd.f32 %v4107_v14, %v4065_v30  ;;  %v1106_v45 = vadd.f32 %v4109_v16, %v4067_v63 }
 0x111   : > { %v4124_v25 = vpop.permute.xlu1 %1127  ;;  %v4126_v61 = vpop.permute.xlu0 %1119 }
 0x115   : > { %v4164_v44 = vpop.permute.xlu1 %1143  ;;  %v4166_v10 = vpop.permute.xlu0 %1135 }
 0x119   : > { %v1160_v54 = vpop.permute.xlu1 %1159  ;;  %v1152_v48 = vpop.permute.xlu0 %1151 }
 0x11a   : > { %v1162_v3 = vadd.f32 %v1160_v54, %v1098_v24  ;;  %v1154_v36 = vadd.f32 %v1152_v48, %v1090_v13  ;;  %v1122_v24 = vadd.f32 %v4126_v61, %v4071_v26  ;;  %v1270_v54 = vstv %s4209_s26  ;;  %s4343_s26 = sld [smem:[#allocation2 + $0xa0]] }
 0x11b   : > { %v1238_v26 = vmul.f32 %v4129_v21, %v1237_v8  ;;  %v1138_v61 = vadd.f32 %v4166_v10, %v4077_v28  ;;  %v1349_v8 = vstv %s2304_s30  ;;  %s4370_s30 = sld [smem:[#allocation2 + $0xc4]] }
 0x11c   : > { %v1219_v9 = vadd.f32 %v1218_v17, %v1162_v3  ;;  %v1215_v15 = vadd.f32 %v1214_v52, %v1154_v36  ;;  %v1329_v17 = vmul.f32 %v3674_v58, %v1328_v56  ;;  %v1242_v52 = vmul.f32 %v4129_v21, %v1241_v33 }
 0x11d   : > { %v1176_v39 = vpop.permute.xlu1 %1175  ;;  %v1168_v34 = vpop.permute.xlu0 %1167  ;;  %v1271_v3 = vmul.f32 %v4175_v50, %v1270_v54  ;;  %v1303_v36 = vstv %s4229_s27  ;;  %v1336_v56 = vstv %s4238_s29  ;;  %s4349_s27 = sld [smem:[#allocation2 + $0xdf]]  ;;  %v4352_v54 = vld [vmem:[%s2624_s14 + $0x61] sm:$0xff]  ;;  %s4357_s29 = sld [smem:[#allocation2 + $0x6a]] }
 0x11e   : > { %v1252_v30 = vadd.f32 %v4133_v62, %v1219_v9  ;;  %v1248_v63 = vadd.f32 %v1247_v40, %v1215_v15  ;;  %v1178_v14 = vadd.f32 %v1176_v39, %v1114_v6  ;;  %v1170_v16 = vadd.f32 %v1168_v34, %v1106_v45 }
 0x11f   : > { %v1130_v40 = vadd.f32 %v4124_v25, %v4069_v4  ;;  %v1275_v4 = vmul.f32 %v4175_v50, %v1274_v31  ;;  %v1146_v25 = vadd.f32 %v4164_v44, %v4075_v57  ;;  %v1304_v33 = vmul.f32 %v2449_v37, %v1303_v36  ;;  %v4327_v31 = vld [vmem:[%s2624_s14 + $0x41] sm:$0xff] }
 0x120   : > { %v1285_v20 = vadd.f32 %v4136_v55, %v1252_v30  ;;  %v1281_v51 = vadd.f32 %v1280_v12, %v1248_v63  ;;  %v1227_v22 = vadd.f32 %v1226_v49, %v1178_v14  ;;  %v1223_v62 = vadd.f32 %v1222_v47, %v1170_v16 }
 0x121   : > { %v1192_v13 = vpop.permute.xlu1 %1191  ;;  %v1184_v60 = vpop.permute.xlu0 %1183  ;;  %v1337_v39 = vmul.f32 %v3674_v58, %v1336_v56  ;;  %v1386_v36 = vstv %s4322_s16  ;;  %s148_s16 = sand.u32 1, %s2523_s10  }
 0x122   : > { %v4248_v48 = vadd.f32 %v4151_v46, %v1285_v20  ;;  %v4251_v38 = vadd.f32 %v4171_v27, %v1281_v51  ;;  %v1260_v55 = vadd.f32 %v4178_v5, %v1227_v22  ;;  %v1256_v12 = vadd.f32 %v1255_v2, %v1223_v62  ;;  %v4338_v62 = vld [vmem:[%s2624_s14 + $0x51] sm:$0xff] }
 0x123   : > { %v1194_v49 = vadd.f32 %v1192_v13, %v1130_v40  ;;  %v1186_v47 = vadd.f32 %v1184_v60, %v1122_v24  ;;  %v1345_v20 = vstv %s2303_s3  ;;  %v1382_v40 = vstv %s4300_s4  ;;  %s4372_s3 = sld [smem:[#allocation2 + $0x103]]  ;;  %s4378_s4 = sld [smem:[#allocation2 + $0xa9]] }
 0x124   : > { %v1293_v46 = vadd.f32 %v4181_v41, %v1260_v55  ;;  %v1289_v27 = vadd.f32 %v4191_v19, %v1256_v12  ;;  %v1340_v41 = vstv %s4235_s28  ;;  %v1308_v19 = vmul.f32 %v2449_v37, %v1307_v23  ;;  %s4355_s28 = sld [smem:[#allocation2 + $0x8e]] }
 0x125   : > { %v1235_v5 = vadd.f32 %v1234_v1, %v1194_v49  ;;  %v1231_v2 = vadd.f32 %v1230_v42, %v1186_v47  ;;  %v1208_v11 = vpop.permute.xlu1 %1207  ;;  %v1200_v59 = vpop.permute.xlu0 %1199  ;;  %v1350_v24 = vmul.f32 %v4327_v31, %v1349_v8  ;;  %v1346_v13 = vmul.f32 %v4327_v31, %v1345_v20 }
 0x126   : > { %v4265_v21 = vadd.f32 %v4186_v53, %v1293_v46  ;;  %v4268_v57 = vadd.f32 %v4202_v32, %v1289_v27  ;;  %v1210_v44 = vadd.f32 %v1208_v11, %v1146_v25  ;;  %v1202_v28 = vadd.f32 %v1200_v59, %v1138_v61 }
 0x127   : > { %v1268_v10 = vadd.f32 %v1267_v0, %v1235_v5  ;;  %v1264_v18 = vadd.f32 %v1263_v7, %v1231_v2  ;;  %v1341_v32 = vmul.f32 %v3674_v58, %v1340_v41  ;;  %v1378_v60 = vstv %s4302_s5  ;;  %s4390_s5 = sld [smem:[#allocation2 + $0xcd]] }
 0x128   : > { %v1243_v1 = vadd.f32 %v1242_v52, %v1210_v44  ;;  %v1239_v6 = vadd.f32 %v1238_v26, %v1202_v28  ;;  %v1353_v23 = vstv %s4304_s0  ;;  %v1415_v55 = vstv %s4306_s6  ;;  %s4400_s0 = sld [smem:[#allocation2 + $0xb2]]  ;;  %s4402_s6 = sld [smem:[#allocation2 + $0x10c]] }
 0x129   : > { %v1301_v50 = vadd.f32 %v4215_v43, %v1268_v10  ;;  %v1297_v45 = vadd.f32 %v1296_v35, %v1264_v18  ;;  %v4273_v9 = vpop.permute.xlu1 %1487  ;;  %v4275_v53 = vpop.permute.xlu0 %1479  ;;  %v1383_v47 = vmul.f32 %v4338_v62, %v1382_v40  ;;  %v1448_v26 = vstv %s4308_s1  ;;  %s4410_s1 = sld [smem:[#allocation2 + $0xf1]] }
 0x12a   : > { %v1276_v15 = vadd.f32 %v1275_v4, %v1243_v1  ;;  %v1272_v0 = vadd.f32 %v1271_v3, %v1239_v6  ;;  %v4365_v4 = vld [vmem:[%s2624_s14 + $0x71] sm:$0xff]  ;;  %v1411_v25 = vstv %s4314_s7  ;;  %v1357_v61 = vstv %s4316_s17  ;;  %s4384_s14 = sld [smem:[#allocation2 + $0xe8]]  ;;  %s4423_s7 = sld [smem:[#allocation2 + $0xd6]] }
 0x12b   : > { %v4280_v34 = vadd.f32 %v4224_v29, %v1301_v50  ;;  %v4282_v42 = vadd.f32 %v1329_v17, %v1297_v45  ;;  %v1379_v46 = vmul.f32 %v4338_v62, %v1378_v60  ;;  %v1444_v27 = vstv %s4318_s22  ;;  %s4426_s17 = sld [smem:[#allocation2 + $0x115]]  ;;  %s4433_s22 = sld [smem:[#allocation2 + $0xfa]] }
 0x12c   : > { %v1309_v7 = vadd.f32 %v1308_v19, %v1276_v15  ;;  %v1305_v37 = vadd.f32 %v1304_v33, %v1272_v0  ;;  %v1390_v5 = vstv %s4320_s8  ;;  %v1354_v2 = vmul.f32 %v4327_v31, %v1353_v23  ;;  %s4444_s8 = sld [smem:[#allocation2 + $0x11e]] }
 0x12d   : > { %v4284_v30 = vpop.permute.xlu1 %1503  ;;  %v4286_v43 = vpop.permute.xlu0 %1495  ;;  %v1351_v11 = vadd.f32 %v1350_v24, %v4248_v48  ;;  %v1347_v3 = vadd.f32 %v1346_v13, %v4251_v38  ;;  %v1361_v59 = vstv %s4324_s21  ;;  %v1416_v44 = vmul.f32 %v4352_v54, %v1415_v55  ;;  %s2058_s21 = sshll.u32 %s148_s16, 6 }
 0x12e   : > { %v4288_v35 = vadd.f32 %v1341_v32, %v1309_v7  ;;  %v4290_v63 = vadd.f32 %v1337_v39, %v1305_v37  ;;  %v1449_v28 = vmul.f32 %v4365_v4, %v1448_v26  ;;  %v1412_v10 = vmul.f32 %v4352_v54, %v1411_v25 }
 0x12f   : > { %v1358_v18 = vmul.f32 %v4327_v31, %v1357_v61  ;;  %v1445_v41 = vmul.f32 %v4365_v4, %v1444_v27  ;;  %v1391_v56 = vmul.f32 %v4338_v62, %v1390_v5  ;;  %v1423_v19 = vstv %s4333_s23  ;;  %s4571_s23 = scalar_lea.vmem [#allocation5], %s2058_s21 }
 0x130   : > { %v1419_v1 = vstv %s4335_s24  ;;  %v1387_v33 = vmul.f32 %v4338_v62, %v1386_v36  ;;  %v1365_v6 = vstv %s4341_s25  ;;  %v1362_v50 = vmul.f32 %v4327_v31, %v1361_v59  ;;  %s2376_s24 = sshll.u32 %s2574_s13, 10  ;;  %s1978_s25 = sshll.u32 %s4571_s23, 4  ;;  %s4600_s25 = int_to_ptr.vmem [resolvable:$true] %s1978_s25 }
 0x131   : > { %v4292_v14 = vpop.permute.xlu1 %1519  ;;  %v4294_v16 = vpop.permute.xlu0 %1511  ;;  %v1394_v45 = vstv %s4343_s26  ;;  %v1384_v32 = vadd.f32 %v1383_v47, %v1351_v11  ;;  %v1380_v15 = vadd.f32 %v1379_v46, %v1347_v3  ;;  %v1355_v39 = vadd.f32 %v1354_v2, %v4268_v57  ;;  %s4606_s13 = scalar_lea.sflag [#allocation3], %s148_s16 }
 0x132   : > { %v1369_v0 = vstv %s4349_s27  ;;  %v1424_v7 = vmul.f32 %v4352_v54, %v1423_v19  ;;  %v1456_v37 = vstv %s4355_s28  ;;  %v1359_v8 = vadd.f32 %v1358_v18, %v4265_v21  ;;  %s4598_s28 = scalar_lea.hbm %s4649_s2, %s2376_s24 }
 0x133   : > { %v1420_v20 = vmul.f32 %v4352_v54, %v1419_v1  ;;  %v1452_v13 = vstv %s4357_s29  ;;  %v1366_v60 = vmul.f32 %v4327_v31, %v1365_v6  ;;  %v1398_v57 = vstv %s4370_s30  ;;  %s2465_s29 = scalar_lea.vmem %s4600_s25, 1024  ;;  %s2535_s30 = smov [#allocation5]  }
 0x134   : > { %v1373_v23 = vstv %s4372_s3  ;;  %v1395_v55 = vmul.f32 %v4338_v62, %v1394_v45  ;;  %v1427_v21 = vstv %s4378_s4  ;;  %v1363_v47 = vadd.f32 %v1362_v50, %v4282_v42  ;;  %p2466_p9 = scmp.ne.s32.totalorder %s4600_s25, %s2465_s29  ;;  %s2469_s3 = sshll.u32 %s2535_s30, 4  ;;  %s2470_s3 = int_to_ptr.vmem [resolvable:$false] %s2469_s3 }
 0x135   : > { %v4296_v58 = vpop.permute.xlu1 %1535  ;;  %v4298_v29 = vpop.permute.xlu0 %1527  ;;  %v1370_v26 = vmul.f32 %v4327_v31, %v1369_v0  ;;  %v1417_v25 = vadd.f32 %v1416_v44, %v1384_v32  ;;  %v1413_v61 = vadd.f32 %v1412_v10, %v1380_v15  ;;  %v1388_v46 = vadd.f32 %v1387_v33, %v1355_v39  ;;  %s2471_s4 = scalar_lea.vmem %s2470_s3, 2048  ;;  %p2472_p13 = scmp.lt.s32.totalorder %s4600_s25, %s2470_s3 }
 0x136   : > { %v1402_v27 = vstv %s4384_s14  ;;  %v1392_v5 = vadd.f32 %v1391_v56, %v1359_v8  ;;  %v1453_v2 = vmul.f32 %v4365_v4, %v1452_v13  ;;  %v1431_v11 = vstv %s4390_s5  ;;  %p2467_p10 = pnand %p2466_p9, %p2591_p5  ;;  %p2473_p0 = scmp.lt.s32.totalorder %s2471_s4, %s2465_s29 }
 0x137   : > { %v1374_v3 = vmul.f32 %v4327_v31, %v1373_v23  ;;  %v1399_v42 = vmul.f32 %v4338_v62, %v1398_v57  ;;  %v1367_v18 = vadd.f32 %v1366_v60, %v4280_v34  ;;  %v1460_v44 = vstv %s4400_s0 }
 0x138   : > { %v1406_v10 = vstv %s4402_s6  ;;  %v1428_v56 = vmul.f32 %v4352_v54, %v1427_v21  ;;  %v1396_v19 = vadd.f32 %v1395_v55, %v1363_v47  ;;  %v1403_v1 = vmul.f32 %v4338_v62, %v1402_v27  ;;  %p2468_p12 = pneg %p2467_p10  ;;  %p2474_p1 = por %p2473_p0, %p2472_p13 }
 0x139   : > { %v4310_v17 = vpop.permute.xlu1 %1551  ;;  %v4312_v52 = vpop.permute.xlu0 %1543  ;;  %v1371_v31 = vadd.f32 %v1370_v26, %v4290_v63  ;;  %v1450_v33 = vadd.f32 %v1449_v28, %v1417_v25  ;;  %v1446_v6 = vadd.f32 %v1445_v41, %v1413_v61  ;;  %v1421_v50 = vadd.f32 %v1420_v20, %v1388_v46 }
 0x13a   : > { %v1435_v45 = vstv %s4410_s1  ;;  %v1457_v32 = vmul.f32 %v4365_v4, %v1456_v37  ;;  %v1425_v34 = vadd.f32 %v1424_v7, %v1392_v5  ;;  %v1407_v15 = vmul.f32 %v4338_v62, %v1406_v10  ;;  %p2475_p2 = pnand %p2474_p1, %p2468_p12 }
 0x13b   : > { %v1375_v39 = vadd.f32 %v1374_v3, %v4288_v35  ;;  %v1432_v13 = vmul.f32 %v4352_v54, %v1431_v11  ;;  %v1464_v60 = vstv %s4423_s7  ;;  %v1400_v57 = vadd.f32 %v1399_v42, %v1367_v18 }
 0x13c   : > { %v1439_v63 = vstv %s4426_s17  ;;  %v1461_v28 = vmul.f32 %v4365_v4, %v1460_v44  ;;  %v1429_v41 = vadd.f32 %v1428_v56, %v1396_v19  ;;  %v1436_v37 = vmul.f32 %v4352_v54, %v1435_v45 }
 0x13d   : > { %v4329_v51 = vpop.permute.xlu1 %1567  ;;  %v4331_v22 = vpop.permute.xlu0 %1559  ;;  %v1404_v7 = vadd.f32 %v1403_v1, %v1371_v31  ;;  %v1490_v20 = vadd.f32 %v4273_v9, %v1450_v33  ;;  %v1482_v62 = vadd.f32 %v4275_v53, %v1446_v6  ;;  %v1454_v35 = vadd.f32 %v1453_v2, %v1421_v50 }
 0x13e   : > { %v1468_v23 = vstv %s4433_s22  ;;  %v1458_v55 = vadd.f32 %v1457_v32, %v1425_v34  ;;  %v1465_v21 = vmul.f32 %v4365_v4, %v1464_v60  ;;  %v1440_v47 = vmul.f32 %v4352_v54, %v1439_v63 }
 0x13f   : > { %v1408_v26 = vadd.f32 %v1407_v15, %v1375_v39  ;;  %v1433_v46 = vadd.f32 %v1432_v13, %v1400_v57  ;;  %v1472_v27 = vstv %s4444_s8  ;;  %v1554_v5 = vadd.f32 %v4310_v17, %v1490_v20 }
 0x140   : > { %v1546_v11 = vadd.f32 %v4312_v52, %v1482_v62  ;;  %v1462_v3 = vadd.f32 %v1461_v28, %v1429_v41  ;;  %v1469_v9 = vmul.f32 %v4365_v4, %v1468_v23  ;;  %v1437_v53 = vadd.f32 %v1436_v37, %v1404_v7 }
 0x141   : > { %v4359_v12 = vpop.permute.xlu1 %1583  ;;  %v4361_v49 = vpop.permute.xlu0 %1575  ;;  %v1498_v2 = vadd.f32 %v4286_v43, %v1454_v35  ;;  %v1506_v54 = vadd.f32 %v4284_v30, %v1458_v55  ;;  %v1473_v44 = vmul.f32 %v4365_v4, %v1472_v27  ;;  %v1441_v10 = vadd.f32 %v1440_v47, %v1408_v26 }
 0x142   : > { %v1466_v17 = vadd.f32 %v1465_v21, %v1433_v46  ;;  %v1514_v43 = vadd.f32 %v4294_v16, %v1462_v3 }
 0x143   : > { %v1562_v52 = vadd.f32 %v4331_v22, %v1498_v2  ;;  %v1474_v6 = vadd.f32 %v1473_v44, %v1441_v10 }
 0x144   : > { %v1522_v22 = vadd.f32 %v4292_v14, %v1466_v17  ;;  %v1578_v32 = vadd.f32 %v4361_v49, %v1514_v43 }
 0x145   : > { %v4392_v48 = vpop.permute.xlu1 %1599  ;;  %v4394_v38 = vpop.permute.xlu0 %1591  ;;  %v1538_v60 = vadd.f32 %v4296_v58, %v1474_v6 }
 0x149   : > { %v4416_v40 = vpop.permute.xlu1 %1615  ;;  %v4418_v24 = vpop.permute.xlu0 %1607 }
 0x14a   : > { %v1618_v42 = vadd.f32 %v4416_v40, %v1554_v5  ;;  %v1610_v18 = vadd.f32 %v4418_v24, %v1546_v11  ;;  %v1470_v40 = vadd.f32 %v1469_v9, %v1437_v53  ;;  %v1570_v24 = vadd.f32 %v4329_v51, %v1506_v54 }
 0x14c   : > { %v1530_v51 = vadd.f32 %v4298_v29, %v1470_v40  ;;  %v1602_v29 = vadd.f32 %v4392_v48, %v1538_v60 }
 0x14d   : > { %v4438_v36 = vpop.permute.xlu1 %1631  ;;  %v1624_v59 = vpop.permute.xlu0 %1623 }
 0x14e   : > { %v1626_v33 = vadd.f32 %v1624_v59, %v1562_v52  ;;  %v1634_v16 = vadd.f32 %v4438_v36, %v1570_v24  ;;  %v1586_v59 = vadd.f32 %v4359_v12, %v1522_v22  ;;  %v1594_v49 = vadd.f32 %v4394_v38, %v1530_v51 }
 0x151   : > { %v4453_v0 = vpop.permute.xlu1 %1647  ;;  %v1640_v8 = vpop.permute.xlu0 %1639 }
 0x152   : > { %v1642_v15 = vadd.f32 %v1640_v8, %v1578_v32  ;;  %v1650_v36 = vadd.f32 %v4453_v0, %v1586_v59 }
 0x155   : > { %v1664_v25 = vpop.permute.xlu1 %1663  ;;  %v1656_v61 = vpop.permute.xlu0 %1655 }
 0x156   : > { %v1658_v12 = vadd.f32 %v1656_v61, %v1594_v49  ;;  %v1666_v38 = vadd.f32 %v1664_v25, %v1602_v29 }
 0x159   : > { %v1680_v56 = vpop.permute.xlu1 %1679  ;;  %v1672_v19 = vpop.permute.xlu0 %1671 }
 0x15a   : > { %v4475_v1 = vadd.f32 %v1680_v56, %v1618_v42  ;;  %v4477_v31 = vadd.f32 %v1672_v19, %v1610_v18 }
 0x15c   : > { %v1735_v30 = vsel %vm1731_vm0, %v4475_v1, 0.0  ;;  %v1732_v4 = vsel %vm1731_vm0, %v4477_v31, 0.0 }
 0x15d   : > { %v1696_v50 = vpop.permute.xlu1 %1695  ;;  %v1688_v45 = vpop.permute.xlu0 %1687  ;;  %1736 = vadd.xlane.f32.xlu1 %v1735_v30  ;;  %1733 = vadd.xlane.f32.xlu0 %v1732_v4 }
 0x15e   : > { %v4488_v34 = vadd.f32 %v1688_v45, %v1626_v33  ;;  %v4492_v39 = vadd.f32 %v1696_v50, %v1634_v16 }
 0x160   : > { %v1738_v13 = vsel %vm1731_vm0, %v4488_v34, 0.0  ;;  %v1741_v58 = vsel %vm1731_vm0, %v4492_v39, 0.0 }
 0x161   : > { %v1712_v57 = vpop.permute.xlu1 %1711  ;;  %v1704_v14 = vpop.permute.xlu0 %1703  ;;  %1739 = vadd.xlane.f32.xlu0 %v1738_v13 }
 0x162   : > { %v4499_v63 = vadd.f32 %v1704_v14, %v1642_v15  ;;  %v4502_v8 = vadd.f32 %v1712_v57, %v1650_v36 }
 0x164   : > { %v1744_v28 = vsel %vm1731_vm0, %v4499_v63, 0.0  ;;  %v1747_v20 = vsel %vm1731_vm0, %v4502_v8, 0.0 }
 0x165   : > { %v1728_v41 = vpop.permute.xlu1 %1727  ;;  %v1720_v37 = vpop.permute.xlu0 %1719  ;;  %1745 = vadd.xlane.f32.xlu1 %v1744_v28  ;;  %1742 = vadd.xlane.f32.xlu0 %v1741_v58 }
 0x166   : > { %v4508_v7 = vadd.f32 %v1720_v37, %v1658_v12  ;;  %v4510_v0 = vadd.f32 %v1728_v41, %v1666_v38 }
 0x168   : > { %v1750_v48 = vsel %vm1731_vm0, %v4508_v7, 0.0  ;;  %v1753_v62 = vsel %vm1731_vm0, %v4510_v0, 0.0 }
 0x169   : > { %1751 = vadd.xlane.f32.xlu1 %v1750_v48  ;;  %1748 = vadd.xlane.f32.xlu0 %v1747_v20 }
 0x16d   : > { %1754 = vadd.xlane.f32.xlu0 %v1753_v62 }
 0x1ea   : > { %v1737_v35 = vpop.xlane.xlu1 %1736  ;;  %v1734_v23 = vpop.xlane.xlu0 %1733 }
 0x1eb   : > { %v1762_v55 = vrot.slane %v1737_v35, 4  ;;  %v1756_v21 = vrot.slane %v1734_v23, 4 }
 0x1ed   : > { %v1763_v47 = vadd.f32 %v1762_v55, %v1737_v35  ;;  %v1757_v26 = vadd.f32 %v1756_v21, %v1734_v23 }
 0x1ee   : > { %v1740_v25 = vpop.xlane.xlu0 %1739 }
 0x1ef   : > { %v1764_v61 = vrot.slane %v1763_v47, 2  ;;  %v1758_v46 = vrot.slane %v1757_v26, 2  ;;  %v1768_v27 = vrot.slane %v1740_v25, 4 }
 0x1f1   : > { %v1765_v5 = vadd.f32 %v1764_v61, %v1763_v47  ;;  %v1759_v11 = vadd.f32 %v1758_v46, %v1757_v26  ;;  %v1769_v3 = vadd.f32 %v1768_v27, %v1740_v25 }
 0x1f2   : > { %v1746_v9 = vpop.xlane.xlu1 %1745  ;;  %v1743_v53 = vpop.xlane.xlu0 %1742 }
 0x1f3   : > { %v1766_v2 = vrot.slane %v1765_v5, 1  ;;  %v1760_v42 = vrot.slane %v1759_v11, 1  ;;  %v1770_v18 = vrot.slane %v1769_v3, 2  ;;  %v1780_v54 = vrot.slane %v1746_v9, 4 }
 0x1f4   : > { %v1774_v44 = vrot.slane %v1743_v53, 4 }
 0x1f5   : > { %v1767_v10 = vadd.f32 %v1766_v2, %v1765_v5  ;;  %v1761_v56 = vadd.f32 %v1760_v42, %v1759_v11  ;;  %v1771_v19 = vadd.f32 %v1770_v18, %v1769_v3  ;;  %v1781_v17 = vadd.f32 %v1780_v54, %v1746_v9 }
 0x1f6   : > { %v1775_v52 = vadd.f32 %v1774_v44, %v1743_v53  ;;  %v1752_v43 = vpop.xlane.xlu1 %1751  ;;  %v1749_v40 = vpop.xlane.xlu0 %1748 }
 0x1f7   : > { %v1805_v24 = vmul.f32 0.015625, %v1767_v10  ;;  %v1804_v33 = vmul.f32 0.015625, %v1761_v56  ;;  %v1772_v30 = vrot.slane %v1771_v19, 1  ;;  %v1782_v4 = vrot.slane %v1781_v17, 2 }
 0x1f8   : > { %v1776_v6 = vrot.slane %v1775_v52, 2  ;;  %v1792_v50 = vrot.slane %v1752_v43, 4  ;;  %v1786_v45 = vrot.slane %v1749_v40, 4 }
 0x1f9   : > { %v1773_v22 = vadd.f32 %v1772_v30, %v1771_v19  ;;  %v1783_v32 = vadd.f32 %v1782_v4, %v1781_v17  ;;  %v4519_v16 = vsub.f32 %v4475_v1, %v1805_v24  ;;  %v4522_v51 = vsub.f32 %v4477_v31, %v1804_v33 }
 0x1fa   : > { %v1777_v59 = vadd.f32 %v1776_v6, %v1775_v52  ;;  %v1793_v15 = vadd.f32 %v1792_v50, %v1752_v43  ;;  %v1787_v13 = vadd.f32 %v1786_v45, %v1749_v40  ;;  %v1755_v60 = vpop.xlane.xlu0 %1754 }
 0x1fb   : > { %v1806_v57 = vmul.f32 0.015625, %v1773_v22  ;;  %v1784_v14 = vrot.slane %v1783_v32, 1  ;;  %v1798_v49 = vrot.slane %v1755_v60, 4  ;;  %v1821_v36 = vmul.f32 %v4519_v16, %v4519_v16 }
 0x1fc   : > { %v1778_v29 = vrot.slane %v1777_v59, 1  ;;  %v1794_v12 = vrot.slane %v1793_v15, 2  ;;  %v1788_v28 = vrot.slane %v1787_v13, 2  ;;  %v1820_v1 = vmul.f32 %v4522_v51, %v4522_v51 }
 0x1fd   : > { %v1785_v58 = vadd.f32 %v1784_v14, %v1783_v32  ;;  %v1799_v41 = vadd.f32 %v1798_v49, %v1755_v60  ;;  %v1831_v31 = vsel %vm1731_vm0, %v1821_v36, 0.0  ;;  %v4530_v37 = vsub.f32 %v4488_v34, %v1806_v57 }
 0x1fe   : > { %v1779_v38 = vadd.f32 %v1778_v29, %v1777_v59  ;;  %v1795_v48 = vadd.f32 %v1794_v12, %v1793_v15  ;;  %v1789_v20 = vadd.f32 %v1788_v28, %v1787_v13  ;;  %1832 = vadd.xlane.f32.xlu0 %v1831_v31  ;;  %v1828_v62 = vsel %vm1731_vm0, %v1820_v1, 0.0 }
 0x1ff   : > { %v1808_v35 = vmul.f32 0.015625, %v1785_v58  ;;  %v1800_v23 = vrot.slane %v1799_v41, 2  ;;  %1829 = vadd.xlane.f32.xlu1 %v1828_v62  ;;  %v1822_v55 = vmul.f32 %v4530_v37, %v4530_v37 }
 0x200   : > { %v1807_v21 = vmul.f32 0.015625, %v1779_v38  ;;  %v1796_v47 = vrot.slane %v1795_v48, 1  ;;  %v1790_v26 = vrot.slane %v1789_v20, 1 }
 0x201   : > { %v1801_v25 = vadd.f32 %v1800_v23, %v1799_v41  ;;  %v1834_v61 = vsel %vm1731_vm0, %v1822_v55, 0.0  ;;  %v4537_v34 = vsub.f32 %v4499_v63, %v1808_v35 }
 0x202   : > { %v1797_v46 = vadd.f32 %v1796_v47, %v1795_v48  ;;  %v1791_v27 = vadd.f32 %v1790_v26, %v1789_v20  ;;  %v4540_v5 = vsub.f32 %v4492_v39, %v1807_v21 }
 0x203   : > { %v1802_v11 = vrot.slane %v1801_v25, 1  ;;  %1835 = vadd.xlane.f32.xlu1 %v1834_v61  ;;  %v1824_v3 = vmul.f32 %v4537_v34, %v4537_v34 }
 0x204   : > { %v1810_v9 = vmul.f32 0.015625, %v1797_v46  ;;  %v1809_v53 = vmul.f32 0.015625, %v1791_v27  ;;  %v1823_v2 = vmul.f32 %v4540_v5, %v4540_v5 }
 0x205   : > { %v1803_v42 = vadd.f32 %v1802_v11, %v1801_v25  ;;  %v1840_v18 = vsel %vm1731_vm0, %v1824_v3, 0.0 }
 0x206   : > { %v1837_v63 = vsel %vm1731_vm0, %v1823_v2, 0.0  ;;  %v4549_v54 = vsub.f32 %v4508_v7, %v1810_v9  ;;  %v4552_v39 = vsub.f32 %v4502_v8, %v1809_v53 }
 0x207   : > { %v1811_v44 = vmul.f32 0.015625, %v1803_v42  ;;  %1841 = vadd.xlane.f32.xlu1 %v1840_v18  ;;  %1838 = vadd.xlane.f32.xlu0 %v1837_v63 }
 0x208   : > { %v1826_v10 = vmul.f32 %v4549_v54, %v4549_v54  ;;  %v1825_v56 = vmul.f32 %v4552_v39, %v4552_v39 }
 0x209   : > { %v4559_v19 = vsub.f32 %v4510_v0, %v1811_v44 }
 0x20a   : > { %v1846_v17 = vsel %vm1731_vm0, %v1826_v10, 0.0  ;;  %v1843_v7 = vsel %vm1731_vm0, %v1825_v56, 0.0 }
 0x20b   : > { %1847 = vadd.xlane.f32.xlu1 %v1846_v17  ;;  %1844 = vadd.xlane.f32.xlu0 %v1843_v7  ;;  %v1827_v8 = vmul.f32 %v4559_v19, %v4559_v19 }
 0x20d   : > { %v1849_v52 = vsel %vm1731_vm0, %v1827_v8, 0.0 }
 0x20f   : > { %1850 = vadd.xlane.f32.xlu0 %v1849_v52 }
 0x28b   : > { %v1833_v43 = vpop.xlane.xlu0 %1832 }
 0x28c   : > { %v1830_v40 = vpop.xlane.xlu1 %1829  ;;  %v1858_v24 = vrot.slane %v1833_v43, 4 }
 0x28d   : > { %v1852_v33 = vrot.slane %v1830_v40, 4 }
 0x28e   : > { %v1859_v30 = vadd.f32 %v1858_v24, %v1833_v43 }
 0x28f   : > { %v1853_v4 = vadd.f32 %v1852_v33, %v1830_v40 }
 0x290   : > { %v1860_v0 = vrot.slane %v1859_v30, 2  ;;  %v1836_v6 = vpop.xlane.xlu1 %1835 }
 0x291   : > { %v1854_v50 = vrot.slane %v1853_v4, 2  ;;  %v1864_v45 = vrot.slane %v1836_v6, 4 }
 0x292   : > { %v1861_v22 = vadd.f32 %v1860_v0, %v1859_v30 }
 0x293   : > { %v1855_v32 = vadd.f32 %v1854_v50, %v1853_v4  ;;  %v1865_v59 = vadd.f32 %v1864_v45, %v1836_v6 }
 0x294   : > { %v1862_v15 = vrot.slane %v1861_v22, 1  ;;  %v1842_v13 = vpop.xlane.xlu1 %1841  ;;  %v1839_v60 = vpop.xlane.xlu0 %1838 }
 0x295   : > { %v1856_v57 = vrot.slane %v1855_v32, 1  ;;  %v1866_v14 = vrot.slane %v1865_v59, 2  ;;  %v1876_v49 = vrot.slane %v1842_v13, 4  ;;  %v1870_v36 = vrot.slane %v1839_v60, 4 }
 0x296   : > { %v1863_v29 = vadd.f32 %v1862_v15, %v1861_v22 }
 0x297   : > { %v1857_v12 = vadd.f32 %v1856_v57, %v1855_v32  ;;  %v1867_v28 = vadd.f32 %v1866_v14, %v1865_v59  ;;  %v1877_v1 = vadd.f32 %v1876_v49, %v1842_v13  ;;  %v1871_v58 = vadd.f32 %v1870_v36, %v1839_v60 }
 0x298   : > { %v1901_v41 = vmul.f32 0.015625, %v1863_v29  ;;  %v1848_v31 = vpop.xlane.xlu1 %1847  ;;  %v1845_v38 = vpop.xlane.xlu0 %1844 }
 0x299   : > { %v1900_v48 = vmul.f32 0.015625, %v1857_v12  ;;  %v1868_v20 = vrot.slane %v1867_v28, 1  ;;  %v1878_v62 = vrot.slane %v1877_v1, 2  ;;  %v1872_v35 = vrot.slane %v1871_v58, 2 }
 0x29a   : > { %v1909_v23 = vadd.f32 1e-05, %v1901_v41  ;;  %v1888_v55 = vrot.slane %v1848_v31, 4  ;;  %v1882_v21 = vrot.slane %v1845_v38, 4 }
 0x29b   : > { %v1908_v47 = vadd.f32 1e-05, %v1900_v48  ;;  %v1869_v26 = vadd.f32 %v1868_v20, %v1867_v28  ;;  %v1879_v25 = vadd.f32 %v1878_v62, %v1877_v1  ;;  %v1873_v61 = vadd.f32 %v1872_v35, %v1871_v58 }
 0x29c   : > { %2430 = vrsqrt.f32 %v1909_v23  ;;  %v1889_v46 = vadd.f32 %v1888_v55, %v1848_v31  ;;  %v1883_v27 = vadd.f32 %v1882_v21, %v1845_v38  ;;  %v1851_v11 = vpop.xlane.xlu0 %1850 }
 0x29d   : > { %2432 = vrsqrt.f32 %v1908_v47  ;;  %v1902_v3 = vmul.f32 0.015625, %v1869_v26  ;;  %v1880_v9 = vrot.slane %v1879_v25, 1  ;;  %v1874_v53 = vrot.slane %v1873_v61, 1 }
 0x29e   : > { %v1890_v2 = vrot.slane %v1889_v46, 2  ;;  %v1884_v42 = vrot.slane %v1883_v27, 2  ;;  %v1894_v18 = vrot.slane %v1851_v11, 4 }
 0x29f   : > { %v1910_v63 = vadd.f32 1e-05, %v1902_v3  ;;  %v1881_v44 = vadd.f32 %v1880_v9, %v1879_v25  ;;  %v1875_v10 = vadd.f32 %v1874_v53, %v1873_v61 }
 0x2a0   : > { %v1891_v56 = vadd.f32 %v1890_v2, %v1889_v46  ;;  %v1885_v17 = vadd.f32 %v1884_v42, %v1883_v27  ;;  %v1895_v7 = vadd.f32 %v1894_v18, %v1851_v11 }
 0x2a1   : > { %2434 = vrsqrt.f32 %v1910_v63  ;;  %v1904_v8 = vmul.f32 0.015625, %v1881_v44  ;;  %v1903_v52 = vmul.f32 0.015625, %v1875_v10 }
 0x2a2   : > { %v1892_v43 = vrot.slane %v1891_v56, 1  ;;  %v1886_v40 = vrot.slane %v1885_v17, 1  ;;  %v1896_v24 = vrot.slane %v1895_v7, 2 }
 0x2a3   : > { %v1912_v33 = vadd.f32 1e-05, %v1904_v8  ;;  %v1911_v30 = vadd.f32 1e-05, %v1903_v52 }
 0x2a4   : > { %v1893_v4 = vadd.f32 %v1892_v43, %v1891_v56  ;;  %v1887_v0 = vadd.f32 %v1886_v40, %v1885_v17  ;;  %v1897_v6 = vadd.f32 %v1896_v24, %v1895_v7 }
 0x2a5   : > { %2436 = vrsqrt.f32 %v1912_v33 }
 0x2a6   : > { %v2431_v50 = vpop.eup %2430  ;;  %2438 = vrsqrt.f32 %v1911_v30  ;;  %v1906_v45 = vmul.f32 0.015625, %v1893_v4  ;;  %v1905_v22 = vmul.f32 0.015625, %v1887_v0  ;;  %v1898_v32 = vrot.slane %v1897_v6, 1 }
 0x2a7   : > { %v2433_v59 = vpop.eup %2432  ;;  %v1925_v15 = vmul.f32 %v2431_v50, %v4519_v16 }
 0x2a8   : > { %v1924_v13 = vmul.f32 %v2433_v59, %v4522_v51  ;;  %v1914_v60 = vadd.f32 1e-05, %v1906_v45  ;;  %v1913_v57 = vadd.f32 1e-05, %v1905_v22  ;;  %v1899_v14 = vadd.f32 %v1898_v32, %v1897_v6 }
 0x2a9   : > { %vm1933_vm1 = vcmp.ge.f32.partialorder %v1925_v15, 0.0  ;;  %v1941_v49 = vmul.f32 0.2, %v1925_v15 }
 0x2aa   : > { %vm1932_vm2 = vcmp.ge.f32.partialorder %v1924_v13, 0.0  ;;  %v1940_v36 = vmul.f32 0.2, %v1924_v13  ;;  %2440 = vrsqrt.f32 %v1914_v60  ;;  %v1907_v29 = vmul.f32 0.015625, %v1899_v14 }
 0x2ab   : > { %v2435_v12 = vpop.eup %2434  ;;  %v1949_v28 = vsel %vm1933_vm1, %v1925_v15, %v1941_v49  ;;  %2442 = vrsqrt.f32 %v1913_v57 }
 0x2ac   : > { %v1948_v1 = vsel %vm1932_vm2, %v1924_v13, %v1940_v36  ;;  %1957 = vst.msk [vmem:[%s4571_s23 + $0x8] sm:$0xff] %vm1731_vm0, %v1949_v28  ;;  %v1926_v16 = vmul.f32 %v2435_v12, %v4530_v37  ;;  %v1915_v51 = vadd.f32 1e-05, %v1907_v29 }
 0x2ad   : > { %1956 = vst.msk [vmem:[%s4571_s23] sm:$0xff] %vm1731_vm0, %v1948_v1 }
 0x2ae   : > { %vm1934_vm3 = vcmp.ge.f32.partialorder %v1926_v16, 0.0  ;;  %v1942_v58 = vmul.f32 0.2, %v1926_v16  ;;  %2444 = vrsqrt.f32 %v1915_v51 }
 0x2af   : > { %v2437_v41 = vpop.eup %2436 }
 0x2b0   : > { %v2439_v31 = vpop.eup %2438  ;;  %v1950_v38 = vsel %vm1934_vm3, %v1926_v16, %v1942_v58  ;;  %v1928_v48 = vmul.f32 %v2437_v41, %v4537_v34 }
 0x2b1   : > { %1958 = vst.msk [vmem:[%s4571_s23 + $0x10] sm:$0xff] %vm1731_vm0, %v1950_v38  ;;  %v1927_v20 = vmul.f32 %v2439_v31, %v4540_v5 }
 0x2b2   : > { %vm1936_vm4 = vcmp.ge.f32.partialorder %v1928_v48, 0.0  ;;  %v1944_v62 = vmul.f32 0.2, %v1928_v48 }
 0x2b3   : > { %vm1935_vm5 = vcmp.ge.f32.partialorder %v1927_v20, 0.0  ;;  %v1943_v37 = vmul.f32 0.2, %v1927_v20 }
 0x2b4   : > { %v2441_v35 = vpop.eup %2440  ;;  %v1952_v23 = vsel %vm1936_vm4, %v1928_v48, %v1944_v62 }
 0x2b5   : > { %v2443_v55 = vpop.eup %2442  ;;  %1960 = vst.msk [vmem:[%s4571_s23 + $0x20] sm:$0xff] %vm1731_vm0, %v1952_v23  ;;  %v1951_v21 = vsel %vm1935_vm5, %v1927_v20, %v1943_v37  ;;  %v1930_v34 = vmul.f32 %v2441_v35, %v4549_v54 }
 0x2b6   : > { %1959 = vst.msk [vmem:[%s4571_s23 + $0x18] sm:$0xff] %vm1731_vm0, %v1951_v21  ;;  %v1929_v5 = vmul.f32 %v2443_v55, %v4552_v39 }
 0x2b7   : > { %vm1938_vm6 = vcmp.ge.f32.partialorder %v1930_v34, 0.0  ;;  %v1946_v47 = vmul.f32 0.2, %v1930_v34 }
 0x2b8   : > { %v2445_v26 = vpop.eup %2444  ;;  %vm1937_vm7 = vcmp.ge.f32.partialorder %v1929_v5, 0.0  ;;  %v1945_v25 = vmul.f32 0.2, %v1929_v5 }
 0x2b9   : > { %v1954_v61 = vsel %vm1938_vm6, %v1930_v34, %v1946_v47  ;;  %v1931_v46 = vmul.f32 %v2445_v26, %v4559_v19 }
 0x2ba   : > { %1962 = vst.msk [vmem:[%s4571_s23 + $0x30] sm:$0xff] %vm1731_vm0, %v1954_v61  ;;  %v1953_v54 = vsel %vm1937_vm7, %v1929_v5, %v1945_v25 }
 0x2bb   : > { %1961 = vst.msk [vmem:[%s4571_s23 + $0x28] sm:$0xff] %vm1731_vm0, %v1953_v54  ;;  %vm1939_vm8 = vcmp.ge.f32.partialorder %v1931_v46, 0.0  ;;  %v1947_v39 = vmul.f32 0.2, %v1931_v46 }
 0x2bd   : > { %v1955_v27 = vsel %vm1939_vm8, %v1931_v46, %v1947_v39 }
 0x2be   : > { %1963 = vst.msk [vmem:[%s4571_s23 + $0x38] sm:$0xff] %vm1731_vm0, %v1955_v27 }
 0x2bf   : > { %2478 = shalt.err (!%p2475_p2)
}
 0x2c0   : > { %s2479_s14 = scalar_lea.hbm %s4598_s28, 1024  ;;  %s2483_s6 = scalar_lea.hbm %s4649_s2, 2048 }
 0x2c1   : > { %p2480_p3 = scmp.ne.s32.totalorder %s4598_s28, %s2479_s14  ;;  %p2484_p8 = scmp.lt.u32.totalorder %s4598_s28, %s4649_s2 }
 0x2c2   : > { %p2485_p11 = scmp.lt.u32.totalorder %s2483_s6, %s2479_s14  ;;  %p2487_p10 = scmp.lt.u32.totalorder %s2479_s14, %s4598_s28 }
 0x2c3   : > { %p2481_p4 = pnand %p2480_p3, %p2591_p5 }
 0x2c4   : > { %p2486_p9 = por %p2485_p11, %p2484_p8 }
 0x2c5   : > { %p2482_p7 = pneg %p2481_p4 }
 0x2c6   : > { %p2488_p12 = por %p2487_p10, %p2486_p9 }
 0x2c8   : > { %p2489_p13 = pnand %p2488_p12, %p2482_p7 }
 0x2ca   : > { %2492 = shalt.err (!%p2489_p13)
}
 0x2cb   : > { %s2536_s17 = smov 128   ;;  %s2537_s22 = smov 8  }
 0x2cc   : > { %2381 = dma.vmem_to_hbm [thread:$0]  (%p2591_p5), %s4600_s25, 1024, %s4598_s28, %s4606_s13, %s2536_s17, %s2536_s17, %s2537_s22  }
 0x2cd PF: > { %p2393_p0 = scmp.ge.s32.totalorder %s2531_s12, 2  ;;  %s1993_s8 = sand.u32 1, %s2519_s9  }
 0x2ce   : > { %s1994_s16 = scalar_lea.sflag [#allocation3], %s1993_s8 }
 0x2cf   : > { %p2388_p1 = pnand %p2393_p0, %p2595_p6 }
 0x2d1   : > { %2514 = dma.done.wait (!%p2388_p1), %s1994_s16, 1024  }
 0x2d2   : > { %2516 = vsyncadd (!%p2388_p1), %s1994_s16, 4294966272  ;;  %p13_p2 = scmp.ge.s32.totalorder %s2578_s15, 4   ;;  %s4722_s9 = smov %s2523_s10 }
 0x2d3   : > { %s4723_s10 = smov %s2527_s11  ;;  %s4724_s11 = smov %s2589_s18 }
 0x2d4   : > { %s4725_s12 = smov %s2578_s15  ;;  %15 = sbr.rel (!%p13_p2) target bundleno = 7 (0x7), region = 83 }
 0x2db   :  { %1999 = vsyncpa [#allocation3], 1 }
 0x2dc   :  { %2001 = vsyncpa [#allocation3 + $0x1], 1 }
 0x2dd   :  { %2002 = vsyncpa [#allocation4], 1 }
 0x2de   :  { %2004 = vsyncpa [#allocation4 + $0x1], 1 }

</bundles_post_ra>
